<compile_context>
chip_gen: v7x
topology: tpu7x:2x2x1
jax: 0.10.0
libtpu: 0.0.40
codegen_flags: <defaults>
</compile_context>

<pallas_src>
import functools
import math

import jax
import jax.numpy as jnp
from jax import lax
from jax.experimental import pallas as pl
from jax.experimental.pallas import tpu as pltpu

_LANE = 128


def _round_up(x, m):
    return (x + m - 1) // m * m


# ----------------------------------------------------------------------------
# Generation-aware knobs (guarded: fall back to conservative v7x-safe values)
# ----------------------------------------------------------------------------
@functools.lru_cache(maxsize=None)
def _vmem_capacity_bytes():
    try:
        info = pltpu.get_tpu_info()
        for name in ("vmem_capacity_bytes", "vmem_size_bytes", "vmem_bytes"):
            v = getattr(info, name, None)
            if v:
                return int(v)
    except Exception:
        pass
    return 64 * 1024 * 1024          # conservative (v7x-sized) default


def _vmem_limit():
    # v5e/v6e: 128 MiB physical VMEM -> larger scoped budget; v7x: 64 MiB.
    big = _vmem_capacity_bytes() >= 100 * 1024 * 1024
    return (64 if big else 32) * 1024 * 1024


def _m_tile_target():
    # Bigger M tiles on the 128 MiB-VMEM generations (tile 512 ~85% of HBM
    # roofline vs ~63% at 256); keep 256 on v7x (64 MiB VMEM, 3.2 TB/s HBM).
    big = _vmem_capacity_bytes() >= 100 * 1024 * 1024
    return 512 if big else 256


@functools.lru_cache(maxsize=None)
def _single_buffer_ok():
    """Probe whether BlockSpec(pipeline_mode=pl.Buffered(1)) is supported."""
    if not hasattr(pl, "Buffered"):
        return False

    def _copy(x_ref, o_ref):
        o_ref[...] = x_ref[...]

    try:
        fn = pl.pallas_call(
            _copy,
            out_shape=jax.ShapeDtypeStruct((8, 128), jnp.float32),
            grid=(2,),
            in_specs=[pl.BlockSpec((8, 128), lambda i: (0, 0),
                                   pipeline_mode=pl.Buffered(1))],
            out_specs=pl.BlockSpec((8, 128), lambda i: (0, 0)),
        )
        jax.block_until_ready(fn(jnp.zeros((8, 128), jnp.float32)))
        return True
    except Exception:
        return False


def _const_spec(block_shape):
    """BlockSpec for a block whose index never changes across the grid
    (weights / biases): single-buffered when supported."""
    nd = len(block_shape)
    idx = lambda *args: (0,) * nd
    if _single_buffer_ok():
        return pl.BlockSpec(block_shape, idx, pipeline_mode=pl.Buffered(1))
    return pl.BlockSpec(block_shape, idx)


def _pick_tile(m, target):
    """Largest M tile <= target (multiple of 16) that still yields >=2 grid
    steps; returns (tile, padded_m)."""
    t = target
    while t > 16 and _round_up(m, t) // t < 2:
        t //= 2
    t = max(t, 16)
    mp = _round_up(m, t)
    return t, mp


def _pick_conv_rows(n, h, w, target):
    """Largest divisor th of h with th*w <= target output rows per tile, then
    halve (while possible) until the grid has >=2 parallel steps."""
    best = 1
    for th in range(1, h + 1):
        if h % th == 0 and th * w <= target:
            best = th
    while n * (h // best) < 2 and best % 2 == 0:
        best //= 2
    return best


# ----------------------------------------------------------------------------
# Pallas kernels
# ----------------------------------------------------------------------------
def _mm_bias_kernel(x_ref, w_ref, b_ref, o_ref, *, relu):
    # (TM, K) @ (K, C) on the MXU; BN scale pre-folded into W, bias-only epilogue.
    acc = jnp.dot(x_ref[...], w_ref[...], preferred_element_type=jnp.float32)
    y = acc + b_ref[...]
    if relu:
        y = jnp.maximum(y, 0.0)
    o_ref[...] = y.astype(o_ref.dtype)


def _mm_bias_res_kernel(x_ref, w_ref, b_ref, r_ref, o_ref, *, relu):
    # Same, fused with the (bf16) residual add + final ReLU (end of the block).
    acc = jnp.dot(x_ref[...], w_ref[...], preferred_element_type=jnp.float32)
    y = acc + b_ref[...] + r_ref[...].astype(jnp.float32)
    if relu:
        y = jnp.maximum(y, 0.0)
    o_ref[...] = y.astype(o_ref.dtype)


def _mm_dual_kernel(x_ref, w1_ref, b1_ref, wd_ref, bd_ref, o1_ref, od_ref):
    # conv1(1x1)+bn1+relu and downsample(1x1)+bn, fused: x tile read once.
    x = x_ref[...]
    y1 = jnp.dot(x, w1_ref[...], preferred_element_type=jnp.float32) + b1_ref[...]
    o1_ref[...] = jnp.maximum(y1, 0.0).astype(o1_ref.dtype)
    yd = jnp.dot(x, wd_ref[...], preferred_element_type=jnp.float32) + bd_ref[...]
    od_ref[...] = yd.astype(od_ref.dtype)


def _conv3x3_kernel(slab_ref, w_ref, b_ref, o_ref, *, relu, rows, wo):
    """3x3 / stride-1 conv for one spatial row-tile.

    slab_ref: (rows + 2*wo, 3C)  channel-concatenated dx taps of the padded image.
    w_ref:    (3, 3C, Cout)      per-dy weights (dx concatenated along K).
    b_ref:    (1, Cout)          folded BN bias.
    o_ref:    (rows, Cout)
    """
    acc = jnp.dot(slab_ref[pl.ds(0, rows), :], w_ref[0],
                  preferred_element_type=jnp.float32)
    for dy in (1, 2):
        acc = acc + jnp.dot(slab_ref[pl.ds(dy * wo, rows), :], w_ref[dy],
                            preferred_element_type=jnp.float32)
    y = acc + b_ref[...]
    if relu:
        y = jnp.maximum(y, 0.0)
    o_ref[...] = y.astype(o_ref.dtype)


# ----------------------------------------------------------------------------
# Wrappers
# ----------------------------------------------------------------------------
def fused_matmul_bn(x2d, wmat, bias, *, relu, residual=None,
                    out_dtype=jnp.float32):
    """1x1 conv + folded BN (+ bf16 residual) (+ ReLU):  (M, K) @ (K, C)."""
    m, k = x2d.shape
    k2, cout = wmat.shape
    assert k == k2
    tm, mp = _pick_tile(m, _m_tile_target())
    if mp != m:
        x2d = jnp.pad(x2d, ((0, mp - m), (0, 0)))
        if residual is not None:
            residual = jnp.pad(residual, ((0, mp - m), (0, 0)))

    in_specs = [pl.BlockSpec((tm, k), lambda i: (i, 0)),
                _const_spec((k, cout)),
                _const_spec((1, cout))]
    args = [x2d, wmat, bias]
    if residual is None:
        kernel = functools.partial(_mm_bias_kernel, relu=relu)
    else:
        in_specs.append(pl.BlockSpec((tm, cout), lambda i: (i, 0)))
        args.append(residual)
        kernel = functools.partial(_mm_bias_res_kernel, relu=relu)

    out = pl.pallas_call(
        kernel,
        out_shape=jax.ShapeDtypeStruct((mp, cout), out_dtype),
        grid=(mp // tm,),
        in_specs=in_specs,
        out_specs=pl.BlockSpec((tm, cout), lambda i: (i, 0)),
        compiler_params=pltpu.CompilerParams(
            dimension_semantics=("parallel",),
            vmem_limit_bytes=_vmem_limit()),
    )(*args)
    return out if mp == m else out[:m]


def fused_conv1_downsample(x2d, w1, b1, wd, bd):
    """conv1(1x1)+bn1+relu and downsample(1x1)+bn in ONE pallas_call (x read once)."""
    m, k = x2d.shape
    c1 = w1.shape[1]
    cd = wd.shape[1]
    tm, mp = _pick_tile(m, _m_tile_target())
    if mp != m:
        x2d = jnp.pad(x2d, ((0, mp - m), (0, 0)))

    out1, outd = pl.pallas_call(
        _mm_dual_kernel,
        out_shape=(jax.ShapeDtypeStruct((mp, c1), jnp.bfloat16),
                   jax.ShapeDtypeStruct((mp, cd), jnp.bfloat16)),
        grid=(mp // tm,),
        in_specs=[pl.BlockSpec((tm, k), lambda i: (i, 0)),
                  _const_spec((k, c1)),
                  _const_spec((1, c1)),
                  _const_spec((k, cd)),
                  _const_spec((1, cd))],
        out_specs=[pl.BlockSpec((tm, c1), lambda i: (i, 0)),
                   pl.BlockSpec((tm, cd), lambda i: (i, 0))],
        compiler_params=pltpu.CompilerParams(
            dimension_semantics=("parallel",),
            vmem_limit_bytes=_vmem_limit()),
    )(x2d, w1, b1, wd, bd)
    if mp != m:
        out1, outd = out1[:m], outd[:m]
    return out1, outd


def fused_conv3x3_bn(x_nhwc, w_cat, bias, *, relu, out_dtype=jnp.float32):
    """3x3, stride-1, pad-1 conv + folded BN (+ ReLU), row-tiled over the grid.

    w_cat: (3, 3*C, Cout) — per-dy weights, the 3 dx taps concatenated along the
    input-channel axis (matches the channel-concatenated slab layout).
    """
    n, h, w, c = x_nhwc.shape
    cout = w_cat.shape[-1]
    th = _pick_conv_rows(n, h, w, _m_tile_target())
    n_tiles = h // th
    rows = th * w

    xp = jnp.pad(x_nhwc, ((0, 0), (1, 1), (1, 1), (0, 0)))       # (n, h+2, w+2, c)
    # dx taps become channel blocks -> one (h+2, w, 3C) slab per image.
    slab = jnp.concatenate([xp[:, :, dx:dx + w, :] for dx in range(3)], axis=-1)
    if n_tiles == 1:
        wins = slab.reshape(n, (h + 2) * w, 3 * c)
    else:
        # Halo-duplicated row windows: tile j needs padded rows [j*th, j*th+th+2),
        # duplicating the 2-row halo keeps BlockSpec indexing non-overlapping.
        # TODO(synk): a manual-DMA (memory_space=pl.ANY) halo fetch would avoid
        # materializing this (th+2)/th-inflated copy in HBM (matters most on v5e).
        wins = jnp.stack(
            [slab[:, j * th:j * th + th + 2] for j in range(n_tiles)], axis=1)
        wins = wins.reshape(n * n_tiles, (th + 2) * w, 3 * c)

    kernel = functools.partial(_conv3x3_kernel, relu=relu, rows=rows, wo=w)
    out = pl.pallas_call(
        kernel,
        out_shape=jax.ShapeDtypeStruct((n * n_tiles, rows, cout), out_dtype),
        grid=(n * n_tiles,),
        in_specs=[pl.BlockSpec((None, (th + 2) * w, 3 * c), lambda i: (i, 0, 0)),
                  _const_spec((3, 3 * c, cout)),
                  _const_spec((1, cout))],
        out_specs=pl.BlockSpec((None, rows, cout), lambda i: (i, 0, 0)),
        compiler_params=pltpu.CompilerParams(
            dimension_semantics=("parallel",),
            vmem_limit_bytes=_vmem_limit()),
    )(wins, w_cat, bias)
    return out.reshape(n, h, w, cout)


# ----------------------------------------------------------------------------
# Parameter init + BN folding (inference mode, mirrors init_weights semantics)
# ----------------------------------------------------------------------------
def _conv_init(key, cout, cin, kh, kw):
    n = kh * kw * cout
    std = math.sqrt(2.0 / n)
    return jax.random.normal(key, (cout, cin, kh, kw), jnp.float32) * std


def _bn_eval_fold(c, eps=1e-5):
    # BN in eval mode at init: gamma=1, beta=0, running_mean=0, running_var=1.
    gamma = jnp.ones((c,), jnp.float32)
    beta = jnp.zeros((c,), jnp.float32)
    mean = jnp.zeros((c,), jnp.float32)
    var = jnp.ones((c,), jnp.float32)
    scale = gamma / jnp.sqrt(var + eps)
    bias = beta - mean * scale
    return scale, bias


def _fold_1x1(w, scale, bias, kpad, cpad):
    cout, cin = w.shape[:2]
    wm = jnp.transpose(w[:, :, 0, 0], (1, 0)) * scale[None, :]        # (Cin, Cout)
    wm = jnp.pad(wm, ((0, kpad - cin), (0, cpad - cout)))
    b = jnp.pad(bias, (0, cpad - cout)).reshape(1, cpad)
    return wm.astype(jnp.bfloat16), b


def _fold_3x3(w, scale, bias, kpad, cpad):
    cout, cin = w.shape[:2]
    wm = jnp.transpose(w, (2, 3, 1, 0)) * scale[None, None, None, :]  # (dy,dx,Cin,Cout)
    wm = jnp.pad(wm, ((0, 0), (0, 0), (0, kpad - cin), (0, cpad - cout)))
    wm = wm.reshape(3, 3 * kpad, cpad)                                # dx-major K blocks
    b = jnp.pad(bias, (0, cpad - cout)).reshape(1, cpad)
    return wm.astype(jnp.bfloat16), b


def init_bottleneck(key, inplanes, planes, *, stride=1, cardinality=1,
                    bottleneck_width=64):
    group_width = int(planes * (bottleneck_width / 64.0)) * cardinality
    c4 = planes * 4
    k1, k2, k3, kd = jax.random.split(key, 4)

    raw = {
        "w1": _conv_init(k1, group_width, inplanes, 1, 1),
        "w2": _conv_init(k2, group_width, group_width, 3, 3),
        "w3": _conv_init(k3, c4, group_width, 1, 1),
    }
    need_down = (stride != 1) or (inplanes != c4)
    if need_down:
        raw["wd"] = _conv_init(kd, c4, inplanes, 1, 1)

    cinp = _round_up(inplanes, _LANE)
    gwp = _round_up(group_width, _LANE)
    c4p = _round_up(c4, _LANE)

    s1, b1 = _bn_eval_fold(group_width)
    s2, b2 = _bn_eval_fold(group_width)
    s3, b3 = _bn_eval_fold(c4)

    params = {}
    params["w1"], params["b1"] = _fold_1x1(raw["w1"], s1, b1, cinp, gwp)
    params["w2"], params["b2"] = _fold_3x3(raw["w2"], s2, b2, gwp, gwp)
    params["w3"], params["b3"] = _fold_1x1(raw["w3"], s3, b3, gwp, c4p)
    if need_down:
        sd, bd = _bn_eval_fold(c4)
        params["wd"], params["bd"] = _fold_1x1(raw["wd"], sd, bd, cinp, c4p)

    meta = {"stride": stride, "c4": c4, "cinp": cinp, "gwp": gwp, "c4p": c4p}
    return params, raw, meta


# ----------------------------------------------------------------------------
# Forward pass
# ----------------------------------------------------------------------------
# TODO(synk): SplAtConv2d (radix>=1 split-attention), SEModule (with_se), avd
#             AvgPool, DropBlock2D, stride>1 and dilation>1 are not implemented;
#             conv2 uses the plain conv3x3+bn2+relu path of the reference code.
def bottleneck_forward(params, x_nchw, *, meta):
    """Bottleneck.forward (inference).  NCHW float32 in, NCHW float32 out."""
    assert meta["stride"] == 1
    n, cin, h, w = x_nchw.shape
    cinp, gwp, c4, c4p = meta["cinp"], meta["gwp"], meta["c4"], meta["c4p"]

    x = jnp.transpose(x_nchw, (0, 2, 3, 1))                           # NHWC
    if cinp != cin:
        x = jnp.pad(x, ((0, 0), (0, 0), (0, 0), (0, cinp - cin)))
    m = n * h * w
    x2d = x.reshape(m, cinp).astype(jnp.bfloat16)

    # conv1 (1x1)+bn1+relu, fused with the downsample (1x1)+bn when present.
    if "wd" in params:
        out, resid = fused_conv1_downsample(x2d, params["w1"], params["b1"],
                                            params["wd"], params["bd"])
    else:
        assert cinp == c4p, "identity residual requires inplanes == planes*4"
        out = fused_matmul_bn(x2d, params["w1"], params["b1"],
                              relu=True, out_dtype=jnp.bfloat16)
        resid = x2d                                                    # identity (bf16)

    # conv2 (3x3, stride 1, pad 1) + bn2 + relu
    out = out.reshape(n, h, w, gwp)
    out = fused_conv3x3_bn(out, params["w2"], params["b2"],
                           relu=True, out_dtype=jnp.bfloat16)
    out2d = out.reshape(m, gwp)

    # conv3 (1x1) + bn3 + residual add + final relu
    out = fused_matmul_bn(out2d, params["w3"], params["b3"],
                          relu=True, residual=resid, out_dtype=jnp.float32)
    out = out[:, :c4].reshape(n, h, w, c4)
    return jnp.transpose(out, (0, 3, 1, 2))                           # NCHW


# ----------------------------------------------------------------------------
# Pure-JAX f32 reference (loose numerical check of the bf16 kernels)
# ----------------------------------------------------------------------------
def _ref_bottleneck(raw, x, eps=1e-5):
    def conv(t, w, pad=0):
        return lax.conv_general_dilated(
            t, w, window_strides=(1, 1), padding=[(pad, pad), (pad, pad)],
            dimension_numbers=("NCHW", "OIHW", "NCHW"),
            precision=lax.Precision.HIGHEST)

    def bn(t):
        return t / jnp.sqrt(1.0 + eps)   # eval BN: gamma=1, beta=0, mean=0, var=1

    out = jax.nn.relu(bn(conv(x, raw["w1"])))
    out = jax.nn.relu(bn(conv(out, raw["w2"], pad=1)))
    out = bn(conv(out, raw["w3"]))
    resid = bn(conv(x, raw["wd"])) if "wd" in raw else x
    return jax.nn.relu(out + resid)


if __name__ == "__main__":
    key = jax.random.PRNGKey(0)
    pkey, xkey = jax.random.split(key)

    # Standard first Bottleneck of layer1: inplanes=64, planes=64 (out 256),
    # stride=1, downsample = conv1x1(64->256) + BN.  Small shapes: batch 2, 16x16.
    N, INPLANES, PLANES, H, W = 2, 64, 64, 16, 16
    params, raw, meta = init_bottleneck(pkey, INPLANES, PLANES, stride=1)

    x = jax.random.normal(xkey, (N, INPLANES, H, W), jnp.float32)

    _single_buffer_ok()          # warm the feature probe outside the main trace
    _vmem_capacity_bytes()       # warm the hardware query (guarded)

    fwd = jax.jit(functools.partial(bottleneck_forward, meta=meta))
    out = fwd(params, x)
    jax.block_until_ready(out)

    assert out.shape == (N, PLANES * 4, H, W), out.shape
    assert bool(jnp.all(jnp.isfinite(out)))

    ref = _ref_bottleneck(raw, x)
    max_err = float(jnp.max(jnp.abs(out - ref)))
    assert bool(jnp.allclose(out, ref, rtol=5e-2, atol=1e-1)), max_err

    print("KERNEL_OK")
</pallas_src>

<mosaic_0001>
module attributes {stable_mosaic.version = 11 : i64} {
  func.func @_copy(%arg0: i32, %arg1: memref<8x128xf32, #tpu.memory_space<vmem>>, %arg2: memref<8x128xf32, #tpu.memory_space<vmem>>) attributes {dimension_semantics = [#tpu.dimension_semantics<arbitrary>], iteration_bounds = array<i64: 2>, scalar_prefetch = 0 : i64, scratch_operands = 0 : i64, tpu.core_type = #tpu.core_type<tc>, window_params = [{pipeline_mode = #tpu.pipeline_mode<synchronous>, transform_indices = @transform_0, window_bounds = array<i64: 8, 128>}, {pipeline_mode = #tpu.pipeline_mode<synchronous>, transform_indices = @transform_1, window_bounds = array<i64: 8, 128>}]} {
    %c0 = arith.constant 0 : index
    %c0_0 = arith.constant 0 : index
    %0 = vector.load %arg1[%c0, %c0_0] : memref<8x128xf32, #tpu.memory_space<vmem>>, vector<8x128xf32>
    %c0_1 = arith.constant 0 : index
    %c0_2 = arith.constant 0 : index
    %1 = vector.load %arg2[%c0_1, %c0_2] : memref<8x128xf32, #tpu.memory_space<vmem>>, vector<8x128xf32>
    tpu.vector_store %arg2[%c0_1, %c0_2], %0 {strides = array<i32>} : memref<8x128xf32, #tpu.memory_space<vmem>>, vector<8x128xf32>,
    return
  }
  func.func @transform_0(%arg0: i32) -> (i32, i32) {
    %c0_i32 = arith.constant 0 : i32
    %c0_i32_0 = arith.constant 0 : i32
    %c0_i32_1 = arith.constant 0 : i32
    return %c0_i32, %c0_i32_0 : i32, i32
  }
  func.func @transform_1(%arg0: i32) -> (i32, i32) {
    %c0_i32 = arith.constant 0 : i32
    %c0_i32_0 = arith.constant 0 : i32
    %c0_i32_1 = arith.constant 0 : i32
    return %c0_i32, %c0_i32_0 : i32, i32
  }
}

module attributes {stable_mosaic.version = 11 : i64} {
  func.func @_mm_dual_kernel(%arg0: i32, %arg1: memref<256x128xbf16, #tpu.memory_space<vmem>>, %arg2: memref<128x128xbf16, #tpu.memory_space<vmem>>, %arg3: memref<1x128xf32, #tpu.memory_space<vmem>>, %arg4: memref<128x256xbf16, #tpu.memory_space<vmem>>, %arg5: memref<1x256xf32, #tpu.memory_space<vmem>>, %arg6: memref<256x128xbf16, #tpu.memory_space<vmem>>, %arg7: memref<256x256xbf16, #tpu.memory_space<vmem>>) attributes {dimension_semantics = [#tpu.dimension_semantics<parallel>], iteration_bounds = array<i64: 2>, scalar_prefetch = 0 : i64, scratch_operands = 0 : i64, tpu.core_type = #tpu.core_type<tc>, window_params = [{transform_indices = @transform_0, window_bounds = array<i64: 256, 128>}, {pipeline_mode = #tpu.pipeline_mode<synchronous>, transform_indices = @transform_1, window_bounds = array<i64: 128, 128>}, {pipeline_mode = #tpu.pipeline_mode<synchronous>, transform_indices = @transform_2, window_bounds = array<i64: 1, 128>}, {pipeline_mode = #tpu.pipeline_mode<synchronous>, transform_indices = @transform_3, window_bounds = array<i64: 128, 256>}, {pipeline_mode = #tpu.pipeline_mode<synchronous>, transform_indices = @transform_4, window_bounds = array<i64: 1, 256>}, {transform_indices = @transform_5, window_bounds = array<i64: 256, 128>}, {transform_indices = @transform_6, window_bounds = array<i64: 256, 256>}]} {
    %c0 = arith.constant 0 : index
    %c0_0 = arith.constant 0 : index
    %0 = vector.load %arg1[%c0, %c0_0] : memref<256x128xbf16, #tpu.memory_space<vmem>>, vector<256x128xbf16>
    %c0_1 = arith.constant 0 : index
    %c0_2 = arith.constant 0 : index
    %1 = vector.load %arg2[%c0_1, %c0_2] : memref<128x128xbf16, #tpu.memory_space<vmem>>, vector<128x128xbf16>
    %cst = arith.constant dense<0.000000e+00> : vector<256x128xf32>
    %2 = tpu.matmul %0, %1, %cst {dimension_numbers = #tpu.dot_dimension_numbers<[1], [0], [0], [1], [0, 0, 1, 1], [], []>} : vector<256x128xbf16>, vector<128x128xbf16>, vector<256x128xf32> -> vector<256x128xf32>
    %c0_3 = arith.constant 0 : index
    %c0_4 = arith.constant 0 : index
    %3 = vector.load %arg3[%c0_3, %c0_4] : memref<1x128xf32, #tpu.memory_space<vmem>>, vector<1x128xf32>
    %4 = vector.broadcast %3 : vector<1x128xf32> to vector<256x128xf32>
    %5 = arith.addf %2, %4 : vector<256x128xf32>
    %cst_5 = arith.constant 0.000000e+00 : f32
    %6 = vector.broadcast %cst_5 : f32 to vector<256x128xf32>
    %7 = arith.maximumf %5, %6 : vector<256x128xf32>
    %8 = arith.truncf %7 : vector<256x128xf32> to vector<256x128xbf16>
    %c0_6 = arith.constant 0 : index
    %c0_7 = arith.constant 0 : index
    %9 = vector.load %arg6[%c0_6, %c0_7] : memref<256x128xbf16, #tpu.memory_space<vmem>>, vector<256x128xbf16>
    tpu.vector_store %arg6[%c0_6, %c0_7], %8 {strides = array<i32>} : memref<256x128xbf16, #tpu.memory_space<vmem>>, vector<256x128xbf16>,
    %c0_8 = arith.constant 0 : index
    %c0_9 = arith.constant 0 : index
    %10 = vector.load %arg4[%c0_8, %c0_9] : memref<128x256xbf16, #tpu.memory_space<vmem>>, vector<128x256xbf16>
    %cst_10 = arith.constant dense<0.000000e+00> : vector<256x256xf32>
    %11 = tpu.matmul %0, %10, %cst_10 {dimension_numbers = #tpu.dot_dimension_numbers<[1], [0], [0], [1], [0, 0, 1, 1], [], []>} : vector<256x128xbf16>, vector<128x256xbf16>, vector<256x256xf32> -> vector<256x256xf32>
    %c0_11 = arith.constant 0 : index
    %c0_12 = arith.constant 0 : index
    %12 = vector.load %arg5[%c0_11, %c0_12] : memref<1x256xf32, #tpu.memory_space<vmem>>, vector<1x256xf32>
    %13 = vector.broadcast %12 : vector<1x256xf32> to vector<256x256xf32>
    %14 = arith.addf %11, %13 : vector<256x256xf32>
    %15 = arith.truncf %14 : vector<256x256xf32> to vector<256x256xbf16>
    %c0_13 = arith.constant 0 : index
    %c0_14 = arith.constant 0 : index
    %16 = vector.load %arg7[%c0_13, %c0_14] : memref<256x256xbf16, #tpu.memory_space<vmem>>, vector<256x256xbf16>
    tpu.vector_store %arg7[%c0_13, %c0_14], %15 {strides = array<i32>} : memref<256x256xbf16, #tpu.memory_space<vmem>>, vector<256x256xbf16>,
    return
  }
  func.func @transform_0(%arg0: i32) -> (i32, i32) {
    %c0_i32 = arith.constant 0 : i32
    %c0_i32_0 = arith.constant 0 : i32
    return %arg0, %c0_i32 : i32, i32
  }
  func.func @transform_1(%arg0: i32) -> (i32, i32) {
    %c0_i32 = arith.constant 0 : i32
    %c0_i32_0 = arith.constant 0 : i32
    %c0_i32_1 = arith.constant 0 : i32
    return %c0_i32, %c0_i32_0 : i32, i32
  }
  func.func @transform_2(%arg0: i32) -> (i32, i32) {
    %c0_i32 = arith.constant 0 : i32
    %c0_i32_0 = arith.constant 0 : i32
    %c0_i32_1 = arith.constant 0 : i32
    return %c0_i32, %c0_i32_0 : i32, i32
  }
  func.func @transform_3(%arg0: i32) -> (i32, i32) {
    %c0_i32 = arith.constant 0 : i32
    %c0_i32_0 = arith.constant 0 : i32
    %c0_i32_1 = arith.constant 0 : i32
    return %c0_i32, %c0_i32_0 : i32, i32
  }
  func.func @transform_4(%arg0: i32) -> (i32, i32) {
    %c0_i32 = arith.constant 0 : i32
    %c0_i32_0 = arith.constant 0 : i32
    %c0_i32_1 = arith.constant 0 : i32
    return %c0_i32, %c0_i32_0 : i32, i32
  }
  func.func @transform_5(%arg0: i32) -> (i32, i32) {
    %c0_i32 = arith.constant 0 : i32
    %c0_i32_0 = arith.constant 0 : i32
    return %arg0, %c0_i32 : i32, i32
  }
  func.func @transform_6(%arg0: i32) -> (i32, i32) {
    %c0_i32 = arith.constant 0 : i32
    %c0_i32_0 = arith.constant 0 : i32
    return %arg0, %c0_i32 : i32, i32
  }
}

module attributes {stable_mosaic.version = 11 : i64} {
  func.func @_conv3x3_kernel(%arg0: i32, %arg1: memref<1x288x384xbf16, #tpu.memory_space<vmem>>, %arg2: memref<3x384x128xbf16, #tpu.memory_space<vmem>>, %arg3: memref<1x128xf32, #tpu.memory_space<vmem>>, %arg4: memref<1x256x128xbf16, #tpu.memory_space<vmem>>) attributes {dimension_semantics = [#tpu.dimension_semantics<parallel>], iteration_bounds = array<i64: 2>, scalar_prefetch = 0 : i64, scratch_operands = 0 : i64, tpu.core_type = #tpu.core_type<tc>, window_params = [{transform_indices = @transform_0, window_bounds = array<i64: 1, 288, 384>}, {pipeline_mode = #tpu.pipeline_mode<synchronous>, transform_indices = @transform_1, window_bounds = array<i64: 3, 384, 128>}, {pipeline_mode = #tpu.pipeline_mode<synchronous>, transform_indices = @transform_2, window_bounds = array<i64: 1, 128>}, {transform_indices = @transform_3, window_bounds = array<i64: 1, 256, 128>}]} {
    %c0 = arith.constant 0 : index
    %c0_0 = arith.constant 0 : index
    %c0_1 = arith.constant 0 : index
    %0 = vector.load %arg1[%c0, %c0_0, %c0_1] : memref<1x288x384xbf16, #tpu.memory_space<vmem>>, vector<1x256x384xbf16>
    %1 = vector.shape_cast %0 : vector<1x256x384xbf16> to vector<256x384xbf16>
    %c0_2 = arith.constant 0 : index
    %c0_3 = arith.constant 0 : index
    %c0_4 = arith.constant 0 : index
    %2 = vector.load %arg2[%c0_2, %c0_3, %c0_4] : memref<3x384x128xbf16, #tpu.memory_space<vmem>>, vector<1x384x128xbf16>
    %3 = vector.shape_cast %2 : vector<1x384x128xbf16> to vector<384x128xbf16>
    %cst = arith.constant dense<0.000000e+00> : vector<256x128xf32>
    %4 = tpu.matmul %1, %3, %cst {dimension_numbers = #tpu.dot_dimension_numbers<[1], [0], [0], [1], [0, 0, 1, 1], [], []>} : vector<256x384xbf16>, vector<384x128xbf16>, vector<256x128xf32> -> vector<256x128xf32>
    %c0_5 = arith.constant 0 : index
    %c16 = arith.constant 16 : index
    %c0_6 = arith.constant 0 : index
    %5 = vector.load %arg1[%c0_5, %c16, %c0_6] : memref<1x288x384xbf16, #tpu.memory_space<vmem>>, vector<1x256x384xbf16>
    %6 = vector.shape_cast %5 : vector<1x256x384xbf16> to vector<256x384xbf16>
    %c1 = arith.constant 1 : index
    %c0_7 = arith.constant 0 : index
    %c0_8 = arith.constant 0 : index
    %7 = vector.load %arg2[%c1, %c0_7, %c0_8] : memref<3x384x128xbf16, #tpu.memory_space<vmem>>, vector<1x384x128xbf16>
    %8 = vector.shape_cast %7 : vector<1x384x128xbf16> to vector<384x128xbf16>
    %cst_9 = arith.constant dense<0.000000e+00> : vector<256x128xf32>
    %9 = tpu.matmul %6, %8, %cst_9 {dimension_numbers = #tpu.dot_dimension_numbers<[1], [0], [0], [1], [0, 0, 1, 1], [], []>} : vector<256x384xbf16>, vector<384x128xbf16>, vector<256x128xf32> -> vector<256x128xf32>
    %10 = arith.addf %4, %9 : vector<256x128xf32>
    %c0_10 = arith.constant 0 : index
    %c32 = arith.constant 32 : index
    %c0_11 = arith.constant 0 : index
    %11 = vector.load %arg1[%c0_10, %c32, %c0_11] : memref<1x288x384xbf16, #tpu.memory_space<vmem>>, vector<1x256x384xbf16>
    %12 = vector.shape_cast %11 : vector<1x256x384xbf16> to vector<256x384xbf16>
    %c2 = arith.constant 2 : index
    %c0_12 = arith.constant 0 : index
    %c0_13 = arith.constant 0 : index
    %13 = vector.load %arg2[%c2, %c0_12, %c0_13] : memref<3x384x128xbf16, #tpu.memory_space<vmem>>, vector<1x384x128xbf16>
    %14 = vector.shape_cast %13 : vector<1x384x128xbf16> to vector<384x128xbf16>
    %cst_14 = arith.constant dense<0.000000e+00> : vector<256x128xf32>
    %15 = tpu.matmul %12, %14, %cst_14 {dimension_numbers = #tpu.dot_dimension_numbers<[1], [0], [0], [1], [0, 0, 1, 1], [], []>} : vector<256x384xbf16>, vector<384x128xbf16>, vector<256x128xf32> -> vector<256x128xf32>
    %16 = arith.addf %10, %15 : vector<256x128xf32>
    %c0_15 = arith.constant 0 : index
    %c0_16 = arith.constant 0 : index
    %17 = vector.load %arg3[%c0_15, %c0_16] : memref<1x128xf32, #tpu.memory_space<vmem>>, vector<1x128xf32>
    %18 = vector.broadcast %17 : vector<1x128xf32> to vector<256x128xf32>
    %19 = arith.addf %16, %18 : vector<256x128xf32>
    %cst_17 = arith.constant 0.000000e+00 : f32
    %20 = vector.broadcast %cst_17 : f32 to vector<256x128xf32>
    %21 = arith.maximumf %19, %20 : vector<256x128xf32>
    %22 = arith.truncf %21 : vector<256x128xf32> to vector<256x128xbf16>
    %c0_18 = arith.constant 0 : index
    %c0_19 = arith.constant 0 : index
    %c0_20 = arith.constant 0 : index
    %23 = vector.load %arg4[%c0_18, %c0_19, %c0_20] : memref<1x256x128xbf16, #tpu.memory_space<vmem>>, vector<1x256x128xbf16>
    %24 = vector.shape_cast %23 : vector<1x256x128xbf16> to vector<256x128xbf16>
    %25 = vector.shape_cast %22 : vector<256x128xbf16> to vector<1x256x128xbf16>
    tpu.vector_store %arg4[%c0_18, %c0_19, %c0_20], %25 {strides = array<i32>} : memref<1x256x128xbf16, #tpu.memory_space<vmem>>, vector<1x256x128xbf16>,
    return
  }
  func.func @transform_0(%arg0: i32) -> (i32, i32, i32) {
    %c0_i32 = arith.constant 0 : i32
    %c0_i32_0 = arith.constant 0 : i32
    %c0_i32_1 = arith.constant 0 : i32
    return %arg0, %c0_i32, %c0_i32_0 : i32, i32, i32
  }
  func.func @transform_1(%arg0: i32) -> (i32, i32, i32) {
    %c0_i32 = arith.constant 0 : i32
    %c0_i32_0 = arith.constant 0 : i32
    %c0_i32_1 = arith.constant 0 : i32
    %c0_i32_2 = arith.constant 0 : i32
    return %c0_i32, %c0_i32_0, %c0_i32_1 : i32, i32, i32
  }
  func.func @transform_2(%arg0: i32) -> (i32, i32) {
    %c0_i32 = arith.constant 0 : i32
    %c0_i32_0 = arith.constant 0 : i32
    %c0_i32_1 = arith.constant 0 : i32
    return %c0_i32, %c0_i32_0 : i32, i32
  }
  func.func @transform_3(%arg0: i32) -> (i32, i32, i32) {
    %c0_i32 = arith.constant 0 : i32
    %c0_i32_0 = arith.constant 0 : i32
    %c0_i32_1 = arith.constant 0 : i32
    return %arg0, %c0_i32, %c0_i32_0 : i32, i32, i32
  }
}

module attributes {stable_mosaic.version = 11 : i64} {
  func.func @_mm_bias_res_kernel(%arg0: i32, %arg1: memref<256x128xbf16, #tpu.memory_space<vmem>>, %arg2: memref<128x256xbf16, #tpu.memory_space<vmem>>, %arg3: memref<1x256xf32, #tpu.memory_space<vmem>>, %arg4: memref<256x256xbf16, #tpu.memory_space<vmem>>, %arg5: memref<256x256xf32, #tpu.memory_space<vmem>>) attributes {dimension_semantics = [#tpu.dimension_semantics<parallel>], iteration_bounds = array<i64: 2>, scalar_prefetch = 0 : i64, scratch_operands = 0 : i64, tpu.core_type = #tpu.core_type<tc>, window_params = [{transform_indices = @transform_0, window_bounds = array<i64: 256, 128>}, {pipeline_mode = #tpu.pipeline_mode<synchronous>, transform_indices = @transform_1, window_bounds = array<i64: 128, 256>}, {pipeline_mode = #tpu.pipeline_mode<synchronous>, transform_indices = @transform_2, window_bounds = array<i64: 1, 256>}, {transform_indices = @transform_3, window_bounds = array<i64: 256, 256>}, {transform_indices = @transform_4, window_bounds = array<i64: 256, 256>}]} {
    %c0 = arith.constant 0 : index
    %c0_0 = arith.constant 0 : index
    %0 = vector.load %arg1[%c0, %c0_0] : memref<256x128xbf16, #tpu.memory_space<vmem>>, vector<256x128xbf16>
    %c0_1 = arith.constant 0 : index
    %c0_2 = arith.constant 0 : index
    %1 = vector.load %arg2[%c0_1, %c0_2] : memref<128x256xbf16, #tpu.memory_space<vmem>>, vector<128x256xbf16>
    %cst = arith.constant dense<0.000000e+00> : vector<256x256xf32>
    %2 = tpu.matmul %0, %1, %cst {dimension_numbers = #tpu.dot_dimension_numbers<[1], [0], [0], [1], [0, 0, 1, 1], [], []>} : vector<256x128xbf16>, vector<128x256xbf16>, vector<256x256xf32> -> vector<256x256xf32>
    %c0_3 = arith.constant 0 : index
    %c0_4 = arith.constant 0 : index
    %3 = vector.load %arg3[%c0_3, %c0_4] : memref<1x256xf32, #tpu.memory_space<vmem>>, vector<1x256xf32>
    %4 = vector.broadcast %3 : vector<1x256xf32> to vector<256x256xf32>
    %5 = arith.addf %2, %4 : vector<256x256xf32>
    %c0_5 = arith.constant 0 : index
    %c0_6 = arith.constant 0 : index
    %6 = vector.load %arg4[%c0_5, %c0_6] : memref<256x256xbf16, #tpu.memory_space<vmem>>, vector<256x256xbf16>
    %7 = arith.extf %6 : vector<256x256xbf16> to vector<256x256xf32>
    %8 = arith.addf %5, %7 : vector<256x256xf32>
    %cst_7 = arith.constant 0.000000e+00 : f32
    %9 = vector.broadcast %cst_7 : f32 to vector<256x256xf32>
    %10 = arith.maximumf %8, %9 : vector<256x256xf32>
    %c0_8 = arith.constant 0 : index
    %c0_9 = arith.constant 0 : index
    %11 = vector.load %arg5[%c0_8, %c0_9] : memref<256x256xf32, #tpu.memory_space<vmem>>, vector<256x256xf32>
    tpu.vector_store %arg5[%c0_8, %c0_9], %10 {strides = array<i32>} : memref<256x256xf32, #tpu.memory_space<vmem>>, vector<256x256xf32>,
    return
  }
  func.func @transform_0(%arg0: i32) -> (i32, i32) {
    %c0_i32 = arith.constant 0 : i32
    %c0_i32_0 = arith.constant 0 : i32
    return %arg0, %c0_i32 : i32, i32
  }
  func.func @transform_1(%arg0: i32) -> (i32, i32) {
    %c0_i32 = arith.constant 0 : i32
    %c0_i32_0 = arith.constant 0 : i32
    %c0_i32_1 = arith.constant 0 : i32
    return %c0_i32, %c0_i32_0 : i32, i32
  }
  func.func @transform_2(%arg0: i32) -> (i32, i32) {
    %c0_i32 = arith.constant 0 : i32
    %c0_i32_0 = arith.constant 0 : i32
    %c0_i32_1 = arith.constant 0 : i32
    return %c0_i32, %c0_i32_0 : i32, i32
  }
  func.func @transform_3(%arg0: i32) -> (i32, i32) {
    %c0_i32 = arith.constant 0 : i32
    %c0_i32_0 = arith.constant 0 : i32
    return %arg0, %c0_i32 : i32, i32
  }
  func.func @transform_4(%arg0: i32) -> (i32, i32) {
    %c0_i32 = arith.constant 0 : i32
    %c0_i32_0 = arith.constant 0 : i32
    return %arg0, %c0_i32 : i32, i32
  }
}

</mosaic_0001>

<bundles_post_ra>
// kernel: tpu_custom_call.1
= control target key start
LH: loop header
LB: loop body
LE: loop exit
PB: predicated region body
PF: predicated region fallthrough
CT: control target
= control target key end

     0   :  { %6 = vsyncpa [#allocation3], 0  ;;  %s340_s0 = inlined_call_operand.hbm [shape: f32[8,128], index: 0, kind: input, shape index: {}]   ;;  %s341_s1 = inlined_call_operand.hbm [shape: f32[8,128], index: 1, kind: output, shape index: {}]  }
   0x1   :  { %7 = vsyncpa [#allocation4], 0  ;;  %s261_s6 = smov 0  }
   0x2 LB: > { %s144_s7 = sadd.s32 4294967295, %s247_s6   ;;  %p145_p0 = scmp.ge.s32.totalorder %s247_s6, 1  ;;  %s247_s6 = sphi %s261_s6, %s13_s6  }
   0x3   : > { %p60_p1 = scmp.lt.s32.totalorder %s247_s6, 3  ;;  %p275_p3 = scmp.eq.s32.totalorder %s144_s7, 0 }
   0x4   : > { %s249_s10 = smov [#allocation2]   ;;  %s179_s15 = scalar_lea.hbm %s340_s0, 128 }
   0x5   : > { %p269_p2 = pnand %p145_p0, %p60_p1  ;;  %s73_s11 = sshll.u32 %s249_s10, 4  ;;  %s74_s11 = int_to_ptr.vmem [resolvable:$true] %s73_s11 }
   0x6   : > { %s346_s9 = scalar_select %p275_p3, 1, 0 }
   0x7   : > { %s345_s8 = scalar_select %p269_p2, 1, 0 }
   0x8   : > { %p161_p4 = pneg %p269_p2  ;;  %p180_p6 = scmp.ne.s32.totalorder %s340_s0, %s179_s15 }
   0x9   : > { %p186_p10 = scmp.lt.u32.totalorder %s179_s15, %s340_s0 }
   0xa   : > { %p283_p5 = pnand %p275_p3, %p161_p4 }
   0xc   : > { %p181_p7 = pneg %p283_p5 }
   0xe   : > { %p182_p8 = pnand %p181_p7, %p180_p6 }
  0x10   : > { %p183_p9 = pneg %p182_p8 }
  0x12   : > { %p188_p11 = pnand %p186_p10, %p183_p9 }
  0x14   : > { %191 = shalt.err (!%p188_p11)
}
  0x15   : > { %s192_s20 = scalar_lea.vmem %s74_s11, 128  ;;  %p200_p1 = scmp.lt.s32.totalorder %s74_s11, %s74_s11 }
  0x16   : > { %p193_p12 = scmp.ne.s32.totalorder %s74_s11, %s192_s20  ;;  %p201_p4 = scmp.lt.s32.totalorder %s192_s20, %s192_s20 }
  0x18   : > { %p195_p13 = pnand %p193_p12, %p181_p7  ;;  %p202_p3 = por %p201_p4, %p200_p1 }
  0x1a   : > { %p196_p0 = pneg %p195_p13 }
  0x1c   : > { %p203_p2 = pnand %p202_p3, %p196_p0 }
  0x1e   : > { %206 = shalt.err (!%p203_p2)
}
  0x1f   : > { %164 = dma.hbm_to_vmem [thread:$0]  (!%p283_p5), %s340_s0, 128, %s74_s11, [#allocation3]  }
  0x20   : > { %p348_p6 = scmp.ne.s32.totalorder %s345_s8, 0 }
  0x21   : > { %p349_p8 = scmp.ne.s32.totalorder (!%p348_p6), %s346_s9, 0 }
  0x22   : > { %86 = sbr.rel (%p348_p6) target bundleno = 67 (0x43), region = 24 }
  0x29   : > { %238 = dma.done.wait (%p349_p8), [#allocation3], 128  }
  0x2a   : > { %240 = vsyncadd (%p349_p8), [#allocation3], 4294967168  ;;  %s250_s23 = smov [#allocation5]   ;;  %p311_p2 = scmp.eq.s32.totalorder %s144_s7, 1  ;;  %v96_v0 = vld [vmem:[#allocation2] sm:$0xff] }
  0x2b   : > { %s105_s24 = sshll.u32 %s250_s23, 4  ;;  %97 = vst [vmem:[#allocation5] sm:$0xff] %v96_v0  ;;  %s106_s24 = int_to_ptr.vmem [resolvable:$true] %s105_s24 }
  0x2c   : > { %s207_s26 = scalar_lea.vmem %s106_s24, 128  ;;  %p214_p9 = scmp.lt.s32.totalorder %s106_s24, %s106_s24 }
  0x2d   : > { %p208_p3 = scmp.ne.s32.totalorder %s106_s24, %s207_s26  ;;  %p215_p10 = scmp.lt.s32.totalorder %s207_s26, %s207_s26 }
  0x2f   : > { %p209_p5 = pnand %p208_p3, %p311_p2  ;;  %p216_p11 = por %p215_p10, %p214_p9 }
  0x31   : > { %p210_p7 = pneg %p209_p5 }
  0x33   : > { %p217_p12 = pnand %p216_p11, %p210_p7 }
  0x35   : > { %220 = shalt.err (!%p217_p12)
}
  0x36   : > { %s221_s29 = scalar_lea.hbm %s341_s1, 128 }
  0x37   : > { %p222_p13 = scmp.ne.s32.totalorder %s341_s1, %s221_s29  ;;  %p227_p4 = scmp.lt.u32.totalorder %s221_s29, %s341_s1 }
  0x39   : > { %p223_p0 = pnand %p222_p13, %p311_p2 }
  0x3b   : > { %p224_p1 = pneg %p223_p0 }
  0x3d   : > { %p229_p6 = pnand %p227_p4, %p224_p1 }
  0x3f   : > { %232 = shalt.err (!%p229_p6)
}
  0x40   : > { %158 = dma.vmem_to_hbm [thread:$0]  (%p311_p2), %s106_s24, 128, %s341_s1, [#allocation4]  }
  0x41   : > { %242 = dma.done.wait (%p311_p2), [#allocation4], 128  }
  0x42   : > { %244 = vsyncadd (%p311_p2), [#allocation4], 4294967168 }
  0x43 PF: > { %s13_s6 = sadd.s32 1, %s247_s6  }
  0x44   : > { %p10_p8 = scmp.ge.s32.totalorder %s13_s6, 4  }
  0x46   :  { %12 = sbr.rel (!%p10_p8) target bundleno = 2 (0x2), region = 53 }
  0x4d   :  { %118 = vsyncpa [#allocation3], 1 }
  0x4e   :  { %120 = vsyncpa [#allocation3 + $0x1], 1 }
  0x4f   :  { %121 = vsyncpa [#allocation4], 1 }
  0x50   :  { %123 = vsyncpa [#allocation4 + $0x1], 1 }

// kernel: bottleneck_forward.3
= control target key start
LH: loop header
LB: loop body
LE: loop exit
PB: predicated region body
PF: predicated region fallthrough
CT: control target
= control target key end

     0   :  { %s1909_s21 = smov 0   ;;  %s2235_s0 = inlined_call_operand.vmem [shape: bf16[512,128], index: 0, kind: input, shape index: {}]   ;;  %s2236_s1 = inlined_call_operand.vmem [shape: bf16[128,128], index: 1, kind: input, shape index: {}]   ;;  %s2237_s2 = inlined_call_operand.vmem [shape: f32[1,128], index: 2, kind: input, shape index: {}]   ;;  %s2238_s3 = inlined_call_operand.vmem [shape: bf16[128,256], index: 3, kind: input, shape index: {}]   ;;  %s2239_s4 = inlined_call_operand.vmem [shape: f32[1,256], index: 4, kind: input, shape index: {}]   ;;  %s2240_s5 = inlined_call_operand.vmem [shape: bf16[512,128], index: 5, kind: output, shape index: {0}]   ;;  %s2241_s6 = inlined_call_operand.vmem [shape: bf16[512,256], index: 6, kind: output, shape index: {1}]  }
   0x1 LB: > { %s1441_s22 = sadd.s32 4294967295, %s1871_s21   ;;  %p1445_p0 = scmp.ge.s32.totalorder %s1871_s21, 1  ;;  %s1871_s21 = sphi %s1909_s21, %s17_s21  }
   0x2   : > { %p216_p1 = scmp.lt.s32.totalorder %s1871_s21, 3 }
   0x4   : > { %p217_p2 = pnand %p1445_p0, %p216_p1 }
   0x5   : > { %v1817_v0 = vld [vmem:[%s2236_s1] sm:$0xff] (!%p217_p2)   ;;  %s1446_s25 = sshll.u32 (!%p217_p2), %s1441_s22, 5  ;;  %v1873_v3 = vmov (!%p217_p2), 0   ;;  %v1821_v4 = vld [vmem:[%s2236_s1 + $0x8] sm:$0xff] (!%p217_p2)   ;;  %v1822_v5 = vld [vmem:[%s2238_s3 + $0x14] ss:$8 sps:$4 sm:$0xff] (!%p217_p2)   ;;  %v842_v41 = vlaneseq (!%p217_p2) }
   0x6   : > { %220 = sbr.rel (%p217_p2) target bundleno = 347 (0x15b), region = 40  ;;  %v1923_v1 = vld [vmem:[%s2238_s3 + $0x4] ss:$8 sps:$4 sm:$0xff] (!%p217_p2)   ;;  %1744 = vmatprep.subr.bf16.mxu0 (!%p217_p2), %v1817_v0  ;;  %v1928_v2 = vld [vmem:[%s2238_s3] ss:$8 sps:$4 sm:$0xff] (!%p217_p2)   ;;  %1004 = vmatprep.mubr.bf16.mxu1 (!%p217_p2), %v1873_v3  ;;  %p253_p3 = scmp.lt.s32.totalorder (!%p217_p2), %s1446_s25, 63 }
   0x7   : > { %1792 = vmatprep.subr.bf16.mxu1 (!%p217_p2), %v1923_v1  ;;  %1745 = vmatpush3.bf16.msra.mxu0 (!%p217_p2), %v1817_v0  ;;  %v1942_v6 = vld [vmem:[%s2238_s3 + $0x10] ss:$8 sps:$4 sm:$0xff] (!%p217_p2)   ;;  %v1826_v8 = vld [vmem:[%s2238_s3 + $0x24] ss:$8 sps:$4 sm:$0xff] (!%p217_p2)   ;;  %v1953_v9 = vld [vmem:[%s2238_s3 + $0x20] ss:$8 sps:$4 sm:$0xff] (!%p217_p2)  }
   0x8   : > { %1800 = vmatpush1.bf16.msra.mxu1 (!%p217_p2), %v1928_v2  ;;  %1746 = vmatprep.subr.bf16.mxu0 (!%p217_p2), %v1821_v4  ;;  %v1825_v7 = vld [vmem:[%s2236_s1 + $0x10] sm:$0xff] (!%p217_p2)   ;;  %v1829_v10 = vld [vmem:[%s2236_s1 + $0x18] sm:$0xff] (!%p217_p2)   ;;  %v1833_v13 = vld [vmem:[%s2236_s1 + $0x20] sm:$0xff] (!%p217_p2)   ;;  %v843_v42 = vshrl.u32 (!%p217_p2), %v842_v41, 7 }
   0x9   : > { %1793 = vmatprep.subr.bf16.mxu1 (!%p217_p2), %v1822_v5  ;;  %v1830_v11 = vld [vmem:[%s2238_s3 + $0x34] ss:$8 sps:$4 sm:$0xff] (!%p217_p2)   ;;  %v1832_v12 = vld [vmem:[%s2238_s3 + $0x30] ss:$8 sps:$4 sm:$0xff] (!%p217_p2)   ;;  %v1834_v14 = vld [vmem:[%s2238_s3 + $0x44] ss:$8 sps:$4 sm:$0xff] (!%p217_p2)  }
   0xa   : > { %v1836_v15 = vld [vmem:[%s2238_s3 + $0x40] ss:$8 sps:$4 sm:$0xff] (!%p217_p2)   ;;  %v1838_v17 = vld [vmem:[%s2238_s3 + $0x54] ss:$8 sps:$4 sm:$0xff] (!%p217_p2)   ;;  %v1840_v18 = vld [vmem:[%s2238_s3 + $0x50] ss:$8 sps:$4 sm:$0xff] (!%p217_p2)  }
   0xb   : > { %1747 = vmatpush3.bf16.msra.mxu0 (!%p217_p2), %v1821_v4  ;;  %v1837_v16 = vld [vmem:[%s2236_s1 + $0x28] sm:$0xff] (!%p217_p2)   ;;  %v1841_v20 = vld [vmem:[%s2236_s1 + $0x30] sm:$0xff] (!%p217_p2)   ;;  %v1845_v23 = vld [vmem:[%s2236_s1 + $0x38] sm:$0xff] (!%p217_p2)   ;;  %v844_v43 = vsub.s32 (!%p217_p2), 0, %v843_v42  ;;  %v848_v45 = vsub.s32 (!%p217_p2), 1, %v843_v42 }
   0xc   : > { %1801 = vmatpush1.bf16.msra.mxu1 (!%p217_p2), %v1942_v6  ;;  %1748 = vmatprep.subr.bf16.mxu0 (!%p217_p2), %v1825_v7  ;;  %v1842_v21 = vld [vmem:[%s2238_s3 + $0x64] ss:$8 sps:$4 sm:$0xff] (!%p217_p2)   ;;  %v1844_v22 = vld [vmem:[%s2238_s3 + $0x60] ss:$8 sps:$4 sm:$0xff] (!%p217_p2)   ;;  %v1846_v24 = vld [vmem:[%s2238_s3 + $0x74] ss:$8 sps:$4 sm:$0xff] (!%p217_p2)  }
   0xd   : > { %s2243_s25 = smov (!%p253_p3, %s1446_s25), 63  ;;  %1794 = vmatprep.subr.bf16.mxu1 %v1826_v8  ;;  %v1848_v25 = vld [vmem:[%s2238_s3 + $0x70] ss:$8 sps:$4 sm:$0xff]   ;;  %v840_v44 = vld [vmem:[%s2239_s4] sm:$0x3] }
   0xe   : > { %s1447_s30 = sshll.u32 %s2243_s25, 2  ;;  %v2069_v46 = vld [vmem:[%s2237_s2] ss:$0 sm:$0xff]  ;;  %v2071_v47 = vrot.slane %v840_v44, %v844_v43  ;;  %v2073_v48 = vrot.slane %v840_v44, %v848_v45 }
   0xf   : > { %1749 = vmatpush3.bf16.msra.mxu0 %v1825_v7  ;;  %s1986_s13 = scalar_lea.vmem %s2235_s0, %s1447_s30  ;;  %s2094_s19 = scalar_lea.vmem %s2240_s5, %s1447_s30 }
  0x10   : > { %1802 = vmatpush1.bf16.msra.mxu1 %v1953_v9  ;;  %1750 = vmatprep.subr.bf16.mxu0 %v1829_v10  ;;  %v1995_v19 = vld [vmem:[%s1986_s13] sm:$0xff]   ;;  %v2017_v26 = vld [vmem:[%s1986_s13 + $0x8] sm:$0xff]   ;;  %v2022_v28 = vld [vmem:[%s1986_s13 + $0x10] sm:$0xff]  }
  0x11   : > { %1795 = vmatprep.subr.bf16.mxu1 %v1830_v11  ;;  %1760 = vmatprep.mubr.bf16.mxu0 %v1995_v19  ;;  %v1851_v27 = vld [vmem:[%s1986_s13 + $0x20] sm:$0xff]   ;;  %v2029_v29 = vld [vmem:[%s1986_s13 + $0x18] sm:$0xff]   ;;  %v1854_v30 = vld [vmem:[%s1986_s13 + $0x28] sm:$0xff]  }
  0x12   : > { %v1855_v31 = vld [vmem:[%s1986_s13 + $0x30] sm:$0xff]   ;;  %v1856_v32 = vld [vmem:[%s1986_s13 + $0x38] sm:$0xff]   ;;  %v1857_v33 = vld [vmem:[%s1986_s13 + $0x40] sm:$0xff]  }
  0x13   : > { %1751 = vmatpush3.bf16.msra.mxu0 %v1829_v10  ;;  %v1858_v34 = vld [vmem:[%s1986_s13 + $0x48] sm:$0xff]   ;;  %v1859_v35 = vld [vmem:[%s1986_s13 + $0x50] sm:$0xff]   ;;  %v1860_v36 = vld [vmem:[%s1986_s13 + $0x58] sm:$0xff]  }
  0x14   : > { %1803 = vmatpush1.bf16.msra.mxu1 %v1832_v12  ;;  %1752 = vmatprep.subr.bf16.mxu0 %v1833_v13  ;;  %v1861_v37 = vld [vmem:[%s1986_s13 + $0x60] sm:$0xff]   ;;  %v1862_v38 = vld [vmem:[%s1986_s13 + $0x68] sm:$0xff]   ;;  %v1863_v39 = vld [vmem:[%s1986_s13 + $0x70] sm:$0xff]  }
  0x15   : > { %1796 = vmatprep.subr.bf16.mxu1 %v1834_v14  ;;  %v1864_v40 = vld [vmem:[%s1986_s13 + $0x78] sm:$0xff]   ;;  %s1560_s13 = sshll.u32 %s2243_s25, 3 }
  0x16   : > { %s2084_s16 = scalar_lea.vmem %s2241_s6, %s1560_s13 }
  0x17   : > { %1753 = vmatpush3.bf16.msra.mxu0 %v1833_v13 }
  0x18   : > { %1804 = vmatpush1.bf16.msra.mxu1 %v1836_v15  ;;  %1754 = vmatprep.subr.bf16.mxu0 %v1837_v16 }
  0x19   : > { %1797 = vmatprep.subr.bf16.mxu1 %v1838_v17 }
  0x1b   : > { %1755 = vmatpush3.bf16.msra.mxu0 %v1837_v16 }
  0x1c   : > { %1805 = vmatpush1.bf16.msra.mxu1 %v1840_v18  ;;  %1756 = vmatprep.subr.bf16.mxu0 %v1841_v20 }
  0x1d   : > { %1798 = vmatprep.subr.bf16.mxu1 %v1842_v21 }
  0x1f   : > { %1757 = vmatpush3.bf16.msra.mxu0 %v1841_v20 }
  0x20   : > { %1806 = vmatpush1.bf16.msra.mxu1 %v1844_v22  ;;  %1758 = vmatprep.subr.bf16.mxu0 %v1845_v23 }
  0x21   : > { %1799 = vmatprep.subr.bf16.mxu1 %v1846_v24 }
  0x23   : > { %1759 = vmatpush3.bf16.msra.mxu0 %v1845_v23 }
  0x24   : > { %1807 = vmatpush1.bf16.msra.mxu1 %v1848_v25  ;;  %932 = vmatprep.subr.bf16.mxu0 %v1923_v1 }
  0x26   : > { %1761 = vmatmul.mubr.bf16.vlgmr.msra.gmra.mrb[0].mxu0 %v2017_v26 }
  0x27   : > { %1005 = vmatmul.mubr.bf16.vlgmr.msra.gmra.mrb[0].mxu1 %v1851_v27  ;;  %933 = vmatpush1.bf16.msra.mxu0 %v1928_v2 }
  0x28   : > { %1764 = vmatprep.mubr.bf16.mxu0 %v2022_v28  ;;  %1014 = vmatprep.mubr.bf16.mxu1 %v1873_v3 }
  0x29   : > { %934 = vmatprep.subr.bf16.mxu0 %v1822_v5 }
  0x2b   : > { %935 = vmatpush1.bf16.msra.mxu0 %v1942_v6 }
  0x2c   : > { %936 = vmatprep.subr.bf16.mxu0 %v1826_v8 }
  0x2e   : > { %1765 = vmatmul.mubr.bf16.gmra.mrb[4].mxu0 %v2029_v29 }
  0x2f   : > { %1015 = vmatmul.mubr.bf16.gmra.mrb[4].mxu1 %v1854_v30  ;;  %1768 = vmatprep.mubr.bf16.mxu0 %v1851_v27 }
  0x30   : > { %1024 = vmatprep.mubr.bf16.mxu1 %v1873_v3  ;;  %937 = vmatpush1.bf16.msra.mxu0 %v1953_v9 }
  0x31   : > { %938 = vmatprep.subr.bf16.mxu0 %v1830_v11 }
  0x34   : > { %939 = vmatpush1.bf16.msra.mxu0 %v1832_v12 }
  0x35   : > { %940 = vmatprep.subr.bf16.mxu0 %v1834_v14 }
  0x36   : > { %1769 = vmatmul.mubr.bf16.gmra.mrb[8].mxu0 %v1854_v30 }
  0x37   : > { %1025 = vmatmul.mubr.bf16.gmra.mrb[8].mxu1 %v1855_v31  ;;  %1772 = vmatprep.mubr.bf16.mxu0 %v1855_v31 }
  0x38   : > { %1034 = vmatprep.mubr.bf16.mxu1 %v1873_v3  ;;  %941 = vmatpush1.bf16.msra.mxu0 %v1836_v15 }
  0x39   : > { %942 = vmatprep.subr.bf16.mxu0 %v1838_v17 }
  0x3c   : > { %943 = vmatpush1.bf16.msra.mxu0 %v1840_v18 }
  0x3d   : > { %944 = vmatprep.subr.bf16.mxu0 %v1842_v21 }
  0x3e   : > { %1773 = vmatmul.mubr.bf16.gmra.mrb[12].mxu0 %v1856_v32 }
  0x3f   : > { %1035 = vmatmul.mubr.bf16.gmra.mrb[12].mxu1 %v1856_v32  ;;  %1776 = vmatprep.mubr.bf16.mxu0 %v1857_v33 }
  0x40   : > { %1044 = vmatprep.mubr.bf16.mxu1 %v1873_v3  ;;  %945 = vmatpush1.bf16.msra.mxu0 %v1844_v22 }
  0x41   : > { %946 = vmatprep.subr.bf16.mxu0 %v1846_v24 }
  0x44   : > { %947 = vmatpush1.bf16.msra.mxu0 %v1848_v25 }
  0x46   : > { %1777 = vmatmul.mubr.bf16.gmra.mrb[16].mxu0 %v1858_v34 }
  0x47   : > { %1045 = vmatmul.mubr.bf16.gmra.mrb[16].mxu1 %v1857_v33  ;;  %1780 = vmatprep.mubr.bf16.mxu0 %v1859_v35 }
  0x48   : > { %1054 = vmatprep.mubr.bf16.mxu1 %v1873_v3 }
  0x4e   : > { %1781 = vmatmul.mubr.bf16.gmra.mrb[20].mxu0 %v1860_v36 }
  0x4f   : > { %1055 = vmatmul.mubr.bf16.gmra.mrb[20].mxu1 %v1858_v34  ;;  %1784 = vmatprep.mubr.bf16.mxu0 %v1861_v37 }
  0x50   : > { %1064 = vmatprep.mubr.bf16.mxu1 %v1873_v3 }
  0x56   : > { %1785 = vmatmul.mubr.bf16.gmra.mrb[24].mxu0 %v1862_v38 }
  0x57   : > { %1065 = vmatmul.mubr.bf16.gmra.mrb[24].mxu1 %v1859_v35  ;;  %1788 = vmatprep.mubr.bf16.mxu0 %v1863_v39 }
  0x58   : > { %1074 = vmatprep.mubr.bf16.mxu1 %v1873_v3 }
  0x5e   : > { %1789 = vmatmul.mubr.bf16.gmra.mrb[28].mxu0 %v1864_v40 }
  0x5f   : > { %1075 = vmatmul.mubr.bf16.gmra.mrb[28].mxu1 %v1860_v36  ;;  %964 = vmatprep.mubr.bf16.mxu0 %v1873_v3 }
  0x60   : > { %1084 = vmatprep.mubr.bf16.mxu1 %v1873_v3 }
  0x66   : > { %965 = vmatmul.mubr.bf16.vlgmr.msra.gmra.mrb[32].mxu0 %v1995_v19 }
  0x67   : > { %1085 = vmatmul.mubr.bf16.gmra.mrb[32].mxu1 %v1861_v37  ;;  %974 = vmatprep.mubr.bf16.mxu0 %v1873_v3 }
  0x68   : > { %1094 = vmatprep.mubr.bf16.mxu1 %v1873_v3 }
  0x6e   : > { %975 = vmatmul.mubr.bf16.gmra.mrb[36].mxu0 %v2017_v26 }
  0x6f   : > { %1095 = vmatmul.mubr.bf16.gmra.mrb[36].mxu1 %v1862_v38  ;;  %984 = vmatprep.mubr.bf16.mxu0 %v1873_v3 }
  0x70   : > { %1104 = vmatprep.mubr.bf16.mxu1 %v1873_v3 }
  0x76   : > { %985 = vmatmul.mubr.bf16.gmra.mrb[40].mxu0 %v2022_v28 }
  0x77   : > { %1105 = vmatmul.mubr.bf16.gmra.mrb[40].mxu1 %v1863_v39  ;;  %994 = vmatprep.mubr.bf16.mxu0 %v1873_v3 }
  0x78   : > { %1114 = vmatprep.mubr.bf16.mxu1 %v1873_v3 }
  0x7e   : > { %995 = vmatmul.mubr.bf16.gmra.mrb[44].mxu0 %v2029_v29 }
  0x7f   : > { %1115 = vmatmul.mubr.bf16.gmra.mrb[44].mxu1 %v1864_v40 }
  0xf9   : > { %v1762_v49 = vpop.f32.mrb[0].mxu0 }
  0xfa   : > { %v514_v50 = vadd.f32 %v1762_v49, %v2069_v46  ;;  %v1006_v51 = vpop.f32.mrb[0].mxu1  ;;  %v505_v52 = vpop.f32.mrb[1].mxu0 }
  0xfb   : > { %v1007_v53 = vadd.f32 %v1006_v51, %v2071_v47  ;;  %v506_v54 = vadd.f32 %v2069_v46, %v505_v52  ;;  %v1008_v55 = vpop.f32.mrb[1].mxu1  ;;  %v1763_v56 = vpop.f32.mrb[2].mxu0 }
  0xfc   : > { %v1009_v57 = vadd.f32 %v1008_v55, %v2073_v48  ;;  %v517_v58 = vadd.f32 %v1763_v56, %v2069_v46  ;;  %v1010_v59 = vpop.f32.mrb[2].mxu1  ;;  %v508_v60 = vpop.f32.mrb[3].mxu0  ;;  %v634_v0 = vmax.f32 %v514_v50, 0.0 }
  0xfd   : > { %v1011_v61 = vadd.f32 %v1010_v59, %v2071_v47  ;;  %v509_v62 = vadd.f32 %v2069_v46, %v508_v60  ;;  %v1012_v63 = vpop.f32.mrb[3].mxu1  ;;  %v632_v4 = vmax.f32 %v506_v54, 0.0 }
  0xfe   : > { %v1601_v1 = vpack.c.bf16 %v1009_v57, %v1007_v53  ;;  %v635_v2 = vmax.f32 %v517_v58, 0.0  ;;  %v1013_v3 = vadd.f32 %v1012_v63, %v2073_v48 }
  0xff   : > { %v633_v5 = vmax.f32 %v509_v62, 0.0 }
 0x100   : > { %1325 = vst [vmem:[%s2084_s16 + $0x40] sm:$0xff] %v1601_v1  ;;  %v1633_v6 = vpack.c.bf16 %v635_v2, %v634_v0  ;;  %v1602_v7 = vpack.c.bf16 %v1013_v3, %v1011_v61 }
 0x101   : > { %v1628_v8 = vpack.c.bf16 %v633_v5, %v632_v4  ;;  %v1766_v9 = vpop.f32.mrb[4].mxu0 }
 0x102   : > { %1705 = vst [vmem:[%s2094_s19 + $0x8] sm:$0xff] %v1633_v6   ;;  %1326 = vst [vmem:[%s2084_s16 + $0x48] sm:$0xff] %v1602_v7  ;;  %v530_v10 = vadd.f32 %v1766_v9, %v2069_v46  ;;  %v1016_v11 = vpop.f32.mrb[4].mxu1  ;;  %v521_v12 = vpop.f32.mrb[5].mxu0 }
 0x103   : > { %1629 = vst [vmem:[%s2094_s19] sm:$0xff] %v1628_v8   ;;  %v1017_v13 = vadd.f32 %v1016_v11, %v2071_v47  ;;  %v522_v14 = vadd.f32 %v2069_v46, %v521_v12  ;;  %v1018_v15 = vpop.f32.mrb[5].mxu1  ;;  %v1767_v16 = vpop.f32.mrb[6].mxu0 }
 0x104   : > { %v1019_v17 = vadd.f32 %v1018_v15, %v2073_v48  ;;  %v533_v18 = vadd.f32 %v1767_v16, %v2069_v46  ;;  %v1020_v19 = vpop.f32.mrb[6].mxu1  ;;  %v524_v20 = vpop.f32.mrb[7].mxu0  ;;  %v638_v24 = vmax.f32 %v530_v10, 0.0 }
 0x105   : > { %v1021_v21 = vadd.f32 %v1020_v19, %v2071_v47  ;;  %v525_v22 = vadd.f32 %v2069_v46, %v524_v20  ;;  %v1022_v23 = vpop.f32.mrb[7].mxu1  ;;  %v636_v28 = vmax.f32 %v522_v14, 0.0 }
 0x106   : > { %v1603_v25 = vpack.c.bf16 %v1019_v17, %v1017_v13  ;;  %v639_v26 = vmax.f32 %v533_v18, 0.0  ;;  %v1023_v27 = vadd.f32 %v1022_v23, %v2073_v48 }
 0x107   : > { %v637_v29 = vmax.f32 %v525_v22, 0.0 }
 0x108   : > { %1327 = vst [vmem:[%s2084_s16 + $0x50] sm:$0xff] %v1603_v25  ;;  %v1643_v30 = vpack.c.bf16 %v639_v26, %v638_v24  ;;  %v1604_v31 = vpack.c.bf16 %v1023_v27, %v1021_v21 }
 0x109   : > { %v1638_v32 = vpack.c.bf16 %v637_v29, %v636_v28  ;;  %v1770_v33 = vpop.f32.mrb[8].mxu0 }
 0x10a   : > { %1707 = vst [vmem:[%s2094_s19 + $0x18] sm:$0xff] %v1643_v30   ;;  %1328 = vst [vmem:[%s2084_s16 + $0x58] sm:$0xff] %v1604_v31  ;;  %v546_v34 = vadd.f32 %v1770_v33, %v2069_v46  ;;  %v1026_v35 = vpop.f32.mrb[8].mxu1  ;;  %v537_v36 = vpop.f32.mrb[9].mxu0 }
 0x10b   : > { %1706 = vst [vmem:[%s2094_s19 + $0x10] sm:$0xff] %v1638_v32   ;;  %v1027_v37 = vadd.f32 %v1026_v35, %v2071_v47  ;;  %v538_v38 = vadd.f32 %v2069_v46, %v537_v36  ;;  %v1028_v39 = vpop.f32.mrb[9].mxu1  ;;  %v1771_v40 = vpop.f32.mrb[10].mxu0 }
 0x10c   : > { %v1029_v41 = vadd.f32 %v1028_v39, %v2073_v48  ;;  %v549_v42 = vadd.f32 %v1771_v40, %v2069_v46  ;;  %v1030_v43 = vpop.f32.mrb[10].mxu1  ;;  %v540_v44 = vpop.f32.mrb[11].mxu0  ;;  %v642_v51 = vmax.f32 %v546_v34, 0.0 }
 0x10d   : > { %v1031_v45 = vadd.f32 %v1030_v43, %v2071_v47  ;;  %v541_v49 = vadd.f32 %v2069_v46, %v540_v44  ;;  %v1032_v50 = vpop.f32.mrb[11].mxu1  ;;  %v640_v55 = vmax.f32 %v538_v38, 0.0 }
 0x10e   : > { %v1605_v52 = vpack.c.bf16 %v1029_v41, %v1027_v37  ;;  %v643_v53 = vmax.f32 %v549_v42, 0.0  ;;  %v1033_v54 = vadd.f32 %v1032_v50, %v2073_v48 }
 0x10f   : > { %v641_v56 = vmax.f32 %v541_v49, 0.0 }
 0x110   : > { %1329 = vst [vmem:[%s2084_s16 + $0x60] sm:$0xff] %v1605_v52  ;;  %v1653_v57 = vpack.c.bf16 %v643_v53, %v642_v51  ;;  %v1606_v58 = vpack.c.bf16 %v1033_v54, %v1031_v45 }
 0x111   : > { %v1648_v59 = vpack.c.bf16 %v641_v56, %v640_v55  ;;  %v1774_v60 = vpop.f32.mrb[12].mxu0 }
 0x112   : > { %1709 = vst [vmem:[%s2094_s19 + $0x28] sm:$0xff] %v1653_v57   ;;  %1330 = vst [vmem:[%s2084_s16 + $0x68] sm:$0xff] %v1606_v58  ;;  %v562_v61 = vadd.f32 %v1774_v60, %v2069_v46  ;;  %v1036_v62 = vpop.f32.mrb[12].mxu1  ;;  %v553_v63 = vpop.f32.mrb[13].mxu0 }
 0x113   : > { %1708 = vst [vmem:[%s2094_s19 + $0x20] sm:$0xff] %v1648_v59   ;;  %v1037_v0 = vadd.f32 %v1036_v62, %v2071_v47  ;;  %v554_v1 = vadd.f32 %v2069_v46, %v553_v63  ;;  %v1038_v2 = vpop.f32.mrb[13].mxu1  ;;  %v1775_v3 = vpop.f32.mrb[14].mxu0 }
 0x114   : > { %v1039_v4 = vadd.f32 %v1038_v2, %v2073_v48  ;;  %v565_v5 = vadd.f32 %v1775_v3, %v2069_v46  ;;  %v1040_v6 = vpop.f32.mrb[14].mxu1  ;;  %v556_v7 = vpop.f32.mrb[15].mxu0  ;;  %v646_v11 = vmax.f32 %v562_v61, 0.0 }
 0x115   : > { %v1041_v8 = vadd.f32 %v1040_v6, %v2071_v47  ;;  %v557_v9 = vadd.f32 %v2069_v46, %v556_v7  ;;  %v1042_v10 = vpop.f32.mrb[15].mxu1  ;;  %v644_v15 = vmax.f32 %v554_v1, 0.0 }
 0x116   : > { %v1607_v12 = vpack.c.bf16 %v1039_v4, %v1037_v0  ;;  %v647_v13 = vmax.f32 %v565_v5, 0.0  ;;  %v1043_v14 = vadd.f32 %v1042_v10, %v2073_v48 }
 0x117   : > { %v645_v16 = vmax.f32 %v557_v9, 0.0 }
 0x118   : > { %1331 = vst [vmem:[%s2084_s16 + $0x70] sm:$0xff] %v1607_v12  ;;  %v1663_v17 = vpack.c.bf16 %v647_v13, %v646_v11  ;;  %v1608_v18 = vpack.c.bf16 %v1043_v14, %v1041_v8 }
 0x119   : > { %v1658_v19 = vpack.c.bf16 %v645_v16, %v644_v15  ;;  %v1778_v20 = vpop.f32.mrb[16].mxu0 }
 0x11a   : > { %1711 = vst [vmem:[%s2094_s19 + $0x38] sm:$0xff] %v1663_v17   ;;  %1332 = vst [vmem:[%s2084_s16 + $0x78] sm:$0xff] %v1608_v18  ;;  %v578_v21 = vadd.f32 %v1778_v20, %v2069_v46  ;;  %v1046_v22 = vpop.f32.mrb[16].mxu1  ;;  %v569_v23 = vpop.f32.mrb[17].mxu0 }
 0x11b   : > { %1710 = vst [vmem:[%s2094_s19 + $0x30] sm:$0xff] %v1658_v19   ;;  %v1047_v24 = vadd.f32 %v1046_v22, %v2071_v47  ;;  %v570_v25 = vadd.f32 %v2069_v46, %v569_v23  ;;  %v1048_v26 = vpop.f32.mrb[17].mxu1  ;;  %v1779_v27 = vpop.f32.mrb[18].mxu0 }
 0x11c   : > { %v1049_v28 = vadd.f32 %v1048_v26, %v2073_v48  ;;  %v581_v29 = vadd.f32 %v1779_v27, %v2069_v46  ;;  %v1050_v30 = vpop.f32.mrb[18].mxu1  ;;  %v572_v31 = vpop.f32.mrb[19].mxu0  ;;  %v650_v35 = vmax.f32 %v578_v21, 0.0 }
 0x11d   : > { %v1051_v32 = vadd.f32 %v1050_v30, %v2071_v47  ;;  %v573_v33 = vadd.f32 %v2069_v46, %v572_v31  ;;  %v1052_v34 = vpop.f32.mrb[19].mxu1  ;;  %v648_v39 = vmax.f32 %v570_v25, 0.0 }
 0x11e   : > { %v1609_v36 = vpack.c.bf16 %v1049_v28, %v1047_v24  ;;  %v651_v37 = vmax.f32 %v581_v29, 0.0  ;;  %v1053_v38 = vadd.f32 %v1052_v34, %v2073_v48 }
 0x11f   : > { %v649_v40 = vmax.f32 %v573_v33, 0.0 }
 0x120   : > { %1333 = vst [vmem:[%s2084_s16 + $0x80] sm:$0xff] %v1609_v36  ;;  %v1673_v41 = vpack.c.bf16 %v651_v37, %v650_v35  ;;  %v1610_v42 = vpack.c.bf16 %v1053_v38, %v1051_v32 }
 0x121   : > { %v1668_v43 = vpack.c.bf16 %v649_v40, %v648_v39  ;;  %v1782_v44 = vpop.f32.mrb[20].mxu0 }
 0x122   : > { %1713 = vst [vmem:[%s2094_s19 + $0x48] sm:$0xff] %v1673_v41   ;;  %1334 = vst [vmem:[%s2084_s16 + $0x88] sm:$0xff] %v1610_v42  ;;  %v594_v45 = vadd.f32 %v1782_v44, %v2069_v46  ;;  %v1056_v49 = vpop.f32.mrb[20].mxu1  ;;  %v585_v50 = vpop.f32.mrb[21].mxu0 }
 0x123   : > { %1712 = vst [vmem:[%s2094_s19 + $0x40] sm:$0xff] %v1668_v43   ;;  %v1057_v51 = vadd.f32 %v1056_v49, %v2071_v47  ;;  %v586_v52 = vadd.f32 %v2069_v46, %v585_v50  ;;  %v1058_v53 = vpop.f32.mrb[21].mxu1  ;;  %v1783_v54 = vpop.f32.mrb[22].mxu0 }
 0x124   : > { %v1059_v55 = vadd.f32 %v1058_v53, %v2073_v48  ;;  %v597_v56 = vadd.f32 %v1783_v54, %v2069_v46  ;;  %v1060_v57 = vpop.f32.mrb[22].mxu1  ;;  %v588_v58 = vpop.f32.mrb[23].mxu0  ;;  %v654_v62 = vmax.f32 %v594_v45, 0.0 }
 0x125   : > { %v1061_v59 = vadd.f32 %v1060_v57, %v2071_v47  ;;  %v589_v60 = vadd.f32 %v2069_v46, %v588_v58  ;;  %v1062_v61 = vpop.f32.mrb[23].mxu1  ;;  %v652_v2 = vmax.f32 %v586_v52, 0.0 }
 0x126   : > { %v1611_v63 = vpack.c.bf16 %v1059_v55, %v1057_v51  ;;  %v655_v0 = vmax.f32 %v597_v56, 0.0  ;;  %v1063_v1 = vadd.f32 %v1062_v61, %v2073_v48 }
 0x127   : > { %v653_v3 = vmax.f32 %v589_v60, 0.0 }
 0x128   : > { %1335 = vst [vmem:[%s2084_s16 + $0x90] sm:$0xff] %v1611_v63  ;;  %v1683_v4 = vpack.c.bf16 %v655_v0, %v654_v62  ;;  %v1612_v5 = vpack.c.bf16 %v1063_v1, %v1061_v59 }
 0x129   : > { %v1678_v6 = vpack.c.bf16 %v653_v3, %v652_v2  ;;  %v1786_v7 = vpop.f32.mrb[24].mxu0 }
 0x12a   : > { %1715 = vst [vmem:[%s2094_s19 + $0x58] sm:$0xff] %v1683_v4   ;;  %1336 = vst [vmem:[%s2084_s16 + $0x98] sm:$0xff] %v1612_v5  ;;  %v610_v8 = vadd.f32 %v1786_v7, %v2069_v46  ;;  %v1066_v9 = vpop.f32.mrb[24].mxu1  ;;  %v601_v10 = vpop.f32.mrb[25].mxu0 }
 0x12b   : > { %1714 = vst [vmem:[%s2094_s19 + $0x50] sm:$0xff] %v1678_v6   ;;  %v1067_v11 = vadd.f32 %v1066_v9, %v2071_v47  ;;  %v602_v12 = vadd.f32 %v2069_v46, %v601_v10  ;;  %v1068_v13 = vpop.f32.mrb[25].mxu1  ;;  %v1787_v14 = vpop.f32.mrb[26].mxu0 }
 0x12c   : > { %v1069_v15 = vadd.f32 %v1068_v13, %v2073_v48  ;;  %v613_v16 = vadd.f32 %v1787_v14, %v2069_v46  ;;  %v1070_v17 = vpop.f32.mrb[26].mxu1  ;;  %v604_v18 = vpop.f32.mrb[27].mxu0  ;;  %v658_v22 = vmax.f32 %v610_v8, 0.0 }
 0x12d   : > { %v1071_v19 = vadd.f32 %v1070_v17, %v2071_v47  ;;  %v605_v20 = vadd.f32 %v2069_v46, %v604_v18  ;;  %v1072_v21 = vpop.f32.mrb[27].mxu1  ;;  %v656_v26 = vmax.f32 %v602_v12, 0.0 }
 0x12e   : > { %v1613_v23 = vpack.c.bf16 %v1069_v15, %v1067_v11  ;;  %v659_v24 = vmax.f32 %v613_v16, 0.0  ;;  %v1073_v25 = vadd.f32 %v1072_v21, %v2073_v48 }
 0x12f   : > { %v657_v27 = vmax.f32 %v605_v20, 0.0 }
 0x130   : > { %1337 = vst [vmem:[%s2084_s16 + $0xa0] sm:$0xff] %v1613_v23  ;;  %v1693_v28 = vpack.c.bf16 %v659_v24, %v658_v22  ;;  %v1614_v29 = vpack.c.bf16 %v1073_v25, %v1071_v19 }
 0x131   : > { %v1688_v30 = vpack.c.bf16 %v657_v27, %v656_v26  ;;  %v1790_v31 = vpop.f32.mrb[28].mxu0 }
 0x132   : > { %1717 = vst [vmem:[%s2094_s19 + $0x68] sm:$0xff] %v1693_v28   ;;  %1338 = vst [vmem:[%s2084_s16 + $0xa8] sm:$0xff] %v1614_v29  ;;  %v626_v32 = vadd.f32 %v1790_v31, %v2069_v46  ;;  %v1076_v33 = vpop.f32.mrb[28].mxu1  ;;  %v617_v34 = vpop.f32.mrb[29].mxu0 }
 0x133   : > { %1716 = vst [vmem:[%s2094_s19 + $0x60] sm:$0xff] %v1688_v30   ;;  %v1077_v35 = vadd.f32 %v1076_v33, %v2071_v47  ;;  %v618_v36 = vadd.f32 %v2069_v46, %v617_v34  ;;  %v1078_v37 = vpop.f32.mrb[29].mxu1  ;;  %v1791_v38 = vpop.f32.mrb[30].mxu0 }
 0x134   : > { %v1079_v39 = vadd.f32 %v1078_v37, %v2073_v48  ;;  %v629_v40 = vadd.f32 %v1791_v38, %v2069_v46  ;;  %v1080_v41 = vpop.f32.mrb[30].mxu1  ;;  %v620_v42 = vpop.f32.mrb[31].mxu0  ;;  %v662_v49 = vmax.f32 %v626_v32, 0.0 }
 0x135   : > { %v1081_v43 = vadd.f32 %v1080_v41, %v2071_v47  ;;  %v621_v44 = vadd.f32 %v2069_v46, %v620_v42  ;;  %v1082_v45 = vpop.f32.mrb[31].mxu1  ;;  %v660_v53 = vmax.f32 %v618_v36, 0.0 }
 0x136   : > { %v1615_v50 = vpack.c.bf16 %v1079_v39, %v1077_v35  ;;  %v663_v51 = vmax.f32 %v629_v40, 0.0  ;;  %v1083_v52 = vadd.f32 %v1082_v45, %v2073_v48 }
 0x137   : > { %v661_v54 = vmax.f32 %v621_v44, 0.0 }
 0x138   : > { %1339 = vst [vmem:[%s2084_s16 + $0xb0] sm:$0xff] %v1615_v50  ;;  %v1703_v55 = vpack.c.bf16 %v663_v51, %v662_v49  ;;  %v1616_v56 = vpack.c.bf16 %v1083_v52, %v1081_v43 }
 0x139   : > { %v1698_v57 = vpack.c.bf16 %v661_v54, %v660_v53  ;;  %v966_v58 = vpop.f32.mrb[32].mxu0 }
 0x13a   : > { %1719 = vst [vmem:[%s2094_s19 + $0x78] sm:$0xff] %v1703_v55   ;;  %1340 = vst [vmem:[%s2084_s16 + $0xb8] sm:$0xff] %v1616_v56  ;;  %v967_v59 = vadd.f32 %v966_v58, %v2071_v47  ;;  %v1086_v60 = vpop.f32.mrb[32].mxu1  ;;  %v968_v46 = vpop.f32.mrb[33].mxu0 }
 0x13b   : > { %1718 = vst [vmem:[%s2094_s19 + $0x70] sm:$0xff] %v1698_v57   ;;  %v1087_v61 = vadd.f32 %v1086_v60, %v2071_v47  ;;  %v969_v62 = vadd.f32 %v968_v46, %v2073_v48  ;;  %v1088_v63 = vpop.f32.mrb[33].mxu1  ;;  %v970_v0 = vpop.f32.mrb[34].mxu0 }
 0x13c   : > { %v1089_v1 = vadd.f32 %v1088_v63, %v2073_v48  ;;  %v971_v2 = vadd.f32 %v970_v0, %v2071_v47  ;;  %v1090_v3 = vpop.f32.mrb[34].mxu1  ;;  %v972_v4 = vpop.f32.mrb[35].mxu0 }
 0x13d   : > { %v1593_v5 = vpack.c.bf16 %v969_v62, %v967_v59  ;;  %v1091_v6 = vadd.f32 %v1090_v3, %v2071_v47  ;;  %v973_v7 = vadd.f32 %v972_v4, %v2073_v48  ;;  %v1092_v8 = vpop.f32.mrb[35].mxu1 }
 0x13e   : > { %v1617_v9 = vpack.c.bf16 %v1089_v1, %v1087_v61  ;;  %v1093_v10 = vadd.f32 %v1092_v8, %v2073_v48 }
 0x13f   : > { %1317 = vst [vmem:[%s2084_s16] sm:$0xff] %v1593_v5  ;;  %v1594_v11 = vpack.c.bf16 %v973_v7, %v971_v2 }
 0x140   : > { %1341 = vst [vmem:[%s2084_s16 + $0xc0] sm:$0xff] %v1617_v9  ;;  %v1618_v12 = vpack.c.bf16 %v1093_v10, %v1091_v6 }
 0x141   : > { %1318 = vst [vmem:[%s2084_s16 + $0x8] sm:$0xff] %v1594_v11  ;;  %v976_v13 = vpop.f32.mrb[36].mxu0 }
 0x142   : > { %1342 = vst [vmem:[%s2084_s16 + $0xc8] sm:$0xff] %v1618_v12  ;;  %v977_v14 = vadd.f32 %v976_v13, %v2071_v47  ;;  %v1096_v15 = vpop.f32.mrb[36].mxu1  ;;  %v978_v16 = vpop.f32.mrb[37].mxu0 }
 0x143   : > { %v1097_v17 = vadd.f32 %v1096_v15, %v2071_v47  ;;  %v979_v18 = vadd.f32 %v978_v16, %v2073_v48  ;;  %v1098_v19 = vpop.f32.mrb[37].mxu1  ;;  %v980_v20 = vpop.f32.mrb[38].mxu0 }
 0x144   : > { %v1099_v21 = vadd.f32 %v1098_v19, %v2073_v48  ;;  %v981_v22 = vadd.f32 %v980_v20, %v2071_v47  ;;  %v1100_v23 = vpop.f32.mrb[38].mxu1  ;;  %v982_v24 = vpop.f32.mrb[39].mxu0 }
 0x145   : > { %v1595_v25 = vpack.c.bf16 %v979_v18, %v977_v14  ;;  %v1101_v26 = vadd.f32 %v1100_v23, %v2071_v47  ;;  %v983_v27 = vadd.f32 %v982_v24, %v2073_v48  ;;  %v1102_v28 = vpop.f32.mrb[39].mxu1 }
 0x146   : > { %v1619_v29 = vpack.c.bf16 %v1099_v21, %v1097_v17  ;;  %v1103_v30 = vadd.f32 %v1102_v28, %v2073_v48 }
 0x147   : > { %1319 = vst [vmem:[%s2084_s16 + $0x10] sm:$0xff] %v1595_v25  ;;  %v1596_v31 = vpack.c.bf16 %v983_v27, %v981_v22 }
 0x148   : > { %1343 = vst [vmem:[%s2084_s16 + $0xd0] sm:$0xff] %v1619_v29  ;;  %v1620_v32 = vpack.c.bf16 %v1103_v30, %v1101_v26 }
 0x149   : > { %1320 = vst [vmem:[%s2084_s16 + $0x18] sm:$0xff] %v1596_v31  ;;  %v986_v33 = vpop.f32.mrb[40].mxu0 }
 0x14a   : > { %1344 = vst [vmem:[%s2084_s16 + $0xd8] sm:$0xff] %v1620_v32  ;;  %v987_v34 = vadd.f32 %v986_v33, %v2071_v47  ;;  %v1106_v35 = vpop.f32.mrb[40].mxu1  ;;  %v988_v36 = vpop.f32.mrb[41].mxu0 }
 0x14b   : > { %v1107_v37 = vadd.f32 %v1106_v35, %v2071_v47  ;;  %v989_v38 = vadd.f32 %v988_v36, %v2073_v48  ;;  %v1108_v39 = vpop.f32.mrb[41].mxu1  ;;  %v990_v40 = vpop.f32.mrb[42].mxu0 }
 0x14c   : > { %v1109_v41 = vadd.f32 %v1108_v39, %v2073_v48  ;;  %v991_v42 = vadd.f32 %v990_v40, %v2071_v47  ;;  %v1110_v43 = vpop.f32.mrb[42].mxu1  ;;  %v992_v44 = vpop.f32.mrb[43].mxu0 }
 0x14d   : > { %v1597_v45 = vpack.c.bf16 %v989_v38, %v987_v34  ;;  %v1111_v49 = vadd.f32 %v1110_v43, %v2071_v47  ;;  %v993_v50 = vadd.f32 %v992_v44, %v2073_v48  ;;  %v1112_v51 = vpop.f32.mrb[43].mxu1 }
 0x14e   : > { %v1621_v52 = vpack.c.bf16 %v1109_v41, %v1107_v37  ;;  %v1113_v53 = vadd.f32 %v1112_v51, %v2073_v48 }
 0x14f   : > { %1321 = vst [vmem:[%s2084_s16 + $0x20] sm:$0xff] %v1597_v45  ;;  %v1598_v54 = vpack.c.bf16 %v993_v50, %v991_v42 }
 0x150   : > { %1345 = vst [vmem:[%s2084_s16 + $0xe0] sm:$0xff] %v1621_v52  ;;  %v1622_v55 = vpack.c.bf16 %v1113_v53, %v1111_v49 }
 0x151   : > { %1322 = vst [vmem:[%s2084_s16 + $0x28] sm:$0xff] %v1598_v54  ;;  %v996_v56 = vpop.f32.mrb[44].mxu0 }
 0x152   : > { %1346 = vst [vmem:[%s2084_s16 + $0xe8] sm:$0xff] %v1622_v55  ;;  %v997_v57 = vadd.f32 %v996_v56, %v2071_v47  ;;  %v1116_v58 = vpop.f32.mrb[44].mxu1  ;;  %v998_v59 = vpop.f32.mrb[45].mxu0 }
 0x153   : > { %v1117_v60 = vadd.f32 %v1116_v58, %v2071_v47  ;;  %v999_v46 = vadd.f32 %v998_v59, %v2073_v48  ;;  %v1118_v61 = vpop.f32.mrb[45].mxu1  ;;  %v1000_v62 = vpop.f32.mrb[46].mxu0 }
 0x154   : > { %v1119_v63 = vadd.f32 %v1118_v61, %v2073_v48  ;;  %v1001_v0 = vadd.f32 %v1000_v62, %v2071_v47  ;;  %v1120_v1 = vpop.f32.mrb[46].mxu1  ;;  %v1002_v2 = vpop.f32.mrb[47].mxu0 }
 0x155   : > { %v1599_v3 = vpack.c.bf16 %v999_v46, %v997_v57  ;;  %v1121_v4 = vadd.f32 %v1120_v1, %v2071_v47  ;;  %v1003_v5 = vadd.f32 %v1002_v2, %v2073_v48  ;;  %v1122_v6 = vpop.f32.mrb[47].mxu1 }
 0x156   : > { %v1623_v7 = vpack.c.bf16 %v1119_v63, %v1117_v60  ;;  %v1123_v8 = vadd.f32 %v1122_v6, %v2073_v48 }
 0x157   : > { %1323 = vst [vmem:[%s2084_s16 + $0x30] sm:$0xff] %v1599_v3  ;;  %v1600_v9 = vpack.c.bf16 %v1003_v5, %v1001_v0 }
 0x158   : > { %1347 = vst [vmem:[%s2084_s16 + $0xf0] sm:$0xff] %v1623_v7  ;;  %v1624_v10 = vpack.c.bf16 %v1123_v8, %v1121_v4 }
 0x159   : > { %1324 = vst [vmem:[%s2084_s16 + $0x38] sm:$0xff] %v1600_v9 }
 0x15a   : > { %1348 = vst [vmem:[%s2084_s16 + $0xf8] sm:$0xff] %v1624_v10 }
 0x15b PF: > { %s17_s21 = sadd.s32 1, %s1871_s21  }
 0x15c   : > { %p14_p4 = scmp.ge.s32.totalorder %s17_s21, 4  }
 0x15e   :  { %16 = sbr.rel (!%p14_p4) target bundleno = 1 (0x1), region = 82 }

// kernel: bottleneck_forward.5
= control target key start
LH: loop header
LB: loop body
LE: loop exit
PB: predicated region body
PF: predicated region fallthrough
CT: control target
= control target key end

     0   :  { %9 = vsyncpa [#allocation3], 0  ;;  %s1643_s0 = inlined_call_operand.vmem [shape: bf16[512,128], index: 0, kind: input, shape index: {}]   ;;  %s1644_s1 = inlined_call_operand.vmem [shape: bf16[128,256], index: 1, kind: input, shape index: {}]   ;;  %s1645_s2 = inlined_call_operand.vmem [shape: f32[1,256], index: 2, kind: input, shape index: {}]   ;;  %s1646_s3 = inlined_call_operand.vmem [shape: bf16[512,256], index: 3, kind: input, shape index: {}]   ;;  %s1647_s4 = inlined_call_operand.hbm [shape: f32[512,256], index: 4, kind: output, shape index: {}]  }
   0x1   :  { %11 = vsyncpa [#allocation3 + $0x1], 0  ;;  %s1273_s15 = smov 0   ;;  %s1275_s16 = smov 0  }
   0x2   :  { %s1277_s17 = smov 0   ;;  %s1279_s18 = smov 0  }
   0x3 LB: > { %s1294_s19 = sadd.s32 4294967295, %s1242_s18   ;;  %s1031_s20 = sadd.s32 4294967294, %s1242_s18   ;;  %s1242_s18 = sphi %s1279_s18, %s1653_s18   ;;  %s1238_s17 = sphi %s1277_s17, %s1652_s17   ;;  %s1234_s16 = sphi %s1275_s16, %s1651_s16   ;;  %s1230_s15 = sphi %s1273_s15, %s1650_s15  }
   0x4   : > { %s1298_s21 = sadd.s32 1, %s1242_s18   ;;  %s118_s22 = sadd.s32 1, %s1238_s17 }
   0x5   : > { %s115_s23 = ssub.s32 %s1242_s18, %s1298_s21  ;;  %p128_p0 = scmp.ne.s32.totalorder %s1238_s17, %s1234_s16 }
   0x6   : > { %p116_p1 = scmp.eq.s32.totalorder %s115_s23, 0  ;;  %p129_p2 = scmp.eq.s32.totalorder %s1294_s19, 1 }
   0x7   : > { %p134_p3 = scmp.ne.s32.totalorder %s1234_s16, %s1230_s15  ;;  %p135_p4 = scmp.eq.s32.totalorder %s1031_s20, 1 }
   0x8   : > { %s1309_s24 = scalar_select %p116_p1, %s1238_s17, %s118_s22  }
   0x9   : > { %p1311_p5 = por %p129_p2, %p128_p0  ;;  %p1315_p6 = por %p135_p4, %p134_p3 }
   0xa   : > { %p1034_p7 = scmp.ge.s32.totalorder %s1242_s18, 1  ;;  %p178_p8 = scmp.lt.s32.totalorder %s1242_s18, 3 }
   0xc   : > { %p179_p9 = pnand %p1034_p7, %p178_p8 }
   0xd   : > { %v1140_v0 = vld [vmem:[%s1644_s1 + $0x4] ss:$8 sps:$4 sm:$0xff] (!%p179_p9)   ;;  %s1036_s29 = sshll.u32 (!%p179_p9), %s1294_s19, 5  ;;  %v1142_v1 = vld [vmem:[%s1644_s1] ss:$8 sps:$4 sm:$0xff] (!%p179_p9)   ;;  %v1244_v2 = vmov (!%p179_p9), 0   ;;  %v275_v33 = vlaneseq (!%p179_p9) }
   0xe   : > { %182 = sbr.rel (%p179_p9) target bundleno = 339 (0x153), region = 36  ;;  %493 = vmatprep.mubr.bf16.mxu0 (!%p179_p9), %v1244_v2  ;;  %573 = vmatprep.mubr.bf16.mxu1 (!%p179_p9), %v1244_v2  ;;  %p211_p10 = scmp.lt.s32.totalorder (!%p179_p9), %s1036_s29, 63  ;;  %v1143_v3 = vld [vmem:[%s1644_s1 + $0x14] ss:$8 sps:$4 sm:$0xff] (!%p179_p9)   ;;  %v1145_v4 = vld [vmem:[%s1644_s1 + $0x10] ss:$8 sps:$4 sm:$0xff] (!%p179_p9)  }
   0xf   : > { %461 = vmatprep.subr.bf16.mxu0 (!%p179_p9), %v1140_v0  ;;  %1082 = vmatprep.subr.bf16.mxu1 (!%p179_p9), %v1140_v0  ;;  %v1146_v5 = vld [vmem:[%s1644_s1 + $0x24] ss:$8 sps:$4 sm:$0xff] (!%p179_p9)   ;;  %v1148_v6 = vld [vmem:[%s1644_s1 + $0x20] ss:$8 sps:$4 sm:$0xff] (!%p179_p9)   ;;  %v1149_v7 = vld [vmem:[%s1644_s1 + $0x34] ss:$8 sps:$4 sm:$0xff] (!%p179_p9)  }
  0x10   : > { %462 = vmatpush1.bf16.msra.mxu0 (!%p179_p9), %v1142_v1  ;;  %1090 = vmatpush1.bf16.msra.mxu1 (!%p179_p9), %v1142_v1  ;;  %v1151_v8 = vld [vmem:[%s1644_s1 + $0x30] ss:$8 sps:$4 sm:$0xff] (!%p179_p9)   ;;  %v1152_v9 = vld [vmem:[%s1644_s1 + $0x44] ss:$8 sps:$4 sm:$0xff] (!%p179_p9)   ;;  %v1154_v10 = vld [vmem:[%s1644_s1 + $0x40] ss:$8 sps:$4 sm:$0xff] (!%p179_p9)  }
  0x11   : > { %463 = vmatprep.subr.bf16.mxu0 (!%p179_p9), %v1143_v3  ;;  %1083 = vmatprep.subr.bf16.mxu1 (!%p179_p9), %v1143_v3  ;;  %v1155_v11 = vld [vmem:[%s1644_s1 + $0x54] ss:$8 sps:$4 sm:$0xff] (!%p179_p9)   ;;  %v1157_v12 = vld [vmem:[%s1644_s1 + $0x50] ss:$8 sps:$4 sm:$0xff] (!%p179_p9)   ;;  %v1158_v13 = vld [vmem:[%s1644_s1 + $0x64] ss:$8 sps:$4 sm:$0xff] (!%p179_p9)  }
  0x12   : > { %v1160_v14 = vld [vmem:[%s1644_s1 + $0x60] ss:$8 sps:$4 sm:$0xff] (!%p179_p9)   ;;  %v1161_v15 = vld [vmem:[%s1644_s1 + $0x74] ss:$8 sps:$4 sm:$0xff] (!%p179_p9)   ;;  %v1163_v16 = vld [vmem:[%s1644_s1 + $0x70] ss:$8 sps:$4 sm:$0xff] (!%p179_p9)  }
  0x13   : > { %v276_v34 = vshrl.u32 (!%p179_p9), %v275_v33, 7  ;;  %v273_v36 = vld [vmem:[%s1645_s2] sm:$0x3] (!%p179_p9)  ;;  %s1081_s14 = sshll.u32 (!%p179_p9), %s1294_s19, 13  ;;  %s1245_s5 = smov (!%p179_p9), [#allocation2]  }
  0x14   : > { %464 = vmatpush1.bf16.msra.mxu0 (!%p179_p9), %v1145_v4  ;;  %1091 = vmatpush1.bf16.msra.mxu1 (!%p179_p9), %v1145_v4  ;;  %s1590_s23 = scalar_lea.hbm (!%p179_p9), %s1647_s4, %s1081_s14  ;;  %s1184_s6 = sshll.u32 (!%p179_p9), %s1245_s5, 4  ;;  %s1185_s6 = int_to_ptr.vmem [resolvable:$false] %s1184_s6 }
  0x15   : > { %s1655_s29 = smov (!%p211_p10, %s1036_s29), 63  ;;  %465 = vmatprep.subr.bf16.mxu0 %v1146_v5  ;;  %1084 = vmatprep.subr.bf16.mxu1 %v1146_v5  ;;  %v277_v35 = vsub.s32 0, %v276_v34  ;;  %v281_v37 = vsub.s32 1, %v276_v34 }
  0x16   : > { %s1037_s12 = sshll.u32 %s1655_s29, 2  ;;  %s1079_s7 = sshll.u32 %s1655_s29, 3 }
  0x17   : > { %s1351_s28 = scalar_lea.vmem %s1643_s0, %s1037_s12  ;;  %s1414_s10 = scalar_lea.vmem %s1646_s3, %s1079_s7  ;;  %v1421_v40 = vrot.slane %v273_v36, %v277_v35  ;;  %v1424_v41 = vrot.slane %v273_v36, %v281_v37 }
  0x18   : > { %466 = vmatpush1.bf16.msra.mxu0 %v1148_v6  ;;  %1092 = vmatpush1.bf16.msra.mxu1 %v1148_v6  ;;  %v1164_v17 = vld [vmem:[%s1351_s28] sm:$0xff]   ;;  %v1166_v19 = vld [vmem:[%s1351_s28 + $0x8] sm:$0xff]   ;;  %v1168_v21 = vld [vmem:[%s1351_s28 + $0x10] sm:$0xff]   ;;  %s207_s29 = sand.u32 1, %s1234_s16   ;;  %s1186_s7 = scalar_lea.vmem %s1185_s6, 16384 }
  0x19   : > { %467 = vmatprep.subr.bf16.mxu0 %v1149_v7  ;;  %1085 = vmatprep.subr.bf16.mxu1 %v1149_v7  ;;  %v1165_v18 = vld [vmem:[%s1351_s28 + $0x40] sm:$0xff]   ;;  %v1167_v20 = vld [vmem:[%s1351_s28 + $0x48] sm:$0xff]   ;;  %v1169_v22 = vld [vmem:[%s1351_s28 + $0x50] sm:$0xff]   ;;  %s1602_s27 = scalar_lea.sflag [#allocation3], %s207_s29 }
  0x1a   : > { %v1170_v23 = vld [vmem:[%s1351_s28 + $0x18] sm:$0xff]   ;;  %v1172_v25 = vld [vmem:[%s1351_s28 + $0x20] sm:$0xff]   ;;  %v1174_v27 = vld [vmem:[%s1351_s28 + $0x28] sm:$0xff]  }
  0x1b   : > { %v1171_v24 = vld [vmem:[%s1351_s28 + $0x58] sm:$0xff]   ;;  %v1173_v26 = vld [vmem:[%s1351_s28 + $0x60] sm:$0xff]   ;;  %v1175_v28 = vld [vmem:[%s1351_s28 + $0x68] sm:$0xff]  }
  0x1c   : > { %468 = vmatpush1.bf16.msra.mxu0 %v1151_v8  ;;  %1093 = vmatpush1.bf16.msra.mxu1 %v1151_v8  ;;  %v1176_v29 = vld [vmem:[%s1351_s28 + $0x30] sm:$0xff]   ;;  %v1178_v31 = vld [vmem:[%s1351_s28 + $0x38] sm:$0xff]   ;;  %v654_v38 = vld [vmem:[%s1414_s10] sm:$0xff] }
  0x1d   : > { %469 = vmatprep.subr.bf16.mxu0 %v1152_v9  ;;  %1086 = vmatprep.subr.bf16.mxu1 %v1152_v9  ;;  %v1177_v30 = vld [vmem:[%s1351_s28 + $0x70] sm:$0xff]   ;;  %v1179_v32 = vld [vmem:[%s1351_s28 + $0x78] sm:$0xff]   ;;  %v670_v39 = vld [vmem:[%s1414_s10 + $0x80] sm:$0xff]  ;;  %v686_v44 = vunpack.c.l.bf16 %v654_v38  ;;  %v687_v48 = vunpack.c.h.bf16 %v654_v38  ;;  %s1430_s28 = sshll.u32 %s207_s29, 9 }
  0x1e   : > { %v655_v42 = vld [vmem:[%s1414_s10 + $0x8] sm:$0xff]  ;;  %v718_v45 = vunpack.c.l.bf16 %v670_v39  ;;  %v719_v49 = vunpack.c.h.bf16 %v670_v39  ;;  %v656_v8 = vld [vmem:[%s1414_s10 + $0x10] sm:$0xff]  ;;  %s1445_s13 = scalar_lea.vmem [#allocation2], %s1430_s28 }
  0x1f   : > { %v671_v43 = vld [vmem:[%s1414_s10 + $0x88] sm:$0xff]  ;;  %v688_v54 = vunpack.c.l.bf16 %v655_v42  ;;  %v689_v60 = vunpack.c.h.bf16 %v655_v42  ;;  %v672_v9 = vld [vmem:[%s1414_s10 + $0x90] sm:$0xff]  ;;  %s957_s20 = sshll.u32 %s1445_s13, 4  ;;  %s1592_s20 = int_to_ptr.vmem [resolvable:$true] %s957_s20 }
  0x20   : > { %470 = vmatpush1.bf16.msra.mxu0 %v1154_v10  ;;  %1094 = vmatpush1.bf16.msra.mxu1 %v1154_v10  ;;  %v720_v55 = vunpack.c.l.bf16 %v671_v43  ;;  %v721_v61 = vunpack.c.h.bf16 %v671_v43  ;;  %s1180_s30 = scalar_lea.vmem %s1592_s20, 8192  ;;  %p1187_p0 = scmp.lt.s32.totalorder %s1592_s20, %s1185_s6 }
  0x21   : > { %471 = vmatprep.subr.bf16.mxu0 %v1155_v11  ;;  %1087 = vmatprep.subr.bf16.mxu1 %v1155_v11  ;;  %p1181_p11 = scmp.ne.s32.totalorder %s1592_s20, %s1180_s30  ;;  %p1188_p1 = scmp.lt.s32.totalorder %s1186_s7, %s1180_s30 }
  0x23   : > { %p1182_p12 = pnand %p1181_p11, %p1311_p5  ;;  %p1189_p2 = por %p1188_p1, %p1187_p0 }
  0x24   : > { %472 = vmatpush1.bf16.msra.mxu0 %v1157_v12  ;;  %1095 = vmatpush1.bf16.msra.mxu1 %v1157_v12 }
  0x25   : > { %473 = vmatprep.subr.bf16.mxu0 %v1158_v13  ;;  %1088 = vmatprep.subr.bf16.mxu1 %v1158_v13  ;;  %p1183_p13 = pneg %p1182_p12 }
  0x27   : > { %p1190_p3 = pnand %p1189_p2, %p1183_p13 }
  0x28   : > { %474 = vmatpush1.bf16.msra.mxu0 %v1160_v14  ;;  %1096 = vmatpush1.bf16.msra.mxu1 %v1160_v14 }
  0x29   : > { %475 = vmatprep.subr.bf16.mxu0 %v1161_v15  ;;  %1089 = vmatprep.subr.bf16.mxu1 %v1161_v15 }
  0x2c   : > { %476 = vmatpush1.bf16.msra.mxu0 %v1163_v16  ;;  %1097 = vmatpush1.bf16.msra.mxu1 %v1163_v16 }
  0x2f   : > { %494 = vmatmul.mubr.bf16.vlgmr.msra.gmra.mrb[0].mxu0 %v1164_v17  ;;  %574 = vmatmul.mubr.bf16.vlgmr.msra.gmra.mrb[0].mxu1 %v1165_v18  ;;  %v657_v18 = vld [vmem:[%s1414_s10 + $0x18] sm:$0xff] }
  0x30   : > { %503 = vmatprep.mubr.bf16.mxu0 %v1244_v2  ;;  %583 = vmatprep.mubr.bf16.mxu1 %v1244_v2  ;;  %v692_v34 = vunpack.c.l.bf16 %v657_v18  ;;  %v693_v42 = vunpack.c.h.bf16 %v657_v18 }
  0x37   : > { %504 = vmatmul.mubr.bf16.gmra.mrb[4].mxu0 %v1166_v19  ;;  %584 = vmatmul.mubr.bf16.gmra.mrb[4].mxu1 %v1167_v20  ;;  %v673_v19 = vld [vmem:[%s1414_s10 + $0x98] sm:$0xff] }
  0x38   : > { %513 = vmatprep.mubr.bf16.mxu0 %v1244_v2  ;;  %593 = vmatprep.mubr.bf16.mxu1 %v1244_v2  ;;  %v724_v35 = vunpack.c.l.bf16 %v673_v19  ;;  %v725_v43 = vunpack.c.h.bf16 %v673_v19 }
  0x3f   : > { %514 = vmatmul.mubr.bf16.gmra.mrb[8].mxu0 %v1168_v21  ;;  %594 = vmatmul.mubr.bf16.gmra.mrb[8].mxu1 %v1169_v22  ;;  %v690_v22 = vunpack.c.l.bf16 %v656_v8 }
  0x40   : > { %523 = vmatprep.mubr.bf16.mxu0 %v1244_v2  ;;  %603 = vmatprep.mubr.bf16.mxu1 %v1244_v2 }
  0x47   : > { %524 = vmatmul.mubr.bf16.gmra.mrb[12].mxu0 %v1170_v23  ;;  %604 = vmatmul.mubr.bf16.gmra.mrb[12].mxu1 %v1171_v24  ;;  %v722_v23 = vunpack.c.l.bf16 %v672_v9 }
  0x48   : > { %533 = vmatprep.mubr.bf16.mxu0 %v1244_v2  ;;  %613 = vmatprep.mubr.bf16.mxu1 %v1244_v2 }
  0x4f   : > { %534 = vmatmul.mubr.bf16.gmra.mrb[16].mxu0 %v1172_v25  ;;  %614 = vmatmul.mubr.bf16.gmra.mrb[16].mxu1 %v1173_v26 }
  0x50   : > { %543 = vmatprep.mubr.bf16.mxu0 %v1244_v2  ;;  %623 = vmatprep.mubr.bf16.mxu1 %v1244_v2 }
  0x57   : > { %544 = vmatmul.mubr.bf16.gmra.mrb[20].mxu0 %v1174_v27  ;;  %624 = vmatmul.mubr.bf16.gmra.mrb[20].mxu1 %v1175_v28  ;;  %v691_v28 = vunpack.c.h.bf16 %v656_v8 }
  0x58   : > { %553 = vmatprep.mubr.bf16.mxu0 %v1244_v2  ;;  %633 = vmatprep.mubr.bf16.mxu1 %v1244_v2 }
  0x5f   : > { %554 = vmatmul.mubr.bf16.gmra.mrb[24].mxu0 %v1176_v29  ;;  %634 = vmatmul.mubr.bf16.gmra.mrb[24].mxu1 %v1177_v30  ;;  %v723_v29 = vunpack.c.h.bf16 %v672_v9 }
  0x60   : > { %563 = vmatprep.mubr.bf16.mxu0 %v1244_v2  ;;  %643 = vmatprep.mubr.bf16.mxu1 %v1244_v2 }
  0x67   : > { %564 = vmatmul.mubr.bf16.gmra.mrb[28].mxu0 %v1178_v31  ;;  %644 = vmatmul.mubr.bf16.gmra.mrb[28].mxu1 %v1179_v32 }
 0x102   : > { %v495_v46 = vpop.f32.mrb[0].mxu0  ;;  %v575_v47 = vpop.f32.mrb[0].mxu1 }
 0x103   : > { %v496_v50 = vadd.f32 %v495_v46, %v1421_v40  ;;  %v576_v51 = vadd.f32 %v575_v47, %v1421_v40  ;;  %v497_v52 = vpop.f32.mrb[1].mxu0  ;;  %v577_v53 = vpop.f32.mrb[1].mxu1 }
 0x104   : > { %v498_v56 = vadd.f32 %v497_v52, %v1424_v41  ;;  %v578_v57 = vadd.f32 %v577_v53, %v1424_v41  ;;  %v499_v58 = vpop.f32.mrb[2].mxu0  ;;  %v579_v59 = vpop.f32.mrb[2].mxu1 }
 0x105   : > { %v750_v62 = vadd.f32 %v686_v44, %v496_v50  ;;  %v782_v63 = vadd.f32 %v718_v45, %v576_v51  ;;  %v500_v0 = vadd.f32 %v499_v58, %v1421_v40  ;;  %v580_v1 = vadd.f32 %v579_v59, %v1421_v40  ;;  %v501_v2 = vpop.f32.mrb[3].mxu0  ;;  %v581_v3 = vpop.f32.mrb[3].mxu1 }
 0x106   : > { %v751_v4 = vadd.f32 %v687_v48, %v498_v56  ;;  %v783_v5 = vadd.f32 %v719_v49, %v578_v57  ;;  %v502_v6 = vadd.f32 %v501_v2, %v1424_v41  ;;  %v582_v7 = vadd.f32 %v581_v3, %v1424_v41 }
 0x107   : > { %v814_v10 = vmax.f32 %v750_v62, 0.0  ;;  %v846_v11 = vmax.f32 %v782_v63, 0.0  ;;  %v752_v12 = vadd.f32 %v688_v54, %v500_v0  ;;  %v784_v13 = vadd.f32 %v720_v55, %v580_v1  ;;  %v658_v54 = vld [vmem:[%s1414_s10 + $0x20] sm:$0xff]  ;;  %v659_v0 = vld [vmem:[%s1414_s10 + $0x28] sm:$0xff] }
 0x108   : > { %v815_v14 = vmax.f32 %v751_v4, 0.0  ;;  %v847_v15 = vmax.f32 %v783_v5, 0.0  ;;  %v753_v16 = vadd.f32 %v689_v60, %v502_v6  ;;  %v785_v17 = vadd.f32 %v721_v61, %v582_v7  ;;  %v674_v55 = vld [vmem:[%s1414_s10 + $0xa0] sm:$0xff]  ;;  %v675_v1 = vld [vmem:[%s1414_s10 + $0xa8] sm:$0xff] }
 0x109   : > { %878 = vst [vmem:[%s1445_s13] sm:$0xff] %v814_v10  ;;  %910 = vst [vmem:[%s1445_s13 + $0x100] sm:$0xff] %v846_v11  ;;  %v816_v20 = vmax.f32 %v752_v12, 0.0  ;;  %v848_v21 = vmax.f32 %v784_v13, 0.0  ;;  %v694_v4 = vunpack.c.l.bf16 %v658_v54  ;;  %v726_v5 = vunpack.c.l.bf16 %v674_v55 }
 0x10a   : > { %879 = vst [vmem:[%s1445_s13 + $0x8] sm:$0xff] %v815_v14  ;;  %911 = vst [vmem:[%s1445_s13 + $0x108] sm:$0xff] %v847_v15  ;;  %v817_v24 = vmax.f32 %v753_v16, 0.0  ;;  %v849_v25 = vmax.f32 %v785_v17, 0.0  ;;  %v505_v26 = vpop.f32.mrb[4].mxu0  ;;  %v585_v27 = vpop.f32.mrb[4].mxu1  ;;  %v695_v10 = vunpack.c.h.bf16 %v658_v54  ;;  %v727_v11 = vunpack.c.h.bf16 %v674_v55 }
 0x10b   : > { %880 = vst [vmem:[%s1445_s13 + $0x10] sm:$0xff] %v816_v20  ;;  %912 = vst [vmem:[%s1445_s13 + $0x110] sm:$0xff] %v848_v21  ;;  %v506_v30 = vadd.f32 %v505_v26, %v1421_v40  ;;  %v586_v31 = vadd.f32 %v585_v27, %v1421_v40  ;;  %v507_v32 = vpop.f32.mrb[5].mxu0  ;;  %v587_v33 = vpop.f32.mrb[5].mxu1  ;;  %v696_v16 = vunpack.c.l.bf16 %v659_v0  ;;  %v728_v17 = vunpack.c.l.bf16 %v675_v1 }
 0x10c   : > { %881 = vst [vmem:[%s1445_s13 + $0x18] sm:$0xff] %v817_v24  ;;  %913 = vst [vmem:[%s1445_s13 + $0x118] sm:$0xff] %v849_v25  ;;  %v508_v36 = vadd.f32 %v507_v32, %v1424_v41  ;;  %v588_v37 = vadd.f32 %v587_v33, %v1424_v41  ;;  %v509_v38 = vpop.f32.mrb[6].mxu0  ;;  %v589_v39 = vpop.f32.mrb[6].mxu1 }
 0x10d   : > { %v754_v44 = vadd.f32 %v690_v22, %v506_v30  ;;  %v786_v45 = vadd.f32 %v722_v23, %v586_v31  ;;  %v510_v46 = vadd.f32 %v509_v38, %v1421_v40  ;;  %v590_v47 = vadd.f32 %v589_v39, %v1421_v40  ;;  %v511_v48 = vpop.f32.mrb[7].mxu0  ;;  %v591_v49 = vpop.f32.mrb[7].mxu1 }
 0x10e   : > { %v755_v50 = vadd.f32 %v691_v28, %v508_v36  ;;  %v787_v51 = vadd.f32 %v723_v29, %v588_v37  ;;  %v512_v52 = vadd.f32 %v511_v48, %v1424_v41  ;;  %v592_v53 = vadd.f32 %v591_v49, %v1424_v41 }
 0x10f   : > { %v818_v56 = vmax.f32 %v754_v44, 0.0  ;;  %v850_v57 = vmax.f32 %v786_v45, 0.0  ;;  %v756_v58 = vadd.f32 %v692_v34, %v510_v46  ;;  %v788_v59 = vadd.f32 %v724_v35, %v590_v47  ;;  %v660_v34 = vld [vmem:[%s1414_s10 + $0x30] sm:$0xff]  ;;  %v661_v46 = vld [vmem:[%s1414_s10 + $0x38] sm:$0xff] }
 0x110   : > { %v819_v60 = vmax.f32 %v755_v50, 0.0  ;;  %v851_v61 = vmax.f32 %v787_v51, 0.0  ;;  %v757_v62 = vadd.f32 %v693_v42, %v512_v52  ;;  %v789_v63 = vadd.f32 %v725_v43, %v592_v53  ;;  %v676_v35 = vld [vmem:[%s1414_s10 + $0xb0] sm:$0xff]  ;;  %v677_v47 = vld [vmem:[%s1414_s10 + $0xb8] sm:$0xff] }
 0x111   : > { %882 = vst [vmem:[%s1445_s13 + $0x20] sm:$0xff] %v818_v56  ;;  %914 = vst [vmem:[%s1445_s13 + $0x120] sm:$0xff] %v850_v57  ;;  %v820_v2 = vmax.f32 %v756_v58, 0.0  ;;  %v852_v3 = vmax.f32 %v788_v59, 0.0  ;;  %v697_v22 = vunpack.c.h.bf16 %v659_v0  ;;  %v729_v23 = vunpack.c.h.bf16 %v675_v1 }
 0x112   : > { %883 = vst [vmem:[%s1445_s13 + $0x28] sm:$0xff] %v819_v60  ;;  %915 = vst [vmem:[%s1445_s13 + $0x128] sm:$0xff] %v851_v61  ;;  %v821_v6 = vmax.f32 %v757_v62, 0.0  ;;  %v853_v7 = vmax.f32 %v789_v63, 0.0  ;;  %v515_v8 = vpop.f32.mrb[8].mxu0  ;;  %v595_v9 = vpop.f32.mrb[8].mxu1  ;;  %v698_v50 = vunpack.c.l.bf16 %v660_v34  ;;  %v730_v51 = vunpack.c.l.bf16 %v676_v35 }
 0x113   : > { %884 = vst [vmem:[%s1445_s13 + $0x30] sm:$0xff] %v820_v2  ;;  %916 = vst [vmem:[%s1445_s13 + $0x130] sm:$0xff] %v852_v3  ;;  %v516_v12 = vadd.f32 %v515_v8, %v1421_v40  ;;  %v596_v13 = vadd.f32 %v595_v9, %v1421_v40  ;;  %v517_v14 = vpop.f32.mrb[9].mxu0  ;;  %v597_v15 = vpop.f32.mrb[9].mxu1  ;;  %v699_v56 = vunpack.c.h.bf16 %v660_v34  ;;  %v731_v57 = vunpack.c.h.bf16 %v676_v35 }
 0x114   : > { %885 = vst [vmem:[%s1445_s13 + $0x38] sm:$0xff] %v821_v6  ;;  %917 = vst [vmem:[%s1445_s13 + $0x138] sm:$0xff] %v853_v7  ;;  %v518_v18 = vadd.f32 %v517_v14, %v1424_v41  ;;  %v598_v19 = vadd.f32 %v597_v15, %v1424_v41  ;;  %v519_v20 = vpop.f32.mrb[10].mxu0  ;;  %v599_v21 = vpop.f32.mrb[10].mxu1  ;;  %v700_v62 = vunpack.c.l.bf16 %v661_v46  ;;  %v732_v63 = vunpack.c.l.bf16 %v677_v47 }
 0x115   : > { %v758_v24 = vadd.f32 %v694_v4, %v516_v12  ;;  %v790_v25 = vadd.f32 %v726_v5, %v596_v13  ;;  %v520_v26 = vadd.f32 %v519_v20, %v1421_v40  ;;  %v600_v27 = vadd.f32 %v599_v21, %v1421_v40  ;;  %v521_v28 = vpop.f32.mrb[11].mxu0  ;;  %v601_v29 = vpop.f32.mrb[11].mxu1 }
 0x116   : > { %v759_v30 = vadd.f32 %v695_v10, %v518_v18  ;;  %v791_v31 = vadd.f32 %v727_v11, %v598_v19  ;;  %v522_v32 = vadd.f32 %v521_v28, %v1424_v41  ;;  %v602_v33 = vadd.f32 %v601_v29, %v1424_v41 }
 0x117   : > { %v822_v36 = vmax.f32 %v758_v24, 0.0  ;;  %v854_v37 = vmax.f32 %v790_v25, 0.0  ;;  %v760_v38 = vadd.f32 %v696_v16, %v520_v26  ;;  %v792_v39 = vadd.f32 %v728_v17, %v600_v27  ;;  %v662_v16 = vld [vmem:[%s1414_s10 + $0x40] sm:$0xff]  ;;  %v663_v26 = vld [vmem:[%s1414_s10 + $0x48] sm:$0xff] }
 0x118   : > { %v823_v42 = vmax.f32 %v759_v30, 0.0  ;;  %v855_v43 = vmax.f32 %v791_v31, 0.0  ;;  %v761_v44 = vadd.f32 %v697_v22, %v522_v32  ;;  %v793_v45 = vadd.f32 %v729_v23, %v602_v33  ;;  %v678_v17 = vld [vmem:[%s1414_s10 + $0xc0] sm:$0xff]  ;;  %v679_v27 = vld [vmem:[%s1414_s10 + $0xc8] sm:$0xff] }
 0x119   : > { %886 = vst [vmem:[%s1445_s13 + $0x40] sm:$0xff] %v822_v36  ;;  %918 = vst [vmem:[%s1445_s13 + $0x140] sm:$0xff] %v854_v37  ;;  %v824_v48 = vmax.f32 %v760_v38, 0.0  ;;  %v856_v49 = vmax.f32 %v792_v39, 0.0  ;;  %v701_v4 = vunpack.c.h.bf16 %v661_v46  ;;  %v733_v5 = vunpack.c.h.bf16 %v677_v47 }
 0x11a   : > { %887 = vst [vmem:[%s1445_s13 + $0x48] sm:$0xff] %v823_v42  ;;  %919 = vst [vmem:[%s1445_s13 + $0x148] sm:$0xff] %v855_v43  ;;  %v825_v52 = vmax.f32 %v761_v44, 0.0  ;;  %v857_v53 = vmax.f32 %v793_v45, 0.0  ;;  %v525_v54 = vpop.f32.mrb[12].mxu0  ;;  %v605_v55 = vpop.f32.mrb[12].mxu1  ;;  %v702_v30 = vunpack.c.l.bf16 %v662_v16  ;;  %v734_v31 = vunpack.c.l.bf16 %v678_v17 }
 0x11b   : > { %888 = vst [vmem:[%s1445_s13 + $0x50] sm:$0xff] %v824_v48  ;;  %920 = vst [vmem:[%s1445_s13 + $0x150] sm:$0xff] %v856_v49  ;;  %v526_v58 = vadd.f32 %v525_v54, %v1421_v40  ;;  %v606_v59 = vadd.f32 %v605_v55, %v1421_v40  ;;  %v527_v60 = vpop.f32.mrb[13].mxu0  ;;  %v607_v61 = vpop.f32.mrb[13].mxu1  ;;  %v703_v36 = vunpack.c.h.bf16 %v662_v16  ;;  %v735_v37 = vunpack.c.h.bf16 %v678_v17 }
 0x11c   : > { %889 = vst [vmem:[%s1445_s13 + $0x58] sm:$0xff] %v825_v52  ;;  %921 = vst [vmem:[%s1445_s13 + $0x158] sm:$0xff] %v857_v53  ;;  %v528_v0 = vadd.f32 %v527_v60, %v1424_v41  ;;  %v608_v1 = vadd.f32 %v607_v61, %v1424_v41  ;;  %v529_v2 = vpop.f32.mrb[14].mxu0  ;;  %v609_v3 = vpop.f32.mrb[14].mxu1  ;;  %v704_v44 = vunpack.c.l.bf16 %v663_v26  ;;  %v736_v45 = vunpack.c.l.bf16 %v679_v27 }
 0x11d   : > { %v762_v6 = vadd.f32 %v698_v50, %v526_v58  ;;  %v794_v7 = vadd.f32 %v730_v51, %v606_v59  ;;  %v530_v8 = vadd.f32 %v529_v2, %v1421_v40  ;;  %v610_v9 = vadd.f32 %v609_v3, %v1421_v40  ;;  %v531_v10 = vpop.f32.mrb[15].mxu0  ;;  %v611_v11 = vpop.f32.mrb[15].mxu1 }
 0x11e   : > { %v763_v12 = vadd.f32 %v699_v56, %v528_v0  ;;  %v795_v13 = vadd.f32 %v731_v57, %v608_v1  ;;  %v532_v14 = vadd.f32 %v531_v10, %v1424_v41  ;;  %v612_v15 = vadd.f32 %v611_v11, %v1424_v41 }
 0x11f   : > { %v826_v18 = vmax.f32 %v762_v6, 0.0  ;;  %v858_v19 = vmax.f32 %v794_v7, 0.0  ;;  %v764_v20 = vadd.f32 %v700_v62, %v530_v8  ;;  %v796_v21 = vadd.f32 %v732_v63, %v610_v9  ;;  %v664_v62 = vld [vmem:[%s1414_s10 + $0x50] sm:$0xff]  ;;  %v665_v8 = vld [vmem:[%s1414_s10 + $0x58] sm:$0xff] }
 0x120   : > { %v827_v22 = vmax.f32 %v763_v12, 0.0  ;;  %v859_v23 = vmax.f32 %v795_v13, 0.0  ;;  %v765_v24 = vadd.f32 %v701_v4, %v532_v14  ;;  %v797_v25 = vadd.f32 %v733_v5, %v612_v15  ;;  %v680_v63 = vld [vmem:[%s1414_s10 + $0xd0] sm:$0xff]  ;;  %v681_v9 = vld [vmem:[%s1414_s10 + $0xd8] sm:$0xff] }
 0x121   : > { %890 = vst [vmem:[%s1445_s13 + $0x60] sm:$0xff] %v826_v18  ;;  %922 = vst [vmem:[%s1445_s13 + $0x160] sm:$0xff] %v858_v19  ;;  %v828_v28 = vmax.f32 %v764_v20, 0.0  ;;  %v860_v29 = vmax.f32 %v796_v21, 0.0  ;;  %v705_v50 = vunpack.c.h.bf16 %v663_v26  ;;  %v737_v51 = vunpack.c.h.bf16 %v679_v27 }
 0x122   : > { %891 = vst [vmem:[%s1445_s13 + $0x68] sm:$0xff] %v827_v22  ;;  %923 = vst [vmem:[%s1445_s13 + $0x168] sm:$0xff] %v859_v23  ;;  %v829_v32 = vmax.f32 %v765_v24, 0.0  ;;  %v861_v33 = vmax.f32 %v797_v25, 0.0  ;;  %v535_v34 = vpop.f32.mrb[16].mxu0  ;;  %v615_v35 = vpop.f32.mrb[16].mxu1  ;;  %v706_v12 = vunpack.c.l.bf16 %v664_v62  ;;  %v738_v13 = vunpack.c.l.bf16 %v680_v63 }
 0x123   : > { %892 = vst [vmem:[%s1445_s13 + $0x70] sm:$0xff] %v828_v28  ;;  %924 = vst [vmem:[%s1445_s13 + $0x170] sm:$0xff] %v860_v29  ;;  %v536_v38 = vadd.f32 %v535_v34, %v1421_v40  ;;  %v616_v39 = vadd.f32 %v615_v35, %v1421_v40  ;;  %v537_v42 = vpop.f32.mrb[17].mxu0  ;;  %v617_v43 = vpop.f32.mrb[17].mxu1  ;;  %v707_v18 = vunpack.c.h.bf16 %v664_v62  ;;  %v739_v19 = vunpack.c.h.bf16 %v680_v63 }
 0x124   : > { %893 = vst [vmem:[%s1445_s13 + $0x78] sm:$0xff] %v829_v32  ;;  %925 = vst [vmem:[%s1445_s13 + $0x178] sm:$0xff] %v861_v33  ;;  %v538_v46 = vadd.f32 %v537_v42, %v1424_v41  ;;  %v618_v47 = vadd.f32 %v617_v43, %v1424_v41  ;;  %v539_v48 = vpop.f32.mrb[18].mxu0  ;;  %v619_v49 = vpop.f32.mrb[18].mxu1  ;;  %v708_v24 = vunpack.c.l.bf16 %v665_v8  ;;  %v740_v25 = vunpack.c.l.bf16 %v681_v9 }
 0x125   : > { %v766_v52 = vadd.f32 %v702_v30, %v536_v38  ;;  %v798_v53 = vadd.f32 %v734_v31, %v616_v39  ;;  %v540_v54 = vadd.f32 %v539_v48, %v1421_v40  ;;  %v620_v55 = vadd.f32 %v619_v49, %v1421_v40  ;;  %v541_v56 = vpop.f32.mrb[19].mxu0  ;;  %v621_v57 = vpop.f32.mrb[19].mxu1 }
 0x126   : > { %v767_v58 = vadd.f32 %v703_v36, %v538_v46  ;;  %v799_v59 = vadd.f32 %v735_v37, %v618_v47  ;;  %v542_v60 = vadd.f32 %v541_v56, %v1424_v41  ;;  %v622_v61 = vadd.f32 %v621_v57, %v1424_v41 }
 0x127   : > { %v830_v0 = vmax.f32 %v766_v52, 0.0  ;;  %v862_v1 = vmax.f32 %v798_v53, 0.0  ;;  %v768_v2 = vadd.f32 %v704_v44, %v540_v54  ;;  %v800_v3 = vadd.f32 %v736_v45, %v620_v55  ;;  %v666_v44 = vld [vmem:[%s1414_s10 + $0x60] sm:$0xff]  ;;  %v667_v54 = vld [vmem:[%s1414_s10 + $0x68] sm:$0xff] }
 0x128   : > { %v831_v4 = vmax.f32 %v767_v58, 0.0  ;;  %v863_v5 = vmax.f32 %v799_v59, 0.0  ;;  %v769_v6 = vadd.f32 %v705_v50, %v542_v60  ;;  %v801_v7 = vadd.f32 %v737_v51, %v622_v61  ;;  %v682_v45 = vld [vmem:[%s1414_s10 + $0xe0] sm:$0xff]  ;;  %v683_v55 = vld [vmem:[%s1414_s10 + $0xe8] sm:$0xff] }
 0x129   : > { %894 = vst [vmem:[%s1445_s13 + $0x80] sm:$0xff] %v830_v0  ;;  %926 = vst [vmem:[%s1445_s13 + $0x180] sm:$0xff] %v862_v1  ;;  %v832_v10 = vmax.f32 %v768_v2, 0.0  ;;  %v864_v11 = vmax.f32 %v800_v3, 0.0  ;;  %v709_v30 = vunpack.c.h.bf16 %v665_v8  ;;  %v741_v31 = vunpack.c.h.bf16 %v681_v9 }
 0x12a   : > { %895 = vst [vmem:[%s1445_s13 + $0x88] sm:$0xff] %v831_v4  ;;  %927 = vst [vmem:[%s1445_s13 + $0x188] sm:$0xff] %v863_v5  ;;  %v833_v14 = vmax.f32 %v769_v6, 0.0  ;;  %v865_v15 = vmax.f32 %v801_v7, 0.0  ;;  %v545_v16 = vpop.f32.mrb[20].mxu0  ;;  %v625_v17 = vpop.f32.mrb[20].mxu1  ;;  %v710_v58 = vunpack.c.l.bf16 %v666_v44  ;;  %v742_v59 = vunpack.c.l.bf16 %v682_v45 }
 0x12b   : > { %896 = vst [vmem:[%s1445_s13 + $0x90] sm:$0xff] %v832_v10  ;;  %928 = vst [vmem:[%s1445_s13 + $0x190] sm:$0xff] %v864_v11  ;;  %v546_v20 = vadd.f32 %v545_v16, %v1421_v40  ;;  %v626_v21 = vadd.f32 %v625_v17, %v1421_v40  ;;  %v547_v22 = vpop.f32.mrb[21].mxu0  ;;  %v627_v23 = vpop.f32.mrb[21].mxu1  ;;  %v711_v0 = vunpack.c.h.bf16 %v666_v44  ;;  %v743_v1 = vunpack.c.h.bf16 %v682_v45 }
 0x12c   : > { %897 = vst [vmem:[%s1445_s13 + $0x98] sm:$0xff] %v833_v14  ;;  %929 = vst [vmem:[%s1445_s13 + $0x198] sm:$0xff] %v865_v15  ;;  %v548_v26 = vadd.f32 %v547_v22, %v1424_v41  ;;  %v628_v27 = vadd.f32 %v627_v23, %v1424_v41  ;;  %v549_v28 = vpop.f32.mrb[22].mxu0  ;;  %v629_v29 = vpop.f32.mrb[22].mxu1  ;;  %v712_v6 = vunpack.c.l.bf16 %v667_v54  ;;  %v744_v7 = vunpack.c.l.bf16 %v683_v55 }
 0x12d   : > { %v770_v32 = vadd.f32 %v706_v12, %v546_v20  ;;  %v802_v33 = vadd.f32 %v738_v13, %v626_v21  ;;  %v550_v34 = vadd.f32 %v549_v28, %v1421_v40  ;;  %v630_v35 = vadd.f32 %v629_v29, %v1421_v40  ;;  %v551_v36 = vpop.f32.mrb[23].mxu0  ;;  %v631_v37 = vpop.f32.mrb[23].mxu1 }
 0x12e   : > { %v771_v38 = vadd.f32 %v707_v18, %v548_v26  ;;  %v803_v39 = vadd.f32 %v739_v19, %v628_v27  ;;  %v552_v42 = vadd.f32 %v551_v36, %v1424_v41  ;;  %v632_v43 = vadd.f32 %v631_v37, %v1424_v41 }
 0x12f   : > { %v834_v46 = vmax.f32 %v770_v32, 0.0  ;;  %v866_v47 = vmax.f32 %v802_v33, 0.0  ;;  %v772_v48 = vadd.f32 %v708_v24, %v550_v34  ;;  %v804_v49 = vadd.f32 %v740_v25, %v630_v35  ;;  %v668_v24 = vld [vmem:[%s1414_s10 + $0x70] sm:$0xff]  ;;  %v669_v34 = vld [vmem:[%s1414_s10 + $0x78] sm:$0xff] }
 0x130   : > { %v835_v50 = vmax.f32 %v771_v38, 0.0  ;;  %v867_v51 = vmax.f32 %v803_v39, 0.0  ;;  %v773_v52 = vadd.f32 %v709_v30, %v552_v42  ;;  %v805_v53 = vadd.f32 %v741_v31, %v632_v43  ;;  %v684_v25 = vld [vmem:[%s1414_s10 + $0xf0] sm:$0xff]  ;;  %v685_v35 = vld [vmem:[%s1414_s10 + $0xf8] sm:$0xff] }
 0x131   : > { %898 = vst [vmem:[%s1445_s13 + $0xa0] sm:$0xff] %v834_v46  ;;  %930 = vst [vmem:[%s1445_s13 + $0x1a0] sm:$0xff] %v866_v47  ;;  %v836_v56 = vmax.f32 %v772_v48, 0.0  ;;  %v868_v57 = vmax.f32 %v804_v49, 0.0  ;;  %v713_v12 = vunpack.c.h.bf16 %v667_v54  ;;  %v745_v13 = vunpack.c.h.bf16 %v683_v55 }
 0x132   : > { %899 = vst [vmem:[%s1445_s13 + $0xa8] sm:$0xff] %v835_v50  ;;  %931 = vst [vmem:[%s1445_s13 + $0x1a8] sm:$0xff] %v867_v51  ;;  %v837_v60 = vmax.f32 %v773_v52, 0.0  ;;  %v869_v61 = vmax.f32 %v805_v53, 0.0  ;;  %v555_v62 = vpop.f32.mrb[24].mxu0  ;;  %v635_v63 = vpop.f32.mrb[24].mxu1  ;;  %v714_v38 = vunpack.c.l.bf16 %v668_v24  ;;  %v746_v39 = vunpack.c.l.bf16 %v684_v25 }
 0x133   : > { %900 = vst [vmem:[%s1445_s13 + $0xb0] sm:$0xff] %v836_v56  ;;  %932 = vst [vmem:[%s1445_s13 + $0x1b0] sm:$0xff] %v868_v57  ;;  %v556_v2 = vadd.f32 %v555_v62, %v1421_v40  ;;  %v636_v3 = vadd.f32 %v635_v63, %v1421_v40  ;;  %v557_v4 = vpop.f32.mrb[25].mxu0  ;;  %v637_v5 = vpop.f32.mrb[25].mxu1  ;;  %v715_v46 = vunpack.c.h.bf16 %v668_v24  ;;  %v747_v47 = vunpack.c.h.bf16 %v684_v25 }
 0x134   : > { %901 = vst [vmem:[%s1445_s13 + $0xb8] sm:$0xff] %v837_v60  ;;  %933 = vst [vmem:[%s1445_s13 + $0x1b8] sm:$0xff] %v869_v61  ;;  %v558_v8 = vadd.f32 %v557_v4, %v1424_v41  ;;  %v638_v9 = vadd.f32 %v637_v5, %v1424_v41  ;;  %v559_v10 = vpop.f32.mrb[26].mxu0  ;;  %v639_v11 = vpop.f32.mrb[26].mxu1  ;;  %v716_v52 = vunpack.c.l.bf16 %v669_v34  ;;  %v748_v53 = vunpack.c.l.bf16 %v685_v35 }
 0x135   : > { %v774_v14 = vadd.f32 %v710_v58, %v556_v2  ;;  %v806_v15 = vadd.f32 %v742_v59, %v636_v3  ;;  %v560_v16 = vadd.f32 %v559_v10, %v1421_v40  ;;  %v640_v17 = vadd.f32 %v639_v11, %v1421_v40  ;;  %v561_v18 = vpop.f32.mrb[27].mxu0  ;;  %v641_v19 = vpop.f32.mrb[27].mxu1 }
 0x136   : > { %v775_v20 = vadd.f32 %v711_v0, %v558_v8  ;;  %v807_v21 = vadd.f32 %v743_v1, %v638_v9  ;;  %v562_v22 = vadd.f32 %v561_v18, %v1424_v41  ;;  %v642_v23 = vadd.f32 %v641_v19, %v1424_v41 }
 0x137   : > { %v838_v26 = vmax.f32 %v774_v14, 0.0  ;;  %v870_v27 = vmax.f32 %v806_v15, 0.0  ;;  %v776_v28 = vadd.f32 %v712_v6, %v560_v16  ;;  %v808_v29 = vadd.f32 %v744_v7, %v640_v17 }
 0x138   : > { %v839_v30 = vmax.f32 %v775_v20, 0.0  ;;  %v871_v31 = vmax.f32 %v807_v21, 0.0  ;;  %v777_v32 = vadd.f32 %v713_v12, %v562_v22  ;;  %v809_v33 = vadd.f32 %v745_v13, %v642_v23 }
 0x139   : > { %902 = vst [vmem:[%s1445_s13 + $0xc0] sm:$0xff] %v838_v26  ;;  %934 = vst [vmem:[%s1445_s13 + $0x1c0] sm:$0xff] %v870_v27  ;;  %v840_v36 = vmax.f32 %v776_v28, 0.0  ;;  %v872_v37 = vmax.f32 %v808_v29, 0.0  ;;  %v717_v58 = vunpack.c.h.bf16 %v669_v34  ;;  %v749_v59 = vunpack.c.h.bf16 %v685_v35 }
 0x13a   : > { %903 = vst [vmem:[%s1445_s13 + $0xc8] sm:$0xff] %v839_v30  ;;  %935 = vst [vmem:[%s1445_s13 + $0x1c8] sm:$0xff] %v871_v31  ;;  %v841_v42 = vmax.f32 %v777_v32, 0.0  ;;  %v873_v43 = vmax.f32 %v809_v33, 0.0  ;;  %v565_v44 = vpop.f32.mrb[28].mxu0  ;;  %v645_v45 = vpop.f32.mrb[28].mxu1 }
 0x13b   : > { %904 = vst [vmem:[%s1445_s13 + $0xd0] sm:$0xff] %v840_v36  ;;  %936 = vst [vmem:[%s1445_s13 + $0x1d0] sm:$0xff] %v872_v37  ;;  %v566_v48 = vadd.f32 %v565_v44, %v1421_v40  ;;  %v646_v49 = vadd.f32 %v645_v45, %v1421_v40  ;;  %v567_v50 = vpop.f32.mrb[29].mxu0  ;;  %v647_v51 = vpop.f32.mrb[29].mxu1 }
 0x13c   : > { %905 = vst [vmem:[%s1445_s13 + $0xd8] sm:$0xff] %v841_v42  ;;  %937 = vst [vmem:[%s1445_s13 + $0x1d8] sm:$0xff] %v873_v43  ;;  %v568_v54 = vadd.f32 %v567_v50, %v1424_v41  ;;  %v648_v55 = vadd.f32 %v647_v51, %v1424_v41  ;;  %v569_v56 = vpop.f32.mrb[30].mxu0  ;;  %v649_v57 = vpop.f32.mrb[30].mxu1 }
 0x13d   : > { %v778_v60 = vadd.f32 %v714_v38, %v566_v48  ;;  %v810_v61 = vadd.f32 %v746_v39, %v646_v49  ;;  %v570_v62 = vadd.f32 %v569_v56, %v1421_v40  ;;  %v650_v63 = vadd.f32 %v649_v57, %v1421_v40  ;;  %v571_v0 = vpop.f32.mrb[31].mxu0  ;;  %v651_v1 = vpop.f32.mrb[31].mxu1 }
 0x13e   : > { %v779_v2 = vadd.f32 %v715_v46, %v568_v54  ;;  %v811_v3 = vadd.f32 %v747_v47, %v648_v55  ;;  %v572_v4 = vadd.f32 %v571_v0, %v1424_v41  ;;  %v652_v5 = vadd.f32 %v651_v1, %v1424_v41 }
 0x13f   : > { %v842_v6 = vmax.f32 %v778_v60, 0.0  ;;  %v874_v7 = vmax.f32 %v810_v61, 0.0  ;;  %v780_v8 = vadd.f32 %v716_v52, %v570_v62  ;;  %v812_v9 = vadd.f32 %v748_v53, %v650_v63 }
 0x140   : > { %v843_v40 = vmax.f32 %v779_v2, 0.0  ;;  %v875_v10 = vmax.f32 %v811_v3, 0.0  ;;  %v781_v11 = vadd.f32 %v717_v58, %v572_v4  ;;  %v813_v12 = vadd.f32 %v749_v59, %v652_v5 }
 0x141   : > { %906 = vst [vmem:[%s1445_s13 + $0xe0] sm:$0xff] %v842_v6  ;;  %938 = vst [vmem:[%s1445_s13 + $0x1e0] sm:$0xff] %v874_v7  ;;  %v844_v41 = vmax.f32 %v780_v8, 0.0  ;;  %v876_v13 = vmax.f32 %v812_v9, 0.0 }
 0x142   : > { %907 = vst [vmem:[%s1445_s13 + $0xe8] sm:$0xff] %v843_v40  ;;  %939 = vst [vmem:[%s1445_s13 + $0x1e8] sm:$0xff] %v875_v10  ;;  %v845_v14 = vmax.f32 %v781_v11, 0.0  ;;  %v877_v15 = vmax.f32 %v813_v12, 0.0 }
 0x143   : > { %908 = vst [vmem:[%s1445_s13 + $0xf0] sm:$0xff] %v844_v41  ;;  %940 = vst [vmem:[%s1445_s13 + $0x1f0] sm:$0xff] %v876_v13 }
 0x144   : > { %909 = vst [vmem:[%s1445_s13 + $0xf8] sm:$0xff] %v845_v14  ;;  %941 = vst [vmem:[%s1445_s13 + $0x1f8] sm:$0xff] %v877_v15 }
 0x145   : > { %1193 = shalt.err (!%p1190_p3)
}
 0x146   : > { %s1194_s8 = scalar_lea.hbm %s1590_s23, 8192  ;;  %s1198_s11 = scalar_lea.hbm %s1647_s4, 16384 }
 0x147   : > { %p1195_p4 = scmp.ne.s32.totalorder %s1590_s23, %s1194_s8  ;;  %p1199_p9 = scmp.lt.u32.totalorder %s1590_s23, %s1647_s4 }
 0x148   : > { %p1200_p10 = scmp.lt.u32.totalorder %s1198_s11, %s1194_s8  ;;  %p1202_p12 = scmp.lt.u32.totalorder %s1194_s8, %s1590_s23 }
 0x149   : > { %p1196_p7 = pnand %p1195_p4, %p1311_p5 }
 0x14a   : > { %p1201_p11 = por %p1200_p10, %p1199_p9 }
 0x14b   : > { %p1197_p8 = pneg %p1196_p7 }
 0x14c   : > { %p1203_p13 = por %p1202_p12, %p1201_p11 }
 0x14e   : > { %p1204_p0 = pnand %p1203_p13, %p1197_p8 }
 0x150   : > { %1207 = shalt.err (!%p1204_p0)
}
 0x151   : > { %s1246_s28 = smov 256   ;;  %s1247_s13 = smov 16  }
 0x152   : > { %1098 = dma.vmem_to_hbm [thread:$0]  (%p1311_p5), %s1592_s20, 8192, %s1590_s23, %s1602_s27, %s1246_s28, %s1246_s28, %s1247_s13  }
 0x153 PF: > { %p1104_p1 = scmp.ge.s32.totalorder %s1242_s18, 2  ;;  %s972_s14 = sand.u32 1, %s1230_s15  }
 0x154   : > { %s973_s19 = scalar_lea.sflag [#allocation3], %s972_s14 }
 0x155   : > { %p1101_p2 = pnand %p1104_p1, %p1315_p6 }
 0x157   : > { %1225 = dma.done.wait (!%p1101_p2), %s973_s19, 8192  }
 0x158   : > { %1227 = vsyncadd (!%p1101_p2), %s973_s19, 4294959104  ;;  %p14_p3 = scmp.ge.s32.totalorder %s1298_s21, 4   ;;  %s1650_s15 = smov %s1234_s16 }
 0x159   : > { %s1651_s16 = smov %s1238_s17  ;;  %s1652_s17 = smov %s1309_s24 }
 0x15a   : > { %s1653_s18 = smov %s1298_s21  ;;  %16 = sbr.rel (!%p14_p3) target bundleno = 3 (0x3), region = 74 }
 0x161   :  { %978 = vsyncpa [#allocation3], 1 }
 0x162   :  { %980 = vsyncpa [#allocation3 + $0x1], 1 }

// kernel: bottleneck_forward.4
= control target key start
LH: loop header
LB: loop body
LE: loop exit
PB: predicated region body
PF: predicated region fallthrough
CT: control target
= control target key end

     0   :  { %s4056_s12 = smov 0   ;;  %s4926_s0 = inlined_call_operand.vmem [shape: bf16[2,288,384], index: 0, kind: input, shape index: {}]   ;;  %s4927_s1 = inlined_call_operand.vmem [shape: bf16[3,384,128], index: 1, kind: input, shape index: {}]   ;;  %s4928_s2 = inlined_call_operand.vmem [shape: f32[1,128], index: 2, kind: input, shape index: {}]   ;;  %s4929_s3 = inlined_call_operand.vmem [shape: bf16[2,256,128], index: 3, kind: output, shape index: {}]  }
   0x1 LB: > { %s2694_s13 = sadd.s32 4294967295, %s4034_s12   ;;  %p2698_p0 = scmp.ge.s32.totalorder %s4034_s12, 1  ;;  %s4034_s12 = sphi %s4056_s12, %s13_s12  }
   0x2   : > { %p137_p1 = scmp.lt.s32.totalorder %s4034_s12, 3 }
   0x4   : > { %p138_p2 = pnand %p2698_p0, %p137_p1 }
   0x6   : > { %141 = sbr.rel (%p138_p2) target bundleno = 555 (0x22b), region = 32 }
   0xd   : > { %v3869_v0 = vld [vmem:[%s4927_s1 + $0x100] sm:$0xff]   ;;  %v3872_v3 = vld [vmem:[%s4927_s1 + $0x108] sm:$0xff]   ;;  %v3875_v6 = vld [vmem:[%s4927_s1 + $0x110] sm:$0xff]   ;;  %p161_p3 = scmp.lt.s32.totalorder %s2694_s13, 1 }
   0xe   : > { %v4070_v1 = vld [vmem:[%s4927_s1 + $0x140] sm:$0xff]   ;;  %3132 = vmatprep.subr.bf16.mxu0 %v3869_v0  ;;  %v4083_v4 = vld [vmem:[%s4927_s1 + $0x148] sm:$0xff]   ;;  %v4095_v7 = vld [vmem:[%s4927_s1 + $0x150] sm:$0xff]  }
   0xf   : > { %v3871_v2 = vld [vmem:[%s4927_s1 + $0xc0] sm:$0xff]   ;;  %3684 = vmatprep.subr.bf16.mxu1 %v4070_v1  ;;  %v3874_v5 = vld [vmem:[%s4927_s1 + $0xc8] sm:$0xff]   ;;  %v3877_v8 = vld [vmem:[%s4927_s1 + $0xd0] sm:$0xff]   ;;  %s4935_s13 = smov (!%p161_p3, %s2694_s13), 1 }
  0x10   : > { %3133 = vmatpush3.bf16.msra.mxu0 %v3871_v2  ;;  %3692 = vmatpush3.bf16.msra.mxu1 %v4070_v1  ;;  %v3878_v9 = vld [vmem:[%s4927_s1 + $0x118] sm:$0xff]   ;;  %v3881_v12 = vld [vmem:[%s4927_s1 + $0x120] sm:$0xff]   ;;  %v3884_v15 = vld [vmem:[%s4927_s1 + $0x128] sm:$0xff]   ;;  %s3860_s23 = smul.u32 432, %s4935_s13  ;;  %s3004_s17 = sshll.u32 %s4935_s13, 7 }
  0x11   : > { %3134 = vmatprep.subr.bf16.mxu0 %v3872_v3  ;;  %3685 = vmatprep.subr.bf16.mxu1 %v4083_v4  ;;  %v4108_v10 = vld [vmem:[%s4927_s1 + $0x158] sm:$0xff]   ;;  %v4123_v13 = vld [vmem:[%s4927_s1 + $0x160] sm:$0xff]   ;;  %v4140_v16 = vld [vmem:[%s4927_s1 + $0x168] sm:$0xff]   ;;  %s4837_s20 = scalar_lea.vmem %s4929_s3, %s3004_s17 }
  0x12   : > { %v3880_v11 = vld [vmem:[%s4927_s1 + $0xd8] sm:$0xff]   ;;  %v3883_v14 = vld [vmem:[%s4927_s1 + $0xe0] sm:$0xff]   ;;  %v3886_v17 = vld [vmem:[%s4927_s1 + $0xe8] sm:$0xff]   ;;  %s4162_s7 = scalar_lea.vmem %s4926_s0, %s3860_s23 }
  0x13   : > { %v3887_v18 = vld [vmem:[%s4927_s1 + $0x130] sm:$0xff]   ;;  %v3890_v21 = vld [vmem:[%s4927_s1 + $0x138] sm:$0xff]   ;;  %v4178_v24 = vld [vmem:[%s4162_s7 + $0xe0] ss:$12 sps:$4 sm:$0xff]  }
  0x14   : > { %3135 = vmatpush3.bf16.msra.mxu0 %v3874_v5  ;;  %3693 = vmatpush3.bf16.msra.mxu1 %v4083_v4  ;;  %v4154_v19 = vld [vmem:[%s4927_s1 + $0x170] sm:$0xff]   ;;  %v4171_v22 = vld [vmem:[%s4927_s1 + $0x178] sm:$0xff]   ;;  %v3898_v26 = vld [vmem:[%s4927_s1 + $0x40] sm:$0xff]  }
  0x15   : > { %3136 = vmatprep.subr.bf16.mxu0 %v3875_v6  ;;  %3686 = vmatprep.subr.bf16.mxu1 %v4095_v7  ;;  %v3889_v20 = vld [vmem:[%s4927_s1 + $0xf0] sm:$0xff]   ;;  %v4175_v23 = vld [vmem:[%s4162_s7 + $0x1c] ss:$12 sps:$4 sm:$0xff]   ;;  %v4190_v27 = vld [vmem:[%s4162_s7 + $0x18] ss:$12 sps:$4 sm:$0xff]  }
  0x16   : > { %769 = vmatprep.mubr.bf16.mxu0 %v4175_v23  ;;  %v3892_v25 = vld [vmem:[%s4927_s1 + $0xf8] sm:$0xff]   ;;  %3572 = vmatprep.mubr.bf16.mxu1 %v4178_v24  ;;  %v3899_v29 = vld [vmem:[%s4927_s1] sm:$0xff]   ;;  %v3900_v30 = vld [vmem:[%s4927_s1 + $0x48] sm:$0xff]  }
  0x17   : > { %v4194_v28 = vld [vmem:[%s4162_s7 + $0xf8] ss:$12 sps:$4 sm:$0xff]   ;;  %v4205_v31 = vld [vmem:[%s4162_s7 + $0x34] ss:$12 sps:$4 sm:$0xff]   ;;  %v4208_v32 = vld [vmem:[%s4162_s7 + $0x110] ss:$12 sps:$4 sm:$0xff]  }
  0x18   : > { %3137 = vmatpush3.bf16.msra.mxu0 %v3877_v8  ;;  %3694 = vmatpush3.bf16.msra.mxu1 %v4095_v7  ;;  %v3901_v33 = vld [vmem:[%s4927_s1 + $0x8] sm:$0xff]   ;;  %v4218_v34 = vld [vmem:[%s4162_s7 + $0x30] ss:$12 sps:$4 sm:$0xff]   ;;  %v4253_v43 = vld [vmem:[%s4162_s7 + $0x158] ss:$12 sps:$4 sm:$0xff]  }
  0x19   : > { %3138 = vmatprep.subr.bf16.mxu0 %v3878_v9  ;;  %3687 = vmatprep.subr.bf16.mxu1 %v4108_v10  ;;  %v3907_v35 = vld [vmem:[%s4927_s1 + $0x50] sm:$0xff]   ;;  %v3909_v38 = vld [vmem:[%s4927_s1 + $0x58] sm:$0xff]   ;;  %v4239_v40 = vld [vmem:[%s4162_s7 + $0x140] ss:$12 sps:$4 sm:$0xff]  }
  0x1a   : > { %v4225_v36 = vld [vmem:[%s4162_s7 + $0x128] ss:$12 sps:$4 sm:$0xff]   ;;  %v4235_v39 = vld [vmem:[%s4162_s7 + $0x4c] ss:$12 sps:$4 sm:$0xff]   ;;  %v3916_v44 = vld [vmem:[%s4927_s1 + $0x60] sm:$0xff]  }
  0x1b   : > { %v3908_v37 = vld [vmem:[%s4927_s1 + $0x10] sm:$0xff]   ;;  %v3910_v41 = vld [vmem:[%s4927_s1 + $0x18] sm:$0xff]   ;;  %v3917_v45 = vld [vmem:[%s4927_s1 + $0x20] sm:$0xff]  }
  0x1c   : > { %3139 = vmatpush3.bf16.msra.mxu0 %v3880_v11  ;;  %3695 = vmatpush3.bf16.msra.mxu1 %v4108_v10  ;;  %v4250_v42 = vld [vmem:[%s4162_s7 + $0x48] ss:$12 sps:$4 sm:$0xff]   ;;  %v4267_v47 = vld [vmem:[%s4162_s7 + $0x64] ss:$12 sps:$4 sm:$0xff]   ;;  %v4284_v51 = vld [vmem:[%s4162_s7 + $0x60] ss:$12 sps:$4 sm:$0xff]  }
  0x1d   : > { %3140 = vmatprep.subr.bf16.mxu0 %v3881_v12  ;;  %3688 = vmatprep.subr.bf16.mxu1 %v4123_v13  ;;  %v3918_v46 = vld [vmem:[%s4927_s1 + $0x68] sm:$0xff]   ;;  %v4270_v48 = vld [vmem:[%s4162_s7 + $0x170] ss:$12 sps:$4 sm:$0xff]   ;;  %v3935_v58 = vld [vmem:[%s4927_s1 + $0x80] sm:$0xff]  }
  0x1e   : > { %v3919_v49 = vld [vmem:[%s4927_s1 + $0x28] sm:$0xff]   ;;  %v3925_v50 = vld [vmem:[%s4927_s1 + $0x70] sm:$0xff]   ;;  %v3927_v54 = vld [vmem:[%s4927_s1 + $0x78] sm:$0xff]  }
  0x1f   : > { %v3924_v52 = vld [vmem:[%s4162_s7 + $0x188] ss:$12 sps:$4 sm:$0xff]   ;;  %v3933_v56 = vld [vmem:[%s4162_s7 + $0x4] ss:$12 sps:$4 sm:$0xff]   ;;  %v3928_v57 = vld [vmem:[%s4927_s1 + $0x38] sm:$0xff]  }
  0x20   : > { %3141 = vmatpush3.bf16.msra.mxu0 %v3883_v14  ;;  %3696 = vmatpush3.bf16.msra.mxu1 %v4123_v13  ;;  %v3926_v53 = vld [vmem:[%s4927_s1 + $0x30] sm:$0xff]   ;;  %v4296_v55 = vld [vmem:[%s4162_s7 + $0x7c] ss:$12 sps:$4 sm:$0xff]   ;;  %v3931_v59 = vld [vmem:[%s4162_s7] ss:$12 sps:$4 sm:$0xff]  }
  0x21   : > { %3142 = vmatprep.subr.bf16.mxu0 %v3884_v15  ;;  %3689 = vmatprep.subr.bf16.mxu1 %v4140_v16  ;;  %v4311_v60 = vld [vmem:[%s4162_s7 + $0x78] ss:$12 sps:$4 sm:$0xff]   ;;  %v4315_v61 = vld [vmem:[%s4162_s7 + $0x94] ss:$12 sps:$4 sm:$0xff]   ;;  %v3942_v62 = vld [vmem:[%s4927_s1 + $0x88] sm:$0xff]  }
  0x22   : > { %v3949_v63 = vld [vmem:[%s4927_s1 + $0x90] sm:$0xff]   ;;  %v3956_v2 = vld [vmem:[%s4927_s1 + $0x98] sm:$0xff]   ;;  %v3976_v5 = vld [vmem:[%s4927_s1 + $0x1c0] sm:$0xff]  }
  0x23   : > { %v4329_v0 = vld [vmem:[%s4162_s7 + $0x90] ss:$12 sps:$4 sm:$0xff]   ;;  %v4343_v3 = vld [vmem:[%s4162_s7 + $0xa8] ss:$12 sps:$4 sm:$0xff]   ;;  %v4365_v9 = vld [vmem:[%s4162_s7 + $0xc0] ss:$12 sps:$4 sm:$0xff]  }
  0x24   : > { %3143 = vmatpush3.bf16.msra.mxu0 %v3886_v17  ;;  %3697 = vmatpush3.bf16.msra.mxu1 %v4140_v16  ;;  %v4352_v6 = vld [vmem:[%s4162_s7 + $0xc4] ss:$12 sps:$4 sm:$0xff]   ;;  %v3991_v11 = vld [vmem:[%s4927_s1 + $0xb8] sm:$0xff]   ;;  %v4404_v17 = vld [vmem:[%s4162_s7 + $0x108] ss:$12 sps:$4 sm:$0xff]  }
  0x25   : > { %3144 = vmatprep.subr.bf16.mxu0 %v3887_v18  ;;  %3690 = vmatprep.subr.bf16.mxu1 %v4154_v19  ;;  %v3978_v8 = vld [vmem:[%s4927_s1 + $0xb0] sm:$0xff]   ;;  %v4378_v12 = vld [vmem:[%s4162_s7 + $0xd8] ss:$12 sps:$4 sm:$0xff]  }
  0x26   : > { %v4388_v14 = vld [vmem:[%s4162_s7 + $0xf0] ss:$12 sps:$4 sm:$0xff]   ;;  %v4391_v15 = vld [vmem:[%s4162_s7 + $0x10c] ss:$12 sps:$4 sm:$0xff]  }
  0x27   : > { %v4407_v18 = vld [vmem:[%s4162_s7 + $0x124] ss:$12 sps:$4 sm:$0xff]  }
  0x28   : > { %3145 = vmatpush3.bf16.msra.mxu0 %v3889_v20  ;;  %3698 = vmatpush3.bf16.msra.mxu1 %v4154_v19  ;;  %v4417_v20 = vld [vmem:[%s4162_s7 + $0x13c] ss:$12 sps:$4 sm:$0xff]  }
  0x29   : > { %3146 = vmatprep.subr.bf16.mxu0 %v3890_v21  ;;  %3691 = vmatprep.subr.bf16.mxu1 %v4171_v22  ;;  %v4424_v21 = vld [vmem:[%s4162_s7 + $0x138] ss:$12 sps:$4 sm:$0xff]  }
  0x2c   : > { %3147 = vmatpush3.bf16.msra.mxu0 %v3892_v25  ;;  %3699 = vmatpush3.bf16.msra.mxu1 %v4171_v22  ;;  %v4437_v25 = vld [vmem:[%s4162_s7 + $0x16c] ss:$12 sps:$4 sm:$0xff]  }
  0x2d   : > { %3540 = vmatprep.subr.bf16.mxu0 %v4070_v1  ;;  %3268 = vmatprep.subr.bf16.mxu1 %v3898_v26  ;;  %v4444_v26 = vld [vmem:[%s4162_s7 + $0x168] ss:$12 sps:$4 sm:$0xff]  }
  0x2f   : > { %770 = vmatmul.mubr.bf16.vlgmr.msra.gmra.mrb[0].mxu0 %v4190_v27  ;;  %3573 = vmatmul.mubr.bf16.vlgmr.msra.gmra.mrb[0].mxu1 %v4194_v28 }
  0x30   : > { %3541 = vmatpush3.bf16.msra.mxu0 %v4070_v1  ;;  %3269 = vmatpush3.bf16.msra.mxu1 %v3899_v29  ;;  %v4333_v1 = vld [vmem:[%s4162_s7 + $0xac] ss:$12 sps:$4 sm:$0xff]  }
  0x31   : > { %3270 = vmatprep.subr.bf16.mxu1 %v3900_v30  ;;  %777 = vmatprep.mubr.bf16.mxu0 %v4205_v31  ;;  %v4454_v29 = vld [vmem:[%s4162_s7 + $0x180] ss:$12 sps:$4 sm:$0xff]  }
  0x32   : > { %3576 = vmatprep.mubr.bf16.mxu1 %v4208_v32  ;;  %3542 = vmatprep.subr.bf16.mxu0 %v4083_v4  ;;  %v3974_v30 = vld [vmem:[%s4162_s7 + $0x20] ss:$12 sps:$4 sm:$0xff]  }
  0x34   : > { %3271 = vmatpush3.bf16.msra.mxu1 %v3901_v33  ;;  %3543 = vmatpush3.bf16.msra.mxu0 %v4083_v4  ;;  %v3963_v4 = vld [vmem:[%s4927_s1 + $0xa0] sm:$0xff]  }
  0x35   : > { %3272 = vmatprep.subr.bf16.mxu1 %v3907_v35  ;;  %3544 = vmatprep.subr.bf16.mxu0 %v4095_v7  ;;  %v3975_v33 = vld [vmem:[%s4162_s7 + $0x38] ss:$12 sps:$4 sm:$0xff]  }
  0x36   : > { %v3977_v35 = vld [vmem:[%s4927_s1 + $0x180] sm:$0xff]  }
  0x37   : > { %778 = vmatmul.mubr.bf16.gmra.mrb[4].mxu0 %v4218_v34  ;;  %3577 = vmatmul.mubr.bf16.gmra.mrb[4].mxu1 %v4225_v36 }
  0x38   : > { %3273 = vmatpush3.bf16.msra.mxu1 %v3908_v37  ;;  %785 = vmatprep.mubr.bf16.mxu0 %v4235_v39  ;;  %v3981_v37 = vld [vmem:[%s4162_s7 + $0x50] ss:$12 sps:$4 sm:$0xff]  }
  0x39   : > { %3274 = vmatprep.subr.bf16.mxu1 %v3909_v38  ;;  %3580 = vmatprep.mubr.bf16.mxu1 %v4239_v40  ;;  %v3979_v38 = vld [vmem:[%s4927_s1 + $0x1c8] sm:$0xff]  }
  0x3a   : > { %3545 = vmatpush3.bf16.msra.mxu0 %v4095_v7  ;;  %v3970_v7 = vld [vmem:[%s4927_s1 + $0xa8] sm:$0xff]  }
  0x3b   : > { %3546 = vmatprep.subr.bf16.mxu0 %v4108_v10 }
  0x3c   : > { %3275 = vmatpush3.bf16.msra.mxu1 %v3910_v41  ;;  %v3980_v41 = vld [vmem:[%s4927_s1 + $0x188] sm:$0xff]  }
  0x3d   : > { %3276 = vmatprep.subr.bf16.mxu1 %v3916_v44  ;;  %v3983_v44 = vld [vmem:[%s4927_s1 + $0x1d0] sm:$0xff]  }
  0x3e   : > { %3547 = vmatpush3.bf16.msra.mxu0 %v4108_v10  ;;  %v4368_v10 = vld [vmem:[%s4162_s7 + $0xdc] ss:$12 sps:$4 sm:$0xff]  }
  0x3f   : > { %786 = vmatmul.mubr.bf16.gmra.mrb[8].mxu0 %v4250_v42  ;;  %3581 = vmatmul.mubr.bf16.gmra.mrb[8].mxu1 %v4253_v43 }
  0x40   : > { %3277 = vmatpush3.bf16.msra.mxu1 %v3917_v45  ;;  %793 = vmatprep.mubr.bf16.mxu0 %v4267_v47  ;;  %v3982_v45 = vld [vmem:[%s4162_s7 + $0x68] ss:$12 sps:$4 sm:$0xff]  }
  0x41   : > { %3278 = vmatprep.subr.bf16.mxu1 %v3918_v46  ;;  %3584 = vmatprep.mubr.bf16.mxu1 %v4270_v48  ;;  %v3984_v46 = vld [vmem:[%s4927_s1 + $0x190] sm:$0xff]  }
  0x42   : > { %3548 = vmatprep.subr.bf16.mxu0 %v4123_v13 }
  0x43   : > { %3549 = vmatpush3.bf16.msra.mxu0 %v4123_v13  ;;  %v4381_v13 = vld [vmem:[%s4162_s7 + $0xf4] ss:$12 sps:$4 sm:$0xff]  }
  0x44   : > { %3279 = vmatpush3.bf16.msra.mxu1 %v3919_v49  ;;  %3550 = vmatprep.subr.bf16.mxu0 %v4140_v16  ;;  %v3987_v49 = vld [vmem:[%s4162_s7 + $0x80] ss:$12 sps:$4 sm:$0xff]  }
  0x45   : > { %3280 = vmatprep.subr.bf16.mxu1 %v3925_v50  ;;  %v3985_v50 = vld [vmem:[%s4927_s1 + $0x1d8] sm:$0xff]  }
  0x47   : > { %794 = vmatmul.mubr.bf16.gmra.mrb[12].mxu0 %v4284_v51  ;;  %3585 = vmatmul.mubr.bf16.gmra.mrb[12].mxu1 %v3924_v52  ;;  %v3986_v52 = vld [vmem:[%s4927_s1 + $0x198] sm:$0xff]  }
  0x48   : > { %3281 = vmatpush3.bf16.msra.mxu1 %v3926_v53  ;;  %801 = vmatprep.mubr.bf16.mxu0 %v4296_v55  ;;  %v3989_v53 = vld [vmem:[%s4927_s1 + $0x1e0] sm:$0xff]  }
  0x49   : > { %3282 = vmatprep.subr.bf16.mxu1 %v3927_v54  ;;  %1251 = vmatprep.mubr.bf16.mxu1 %v3933_v56  ;;  %v3988_v54 = vld [vmem:[%s4162_s7 + $0x98] ss:$12 sps:$4 sm:$0xff]  }
  0x4a   : > { %3551 = vmatpush3.bf16.msra.mxu0 %v4140_v16  ;;  %v4396_v16 = vld [vmem:[%s4927_s1 + $0x200] sm:$0xff]  }
  0x4b   : > { %3552 = vmatprep.subr.bf16.mxu0 %v4154_v19  ;;  %v3990_v56 = vld [vmem:[%s4927_s1 + $0x1a0] sm:$0xff]  }
  0x4c   : > { %3283 = vmatpush3.bf16.msra.mxu1 %v3928_v57  ;;  %v3994_v57 = vld [vmem:[%s4162_s7 + $0xb0] ss:$12 sps:$4 sm:$0xff]  }
  0x4d   : > { %3588 = vmatprep.subr.bf16.mxu1 %v3935_v58 }
  0x4e   : > { %3553 = vmatpush3.bf16.msra.mxu0 %v4154_v19  ;;  %v4414_v19 = vld [vmem:[%s4162_s7 + $0x120] ss:$12 sps:$4 sm:$0xff]  }
  0x4f   : > { %802 = vmatmul.mubr.bf16.gmra.mrb[16].mxu0 %v4311_v60  ;;  %1252 = vmatmul.mubr.bf16.vlgmr.msra.gmra.mrb[16].mxu1 %v3931_v59  ;;  %v3993_v59 = vld [vmem:[%s4927_s1 + $0x1a8] sm:$0xff]  }
  0x50   : > { %3589 = vmatpush3.bf16.msra.mxu1 %v3935_v58  ;;  %809 = vmatprep.mubr.bf16.mxu0 %v4315_v61  ;;  %v3992_v58 = vld [vmem:[%s4927_s1 + $0x1e8] sm:$0xff]  }
  0x51   : > { %1259 = vmatprep.mubr.bf16.mxu1 %v4175_v23  ;;  %3590 = vmatprep.subr.bf16.mxu1 %v3942_v62  ;;  %v4434_v23 = vld [vmem:[%s4162_s7 + $0x150] ss:$12 sps:$4 sm:$0xff]  }
  0x52   : > { %3554 = vmatprep.subr.bf16.mxu0 %v4171_v22 }
  0x53   : > { %3555 = vmatpush3.bf16.msra.mxu0 %v4171_v22  ;;  %v4427_v22 = vld [vmem:[%s4162_s7 + $0x154] ss:$12 sps:$4 sm:$0xff]  }
  0x54   : > { %3591 = vmatpush3.bf16.msra.mxu1 %v3942_v62  ;;  %3404 = vmatprep.subr.bf16.mxu0 %v3976_v5  ;;  %v3996_v62 = vld [vmem:[%s4927_s1 + $0x1f0] sm:$0xff]   ;;  %v3998_v5 = vld [vmem:[%s4927_s1 + $0x1f8] sm:$0xff]  }
  0x55   : > { %3592 = vmatprep.subr.bf16.mxu1 %v3949_v63 }
  0x57   : > { %810 = vmatmul.mubr.bf16.gmra.mrb[20].mxu0 %v4329_v0  ;;  %1260 = vmatmul.mubr.bf16.gmra.mrb[20].mxu1 %v4190_v27  ;;  %v4447_v27 = vld [vmem:[%s4162_s7 + $0x184] ss:$12 sps:$4 sm:$0xff]  }
  0x58   : > { %817 = vmatprep.mubr.bf16.mxu0 %v4333_v1  ;;  %1267 = vmatprep.mubr.bf16.mxu1 %v4205_v31 }
  0x59   : > { %3593 = vmatpush3.bf16.msra.mxu1 %v3949_v63  ;;  %v3995_v63 = vld [vmem:[%s4162_s7 + $0xc8] ss:$12 sps:$4 sm:$0xff]  }
  0x5a   : > { %3594 = vmatprep.subr.bf16.mxu1 %v3956_v2 }
  0x5d   : > { %3595 = vmatpush3.bf16.msra.mxu1 %v3956_v2  ;;  %v3997_v2 = vld [vmem:[%s4927_s1 + $0x1b0] sm:$0xff]  }
  0x5e   : > { %3596 = vmatprep.subr.bf16.mxu1 %v3963_v4 }
  0x5f   : > { %818 = vmatmul.mubr.bf16.gmra.mrb[24].mxu0 %v4343_v3  ;;  %1268 = vmatmul.mubr.bf16.gmra.mrb[24].mxu1 %v4218_v34 }
  0x60   : > { %825 = vmatprep.mubr.bf16.mxu0 %v4352_v6  ;;  %1275 = vmatprep.mubr.bf16.mxu1 %v4235_v39 }
  0x61   : > { %3597 = vmatpush3.bf16.msra.mxu1 %v3963_v4  ;;  %v4000_v4 = vld [vmem:[%s4162_s7 + $0x8] ss:$12 sps:$4 sm:$0xff]  }
  0x62   : > { %3598 = vmatprep.subr.bf16.mxu1 %v3970_v7 }
  0x65   : > { %3599 = vmatpush3.bf16.msra.mxu1 %v3970_v7  ;;  %v3999_v7 = vld [vmem:[%s4927_s1 + $0x1b8] sm:$0xff]  }
  0x66   : > { %3600 = vmatprep.subr.bf16.mxu1 %v3978_v8 }
  0x67   : > { %826 = vmatmul.mubr.bf16.gmra.mrb[28].mxu0 %v4365_v9  ;;  %1276 = vmatmul.mubr.bf16.gmra.mrb[28].mxu1 %v4250_v42 }
  0x68   : > { %833 = vmatprep.mubr.bf16.mxu0 %v4368_v10  ;;  %1283 = vmatprep.mubr.bf16.mxu1 %v4267_v47 }
  0x69   : > { %3601 = vmatpush3.bf16.msra.mxu1 %v3978_v8  ;;  %v4002_v8 = vld [vmem:[%s4927_s1 + $0x208] sm:$0xff]  }
  0x6a   : > { %3602 = vmatprep.subr.bf16.mxu1 %v3991_v11 }
  0x6d   : > { %3603 = vmatpush3.bf16.msra.mxu1 %v3991_v11  ;;  %v4003_v11 = vld [vmem:[%s4927_s1 + $0x210] sm:$0xff]  }
  0x6e   : > { %3636 = vmatprep.subr.bf16.mxu1 %v4396_v16 }
  0x6f   : > { %834 = vmatmul.mubr.bf16.gmra.mrb[32].mxu0 %v4378_v12  ;;  %1284 = vmatmul.mubr.bf16.gmra.mrb[32].mxu1 %v4284_v51 }
  0x70   : > { %841 = vmatprep.mubr.bf16.mxu0 %v4381_v13  ;;  %1291 = vmatprep.mubr.bf16.mxu1 %v4296_v55 }
  0x77   : > { %842 = vmatmul.mubr.bf16.gmra.mrb[36].mxu0 %v4388_v14  ;;  %1292 = vmatmul.mubr.bf16.gmra.mrb[36].mxu1 %v4311_v60 }
  0x78   : > { %849 = vmatprep.mubr.bf16.mxu0 %v4391_v15  ;;  %1299 = vmatprep.mubr.bf16.mxu1 %v4315_v61 }
  0x7f   : > { %850 = vmatmul.mubr.bf16.gmra.mrb[40].mxu0 %v4404_v17  ;;  %1300 = vmatmul.mubr.bf16.gmra.mrb[40].mxu1 %v4329_v0 }
  0x80   : > { %857 = vmatprep.mubr.bf16.mxu0 %v4407_v18  ;;  %1307 = vmatprep.mubr.bf16.mxu1 %v4333_v1 }
  0x87   : > { %858 = vmatmul.mubr.bf16.gmra.mrb[44].mxu0 %v4414_v19  ;;  %1308 = vmatmul.mubr.bf16.gmra.mrb[44].mxu1 %v4343_v3 }
  0x88   : > { %865 = vmatprep.mubr.bf16.mxu0 %v4417_v20  ;;  %1315 = vmatprep.mubr.bf16.mxu1 %v4352_v6 }
  0x8f   : > { %866 = vmatmul.mubr.bf16.gmra.mrb[48].mxu0 %v4424_v21  ;;  %1316 = vmatmul.mubr.bf16.gmra.mrb[48].mxu1 %v4365_v9 }
  0x90   : > { %873 = vmatprep.mubr.bf16.mxu0 %v4427_v22  ;;  %1323 = vmatprep.mubr.bf16.mxu1 %v4368_v10 }
  0x97   : > { %874 = vmatmul.mubr.bf16.gmra.mrb[52].mxu0 %v4434_v23  ;;  %1324 = vmatmul.mubr.bf16.gmra.mrb[52].mxu1 %v4378_v12 }
  0x98   : > { %881 = vmatprep.mubr.bf16.mxu0 %v4437_v25  ;;  %1331 = vmatprep.mubr.bf16.mxu1 %v4381_v13 }
  0x9f   : > { %882 = vmatmul.mubr.bf16.gmra.mrb[56].mxu0 %v4444_v26  ;;  %1332 = vmatmul.mubr.bf16.gmra.mrb[56].mxu1 %v4388_v14 }
  0xa0   : > { %889 = vmatprep.mubr.bf16.mxu0 %v4447_v27  ;;  %1339 = vmatprep.mubr.bf16.mxu1 %v4391_v15 }
  0xa7   : > { %890 = vmatmul.mubr.bf16.gmra.mrb[60].mxu0 %v4454_v29  ;;  %1340 = vmatmul.mubr.bf16.gmra.mrb[60].mxu1 %v4404_v17 }
  0xa8   : > { %3556 = vmatprep.mubr.bf16.mxu0 %v3974_v30  ;;  %1347 = vmatprep.mubr.bf16.mxu1 %v4407_v18 }
  0xaf   : > { %3557 = vmatmul.mubr.bf16.vlgmr.msra.gmra.mrb[64].mxu0 %v3975_v33  ;;  %1348 = vmatmul.mubr.bf16.gmra.mrb[64].mxu1 %v4414_v19 }
  0xb0   : > { %3405 = vmatpush3.bf16.msra.mxu0 %v3977_v35  ;;  %3560 = vmatprep.mubr.bf16.mxu0 %v3981_v37 }
  0xb1   : > { %3406 = vmatprep.subr.bf16.mxu0 %v3979_v38  ;;  %1355 = vmatprep.mubr.bf16.mxu1 %v4417_v20 }
  0xb4   : > { %3407 = vmatpush3.bf16.msra.mxu0 %v3980_v41 }
  0xb5   : > { %3408 = vmatprep.subr.bf16.mxu0 %v3983_v44  ;;  %v4015_v44 = vld [vmem:[%s4162_s7 + $0xc8] ss:$12 sps:$4 sm:$0xff]  }
  0xb7   : > { %3561 = vmatmul.mubr.bf16.gmra.mrb[68].mxu0 %v3982_v45  ;;  %1356 = vmatmul.mubr.bf16.gmra.mrb[68].mxu1 %v4424_v21 }
  0xb8   : > { %3409 = vmatpush3.bf16.msra.mxu0 %v3984_v46  ;;  %3564 = vmatprep.mubr.bf16.mxu0 %v3987_v49 }
  0xb9   : > { %3410 = vmatprep.subr.bf16.mxu0 %v3985_v50  ;;  %1363 = vmatprep.mubr.bf16.mxu1 %v4427_v22 }
  0xbc   : > { %3411 = vmatpush3.bf16.msra.mxu0 %v3986_v52  ;;  %v4016_v52 = vld [vmem:[%s4162_s7 + $0xe0] ss:$12 sps:$4 sm:$0xff]  }
  0xbd   : > { %3412 = vmatprep.subr.bf16.mxu0 %v3989_v53 }
  0xbf   : > { %3565 = vmatmul.mubr.bf16.gmra.mrb[72].mxu0 %v3988_v54  ;;  %1364 = vmatmul.mubr.bf16.gmra.mrb[72].mxu1 %v4434_v23 }
  0xc0   : > { %3413 = vmatpush3.bf16.msra.mxu0 %v3990_v56  ;;  %3568 = vmatprep.mubr.bf16.mxu0 %v3994_v57 }
  0xc1   : > { %3414 = vmatprep.subr.bf16.mxu0 %v3992_v58  ;;  %1371 = vmatprep.mubr.bf16.mxu1 %v4437_v25  ;;  %v4017_v58 = vld [vmem:[%s4162_s7 + $0xf8] ss:$12 sps:$4 sm:$0xff]  }
  0xc4   : > { %3415 = vmatpush3.bf16.msra.mxu0 %v3993_v59 }
  0xc5   : > { %3416 = vmatprep.subr.bf16.mxu0 %v3996_v62 }
  0xc7   : > { %3569 = vmatmul.mubr.bf16.gmra.mrb[76].mxu0 %v3995_v63  ;;  %1372 = vmatmul.mubr.bf16.gmra.mrb[76].mxu1 %v4444_v26 }
  0xc8   : > { %3417 = vmatpush3.bf16.msra.mxu0 %v3997_v2  ;;  %3604 = vmatprep.mubr.bf16.mxu1 %v4000_v4 }
  0xc9   : > { %3418 = vmatprep.subr.bf16.mxu0 %v3998_v5  ;;  %2086 = vmatprep.mubr.bf16.mxu0 %v4205_v31  ;;  %v4004_v31 = vld [vmem:[%s4927_s1 + $0x218] sm:$0xff]  }
  0xcc   : > { %3419 = vmatpush3.bf16.msra.mxu0 %v3999_v7  ;;  %v4018_v7 = vld [vmem:[%s4162_s7 + $0x110] ss:$12 sps:$4 sm:$0xff]  }
  0xcf   : > { %3605 = vmatmul.mubr.bf16.vlgmr.msra.gmra.mrb[80].mxu1 %v3974_v30  ;;  %2087 = vmatmul.mubr.bf16.vlgmr.msra.gmra.mrb[80].mxu0 %v4218_v34  ;;  %v4005_v34 = vld [vmem:[%s4927_s1 + $0x220] sm:$0xff]  }
  0xd0   : > { %3637 = vmatpush3.bf16.msra.mxu1 %v4396_v16  ;;  %3608 = vmatprep.mubr.bf16.mxu1 %v3975_v33  ;;  %v4013_v30 = vld [vmem:[%s4162_s7 + $0x98] ss:$12 sps:$4 sm:$0xff]  }
  0xd1   : > { %2094 = vmatprep.mubr.bf16.mxu0 %v4235_v39  ;;  %3638 = vmatprep.subr.bf16.mxu1 %v4002_v8  ;;  %v4006_v39 = vld [vmem:[%s4927_s1 + $0x228] sm:$0xff]  }
  0xd4   : > { %3639 = vmatpush3.bf16.msra.mxu1 %v4002_v8 }
  0xd5   : > { %3640 = vmatprep.subr.bf16.mxu1 %v4003_v11 }
  0xd7   : > { %3609 = vmatmul.mubr.bf16.gmra.mrb[84].mxu1 %v3981_v37  ;;  %2095 = vmatmul.mubr.bf16.gmra.mrb[84].mxu0 %v4250_v42  ;;  %v4007_v42 = vld [vmem:[%s4927_s1 + $0x230] sm:$0xff]  }
  0xd8   : > { %3612 = vmatprep.mubr.bf16.mxu1 %v3982_v45  ;;  %2102 = vmatprep.mubr.bf16.mxu0 %v4267_v47  ;;  %v4008_v47 = vld [vmem:[%s4927_s1 + $0x238] sm:$0xff]  }
  0xd9   : > { %3641 = vmatpush3.bf16.msra.mxu1 %v4003_v11  ;;  %v4014_v37 = vld [vmem:[%s4162_s7 + $0xb0] ss:$12 sps:$4 sm:$0xff]  }
  0xda   : > { %3642 = vmatprep.subr.bf16.mxu1 %v4004_v31 }
  0xdd   : > { %3643 = vmatpush3.bf16.msra.mxu1 %v4004_v31 }
  0xde   : > { %3644 = vmatprep.subr.bf16.mxu1 %v4005_v34 }
  0xdf   : > { %3613 = vmatmul.mubr.bf16.gmra.mrb[88].mxu1 %v3987_v49  ;;  %2103 = vmatmul.mubr.bf16.gmra.mrb[88].mxu0 %v4284_v51 }
  0xe0   : > { %3616 = vmatprep.mubr.bf16.mxu1 %v3988_v54  ;;  %2110 = vmatprep.mubr.bf16.mxu0 %v4296_v55  ;;  %v4009_v55 = vld [vmem:[%s4162_s7 + $0x38] ss:$12 sps:$4 sm:$0xff]  }
  0xe1   : > { %3645 = vmatpush3.bf16.msra.mxu1 %v4005_v34 }
  0xe2   : > { %3646 = vmatprep.subr.bf16.mxu1 %v4006_v39 }
  0xe5   : > { %3647 = vmatpush3.bf16.msra.mxu1 %v4006_v39  ;;  %v4019_v39 = vld [vmem:[%s4162_s7 + $0x128] ss:$12 sps:$4 sm:$0xff]  }
  0xe6   : > { %3648 = vmatprep.subr.bf16.mxu1 %v4007_v42 }
  0xe7   : > { %3617 = vmatmul.mubr.bf16.gmra.mrb[92].mxu1 %v3994_v57  ;;  %2111 = vmatmul.mubr.bf16.gmra.mrb[92].mxu0 %v4311_v60 }
  0xe8   : > { %3620 = vmatprep.mubr.bf16.mxu1 %v3995_v63  ;;  %2118 = vmatprep.mubr.bf16.mxu0 %v4315_v61  ;;  %v4010_v61 = vld [vmem:[%s4162_s7 + $0x50] ss:$12 sps:$4 sm:$0xff]  }
  0xe9   : > { %3649 = vmatpush3.bf16.msra.mxu1 %v4007_v42 }
  0xea   : > { %3650 = vmatprep.subr.bf16.mxu1 %v4008_v47 }
  0xed   : > { %3651 = vmatpush3.bf16.msra.mxu1 %v4008_v47 }
  0xef   : > { %3621 = vmatmul.mubr.bf16.gmra.mrb[0].mxu1 %v4178_v24  ;;  %2119 = vmatmul.mubr.bf16.gmra.mrb[96].mxu0 %v4329_v0 }
  0xf0   : > { %3624 = vmatprep.mubr.bf16.mxu1 %v4194_v28  ;;  %2126 = vmatprep.mubr.bf16.mxu0 %v4333_v1 }
  0xf7   : > { %3625 = vmatmul.mubr.bf16.gmra.mrb[4].mxu1 %v4208_v32  ;;  %2127 = vmatmul.mubr.bf16.gmra.mrb[100].mxu0 %v4343_v3  ;;  %v4011_v3 = vld [vmem:[%s4162_s7 + $0x68] ss:$12 sps:$4 sm:$0xff]  }
  0xf8   : > { %3628 = vmatprep.mubr.bf16.mxu1 %v4225_v36  ;;  %2134 = vmatprep.mubr.bf16.mxu0 %v4352_v6 }
  0xff   : > { %3629 = vmatmul.mubr.bf16.gmra.mrb[8].mxu1 %v4239_v40  ;;  %2135 = vmatmul.mubr.bf16.gmra.mrb[104].mxu0 %v4365_v9 }
 0x100   : > { %3632 = vmatprep.mubr.bf16.mxu1 %v4253_v43  ;;  %2142 = vmatprep.mubr.bf16.mxu0 %v4368_v10 }
 0x102   : > { %v3148_v24 = vpop.f32.mrb[0].mxu0 }
 0x103   : > { %v3149_v28 = vpop.f32.mrb[1].mxu0 }
 0x104   : > { %v4563_v51 = vadd.f32 %v3149_v28, %v3148_v24  ;;  %v3151_v32 = vpop.f32.mrb[2].mxu0 }
 0x105   : > { %v3152_v60 = vpop.f32.mrb[3].mxu0 }
 0x106   : > { %v4566_v36 = vadd.f32 %v3152_v60, %v3151_v32  ;;  %v4020_v60 = vld [vmem:[%s4162_s7 + $0x140] ss:$12 sps:$4 sm:$0xff]  }
 0x107   : > { %3633 = vmatmul.mubr.bf16.gmra.mrb[12].mxu1 %v4270_v48  ;;  %2143 = vmatmul.mubr.bf16.gmra.mrb[108].mxu0 %v4378_v12  ;;  %v4012_v12 = vld [vmem:[%s4162_s7 + $0x80] ss:$12 sps:$4 sm:$0xff]  }
 0x108   : > { %2150 = vmatprep.mubr.bf16.mxu0 %v4381_v13  ;;  %3652 = vmatprep.mubr.bf16.mxu1 %v4009_v55 }
 0x10a   : > { %v3154_v40 = vpop.f32.mrb[4].mxu0 }
 0x10b   : > { %v3155_v43 = vpop.f32.mrb[5].mxu0 }
 0x10c   : > { %v4572_v0 = vadd.f32 %v3155_v43, %v3154_v40  ;;  %v3157_v1 = vpop.f32.mrb[6].mxu0 }
 0x10d   : > { %v3158_v6 = vpop.f32.mrb[7].mxu0 }
 0x10e   : > { %v4575_v9 = vadd.f32 %v3158_v6, %v3157_v1 }
 0x10f   : > { %2151 = vmatmul.mubr.bf16.gmra.mrb[112].mxu0 %v4388_v14  ;;  %3653 = vmatmul.mubr.bf16.vlgmr.msra.gmra.mrb[80].mxu1 %v4010_v61 }
 0x110   : > { %2158 = vmatprep.mubr.bf16.mxu0 %v4391_v15  ;;  %3656 = vmatprep.mubr.bf16.mxu1 %v4011_v3  ;;  %v4021_v3 = vld [vmem:[%s4162_s7 + $0x158] ss:$12 sps:$4 sm:$0xff]  }
 0x112   : > { %v3160_v48 = vpop.f32.mrb[8].mxu0 }
 0x113   : > { %v3161_v10 = vpop.f32.mrb[9].mxu0 }
 0x114   : > { %v4580_v13 = vadd.f32 %v3161_v10, %v3160_v48  ;;  %v3163_v16 = vpop.f32.mrb[10].mxu0 }
 0x115   : > { %v3164_v33 = vpop.f32.mrb[11].mxu0 }
 0x116   : > { %v4583_v35 = vadd.f32 %v3164_v33, %v3163_v16  ;;  %v4022_v33 = vld [vmem:[%s4162_s7 + $0x170] ss:$12 sps:$4 sm:$0xff]  }
 0x117   : > { %2159 = vmatmul.mubr.bf16.gmra.mrb[116].mxu0 %v4404_v17  ;;  %3657 = vmatmul.mubr.bf16.gmra.mrb[84].mxu1 %v4012_v12 }
 0x118   : > { %2166 = vmatprep.mubr.bf16.mxu0 %v4407_v18  ;;  %3660 = vmatprep.mubr.bf16.mxu1 %v4013_v30 }
 0x11a   : > { %v3166_v14 = vpop.f32.mrb[12].mxu0 }
 0x11b   : > { %v3167_v15 = vpop.f32.mrb[13].mxu0 }
 0x11c   : > { %v4588_v38 = vadd.f32 %v3167_v15, %v3166_v14  ;;  %v3169_v41 = vpop.f32.mrb[14].mxu0 }
 0x11d   : > { %v3170_v45 = vpop.f32.mrb[15].mxu0 }
 0x11e   : > { %v4591_v46 = vadd.f32 %v3170_v45, %v3169_v41  ;;  %v4025_v45 = vld [vmem:[%s4162_s7 + $0x188] ss:$12 sps:$4 sm:$0xff]  }
 0x11f   : > { %2167 = vmatmul.mubr.bf16.gmra.mrb[120].mxu0 %v4414_v19  ;;  %3661 = vmatmul.mubr.bf16.gmra.mrb[88].mxu1 %v4014_v37 }
 0x120   : > { %2174 = vmatprep.mubr.bf16.mxu0 %v4417_v20  ;;  %3664 = vmatprep.mubr.bf16.mxu1 %v4015_v44  ;;  %v4023_v44 = vld [vmem:[%s4162_s7 + $0x19c] ss:$12 sps:$4 sm:$0xff]  }
 0x122   : > { %v3172_v17 = vpop.f32.mrb[16].mxu0  ;;  %v3284_v18 = vpop.f32.mrb[16].mxu1 }
 0x123   : > { %v3173_v49 = vpop.f32.mrb[17].mxu0  ;;  %v3285_v50 = vpop.f32.mrb[17].mxu1 }
 0x124   : > { %v4596_v53 = vadd.f32 %v3173_v49, %v3172_v17  ;;  %v3175_v54 = vpop.f32.mrb[18].mxu0  ;;  %v4598_v56 = vadd.f32 %v3285_v50, %v3284_v18  ;;  %v3287_v57 = vpop.f32.mrb[18].mxu1 }
 0x125   : > { %v3176_v59 = vpop.f32.mrb[19].mxu0  ;;  %v3288_v62 = vpop.f32.mrb[19].mxu1 }
 0x126   : > { %v4601_v19 = vadd.f32 %v3176_v59, %v3175_v54  ;;  %v4603_v20 = vadd.f32 %v3288_v62, %v3287_v57  ;;  %v4026_v57 = vld [vmem:[%s4162_s7 + $0x198] ss:$12 sps:$4 sm:$0xff]  }
 0x127   : > { %2175 = vmatmul.mubr.bf16.gmra.mrb[124].mxu0 %v4424_v21  ;;  %3665 = vmatmul.mubr.bf16.gmra.mrb[92].mxu1 %v4016_v52 }
 0x128   : > { %2182 = vmatprep.mubr.bf16.mxu0 %v4427_v22  ;;  %3668 = vmatprep.mubr.bf16.mxu1 %v4017_v58  ;;  %v4027_v58 = vld [vmem:[%s4162_s7 + $0x1a0] ss:$12 sps:$4 sm:$0xff]  }
 0x12a   : > { %v3178_v63 = vpop.f32.mrb[20].mxu0  ;;  %v3290_v2 = vpop.f32.mrb[20].mxu1 }
 0x12b   : > { %v3179_v4 = vpop.f32.mrb[21].mxu0  ;;  %v3291_v5 = vpop.f32.mrb[21].mxu1 }
 0x12c   : > { %v4608_v8 = vadd.f32 %v3179_v4, %v3178_v63  ;;  %v3181_v11 = vpop.f32.mrb[22].mxu0  ;;  %v4610_v31 = vadd.f32 %v3291_v5, %v3290_v2  ;;  %v3293_v34 = vpop.f32.mrb[22].mxu1 }
 0x12d   : > { %v3182_v42 = vpop.f32.mrb[23].mxu0  ;;  %v3294_v47 = vpop.f32.mrb[23].mxu1 }
 0x12e   : > { %v4613_v21 = vadd.f32 %v3182_v42, %v3181_v11  ;;  %v4615_v22 = vadd.f32 %v3294_v47, %v3293_v34 }
 0x12f   : > { %2183 = vmatmul.mubr.bf16.gmra.mrb[128].mxu0 %v4434_v23  ;;  %3669 = vmatmul.mubr.bf16.gmra.mrb[0].mxu1 %v4018_v7 }
 0x130   : > { %2190 = vmatprep.mubr.bf16.mxu0 %v4437_v25  ;;  %3672 = vmatprep.mubr.bf16.mxu1 %v4019_v39 }
 0x132   : > { %v3184_v24 = vpop.f32.mrb[24].mxu0  ;;  %v3296_v28 = vpop.f32.mrb[24].mxu1 }
 0x133   : > { %v3185_v32 = vpop.f32.mrb[25].mxu0  ;;  %v3297_v55 = vpop.f32.mrb[25].mxu1 }
 0x134   : > { %v4620_v40 = vadd.f32 %v3185_v32, %v3184_v24  ;;  %v3187_v43 = vpop.f32.mrb[26].mxu0  ;;  %v4622_v61 = vadd.f32 %v3297_v55, %v3296_v28  ;;  %v3299_v1 = vpop.f32.mrb[26].mxu1 }
 0x135   : > { %v3188_v6 = vpop.f32.mrb[27].mxu0  ;;  %v3300_v48 = vpop.f32.mrb[27].mxu1 }
 0x136   : > { %v4625_v23 = vadd.f32 %v3188_v6, %v3187_v43  ;;  %v4627_v25 = vadd.f32 %v3300_v48, %v3299_v1 }
 0x137   : > { %2191 = vmatmul.mubr.bf16.gmra.mrb[132].mxu0 %v4444_v26  ;;  %3673 = vmatmul.mubr.bf16.gmra.mrb[4].mxu1 %v4020_v60 }
 0x138   : > { %2198 = vmatprep.mubr.bf16.mxu0 %v4447_v27  ;;  %3676 = vmatprep.mubr.bf16.mxu1 %v4021_v3 }
 0x13a   : > { %v3190_v10 = vpop.f32.mrb[28].mxu0  ;;  %v3302_v12 = vpop.f32.mrb[28].mxu1 }
 0x13b   : > { %v3191_v16 = vpop.f32.mrb[29].mxu0  ;;  %v3303_v30 = vpop.f32.mrb[29].mxu1 }
 0x13c   : > { %v4632_v14 = vadd.f32 %v3191_v16, %v3190_v10  ;;  %v3193_v15 = vpop.f32.mrb[30].mxu0  ;;  %v4634_v37 = vadd.f32 %v3303_v30, %v3302_v12  ;;  %v3305_v41 = vpop.f32.mrb[30].mxu1 }
 0x13d   : > { %v3194_v26 = vpop.f32.mrb[31].mxu0  ;;  %v3306_v17 = vpop.f32.mrb[31].mxu1 }
 0x13e   : > { %v4638_v18 = vadd.f32 %v3194_v26, %v3193_v15  ;;  %v4640_v27 = vadd.f32 %v3306_v17, %v3305_v41 }
 0x13f   : > { %2199 = vmatmul.mubr.bf16.gmra.mrb[136].mxu0 %v4454_v29  ;;  %3677 = vmatmul.mubr.bf16.gmra.mrb[8].mxu1 %v4022_v33 }
 0x140   : > { %2206 = vmatprep.mubr.bf16.mxu0 %v4023_v44  ;;  %3680 = vmatprep.mubr.bf16.mxu1 %v4025_v45 }
 0x142   : > { %v3196_v49 = vpop.f32.mrb[32].mxu0  ;;  %v3308_v50 = vpop.f32.mrb[32].mxu1 }
 0x143   : > { %v3197_v52 = vpop.f32.mrb[33].mxu0  ;;  %v3309_v54 = vpop.f32.mrb[33].mxu1 }
 0x144   : > { %v3198_v59 = vadd.f32 %v3197_v52, %v3196_v49  ;;  %v3199_v62 = vpop.f32.mrb[34].mxu0  ;;  %v4645_v63 = vadd.f32 %v3309_v54, %v3308_v50  ;;  %v3311_v2 = vpop.f32.mrb[34].mxu1 }
 0x145   : > { %v3200_v4 = vpop.f32.mrb[35].mxu0  ;;  %v3312_v5 = vpop.f32.mrb[35].mxu1 }
 0x146   : > { %v3201_v7 = vadd.f32 %v3200_v4, %v3199_v62  ;;  %v4647_v11 = vadd.f32 %v3312_v5, %v3311_v2 }
 0x147   : > { %2207 = vmatmul.mubr.bf16.gmra.mrb[140].mxu0 %v4026_v57  ;;  %3681 = vmatmul.mubr.bf16.gmra.mrb[12].mxu1 %v4027_v58 }
 0x14a   : > { %v3202_v29 = vpop.f32.mrb[36].mxu0  ;;  %v3314_v34 = vpop.f32.mrb[36].mxu1 }
 0x14b   : > { %v3203_v39 = vpop.f32.mrb[37].mxu0  ;;  %v3315_v42 = vpop.f32.mrb[37].mxu1 }
 0x14c   : > { %v3204_v47 = vadd.f32 %v3203_v39, %v3202_v29  ;;  %v3205_v24 = vpop.f32.mrb[38].mxu0  ;;  %v4649_v28 = vadd.f32 %v3315_v42, %v3314_v34  ;;  %v3317_v32 = vpop.f32.mrb[38].mxu1 }
 0x14d   : > { %v3206_v55 = vpop.f32.mrb[39].mxu0  ;;  %v3318_v60 = vpop.f32.mrb[39].mxu1 }
 0x14e   : > { %v3207_v43 = vadd.f32 %v3206_v55, %v3205_v24  ;;  %v4651_v1 = vadd.f32 %v3318_v60, %v3317_v32 }
 0x152   : > { %v3208_v3 = vpop.f32.mrb[40].mxu0  ;;  %v3320_v6 = vpop.f32.mrb[40].mxu1 }
 0x153   : > { %v3209_v48 = vpop.f32.mrb[41].mxu0  ;;  %v3321_v10 = vpop.f32.mrb[41].mxu1 }
 0x154   : > { %v3210_v12 = vadd.f32 %v3209_v48, %v3208_v3  ;;  %v3211_v16 = vpop.f32.mrb[42].mxu0  ;;  %v4653_v30 = vadd.f32 %v3321_v10, %v3320_v6  ;;  %v3323_v33 = vpop.f32.mrb[42].mxu1 }
 0x155   : > { %v3212_v15 = vpop.f32.mrb[43].mxu0  ;;  %v3324_v41 = vpop.f32.mrb[43].mxu1 }
 0x156   : > { %v3213_v44 = vadd.f32 %v3212_v15, %v3211_v16  ;;  %v4655_v45 = vadd.f32 %v3324_v41, %v3323_v33 }
 0x15a   : > { %v3214_v26 = vpop.f32.mrb[44].mxu0  ;;  %v3326_v17 = vpop.f32.mrb[44].mxu1 }
 0x15b   : > { %v3215_v49 = vpop.f32.mrb[45].mxu0  ;;  %v3327_v50 = vpop.f32.mrb[45].mxu1 }
 0x15c   : > { %v3216_v52 = vadd.f32 %v3215_v49, %v3214_v26  ;;  %v3217_v54 = vpop.f32.mrb[46].mxu0  ;;  %v4657_v57 = vadd.f32 %v3327_v50, %v3326_v17  ;;  %v3329_v58 = vpop.f32.mrb[46].mxu1 }
 0x15d   : > { %v3218_v62 = vpop.f32.mrb[47].mxu0  ;;  %v3330_v2 = vpop.f32.mrb[47].mxu1 }
 0x15e   : > { %v3219_v4 = vadd.f32 %v3218_v62, %v3217_v54  ;;  %v4659_v5 = vadd.f32 %v3330_v2, %v3329_v58 }
 0x162   : > { %v3220_v29 = vpop.f32.mrb[48].mxu0  ;;  %v3332_v34 = vpop.f32.mrb[48].mxu1 }
 0x163   : > { %v3221_v39 = vpop.f32.mrb[49].mxu0  ;;  %v3333_v42 = vpop.f32.mrb[49].mxu1 }
 0x164   : > { %v4661_v24 = vadd.f32 %v3221_v39, %v3220_v29  ;;  %v3334_v32 = vadd.f32 %v3333_v42, %v3332_v34  ;;  %v3223_v55 = vpop.f32.mrb[50].mxu0  ;;  %v3335_v60 = vpop.f32.mrb[50].mxu1 }
 0x165   : > { %v3224_v3 = vpop.f32.mrb[51].mxu0  ;;  %v3336_v6 = vpop.f32.mrb[51].mxu1 }
 0x166   : > { %v4663_v48 = vadd.f32 %v3334_v32, %v3198_v59  ;;  %v4665_v10 = vadd.f32 %v3224_v3, %v3223_v55  ;;  %v3337_v16 = vadd.f32 %v3336_v6, %v3335_v60 }
 0x168   : > { %v4667_v33 = vadd.f32 %v3337_v16, %v3201_v7 }
 0x16a   : > { %v3226_v15 = vpop.f32.mrb[52].mxu0  ;;  %v3338_v41 = vpop.f32.mrb[52].mxu1 }
 0x16b   : > { %v3227_v26 = vpop.f32.mrb[53].mxu0  ;;  %v3339_v17 = vpop.f32.mrb[53].mxu1 }
 0x16c   : > { %v4669_v49 = vadd.f32 %v3227_v26, %v3226_v15  ;;  %v3340_v50 = vadd.f32 %v3339_v17, %v3338_v41  ;;  %v3229_v54 = vpop.f32.mrb[54].mxu0  ;;  %v3341_v58 = vpop.f32.mrb[54].mxu1 }
 0x16d   : > { %v3230_v62 = vpop.f32.mrb[55].mxu0  ;;  %v3342_v2 = vpop.f32.mrb[55].mxu1 }
 0x16e   : > { %v4671_v29 = vadd.f32 %v3340_v50, %v3204_v47  ;;  %v4673_v59 = vadd.f32 %v3230_v62, %v3229_v54  ;;  %v3343_v34 = vadd.f32 %v3342_v2, %v3341_v58 }
 0x170   : > { %v4675_v39 = vadd.f32 %v3343_v34, %v3207_v43 }
 0x172   : > { %4930 = vst [vmem:[#allocation2_spill] sm:$0xff] %v4675_v39  ;;  %v3232_v7 = vpop.f32.mrb[56].mxu0  ;;  %v3344_v42 = vpop.f32.mrb[56].mxu1 }
 0x173   : > { %v3233_v32 = vpop.f32.mrb[57].mxu0  ;;  %v3345_v55 = vpop.f32.mrb[57].mxu1 }
 0x174   : > { %v4677_v60 = vadd.f32 %v3233_v32, %v3232_v7  ;;  %v3346_v3 = vadd.f32 %v3345_v55, %v3344_v42  ;;  %v3235_v6 = vpop.f32.mrb[58].mxu0  ;;  %v3347_v16 = vpop.f32.mrb[58].mxu1 }
 0x175   : > { %v3236_v15 = vpop.f32.mrb[59].mxu0  ;;  %v3348_v41 = vpop.f32.mrb[59].mxu1 }
 0x176   : > { %v4679_v26 = vadd.f32 %v3346_v3, %v3210_v12  ;;  %v4681_v47 = vadd.f32 %v3236_v15, %v3235_v6  ;;  %v3349_v17 = vadd.f32 %v3348_v41, %v3347_v16 }
 0x178   : > { %v4683_v50 = vadd.f32 %v3349_v17, %v3213_v44 }
 0x17a   : > { %4931 = vst [vmem:[#allocation3_spill] sm:$0xff] %v4683_v50  ;;  %v3238_v43 = vpop.f32.mrb[60].mxu0  ;;  %v3350_v54 = vpop.f32.mrb[60].mxu1 }
 0x17b   : > { %v3239_v58 = vpop.f32.mrb[61].mxu0  ;;  %v3351_v62 = vpop.f32.mrb[61].mxu1 }
 0x17c   : > { %v4685_v2 = vadd.f32 %v3239_v58, %v3238_v43  ;;  %v3352_v34 = vadd.f32 %v3351_v62, %v3350_v54  ;;  %v3241_v7 = vpop.f32.mrb[62].mxu0  ;;  %v3353_v42 = vpop.f32.mrb[62].mxu1 }
 0x17d   : > { %v3242_v32 = vpop.f32.mrb[63].mxu0  ;;  %v3354_v55 = vpop.f32.mrb[63].mxu1 }
 0x17e   : > { %v4687_v39 = vadd.f32 %v3352_v34, %v3216_v52  ;;  %v4689_v12 = vadd.f32 %v3242_v32, %v3241_v7  ;;  %v3355_v3 = vadd.f32 %v3354_v55, %v3353_v42 }
 0x180   : > { %v4691_v6 = vadd.f32 %v3355_v3, %v3219_v4 }
 0x182   : > { %v3558_v44 = vpop.f32.mrb[64].mxu0  ;;  %v3356_v16 = vpop.f32.mrb[64].mxu1 }
 0x183   : > { %v941_v15 = vadd.f32 %v3558_v44, %v4572_v0  ;;  %v932_v41 = vpop.f32.mrb[65].mxu0  ;;  %v3357_v17 = vpop.f32.mrb[65].mxu1 }
 0x184   : > { %v933_v43 = vadd.f32 %v4563_v51, %v932_v41  ;;  %v3358_v54 = vadd.f32 %v3357_v17, %v3356_v16  ;;  %v3559_v58 = vpop.f32.mrb[66].mxu0  ;;  %v3359_v62 = vpop.f32.mrb[66].mxu1 }
 0x185   : > { %v4696_v50 = vadd.f32 %v4610_v31, %v941_v15  ;;  %v944_v52 = vadd.f32 %v3559_v58, %v4575_v9  ;;  %v935_v34 = vpop.f32.mrb[67].mxu0  ;;  %v3360_v7 = vpop.f32.mrb[67].mxu1 }
 0x186   : > { %v4700_v4 = vadd.f32 %v4598_v56, %v933_v43  ;;  %v4703_v42 = vadd.f32 %v3358_v54, %v4661_v24  ;;  %v936_v0 = vadd.f32 %v4566_v36, %v935_v34  ;;  %v3361_v32 = vadd.f32 %v3360_v7, %v3359_v62 }
 0x187   : > { %v4707_v51 = vadd.f32 %v4615_v22, %v944_v52 }
 0x188   : > { %v4710_v55 = vadd.f32 %v4603_v20, %v936_v0  ;;  %v4713_v31 = vadd.f32 %v3361_v32, %v4665_v10 }
 0x18a   : > { %v3562_v9 = vpop.f32.mrb[68].mxu0  ;;  %v3362_v3 = vpop.f32.mrb[68].mxu1 }
 0x18b   : > { %v957_v56 = vadd.f32 %v3562_v9, %v4588_v38  ;;  %v948_v44 = vpop.f32.mrb[69].mxu0  ;;  %v3363_v16 = vpop.f32.mrb[69].mxu1 }
 0x18c   : > { %v949_v24 = vadd.f32 %v4580_v13, %v948_v44  ;;  %v3364_v15 = vadd.f32 %v3363_v16, %v3362_v3  ;;  %v3563_v36 = vpop.f32.mrb[70].mxu0  ;;  %v3365_v41 = vpop.f32.mrb[70].mxu1 }
 0x18d   : > { %v4718_v22 = vadd.f32 %v4634_v37, %v957_v56  ;;  %v960_v20 = vadd.f32 %v3563_v36, %v4591_v46  ;;  %v951_v17 = vpop.f32.mrb[71].mxu0  ;;  %v3366_v43 = vpop.f32.mrb[71].mxu1 }
 0x18e   : > { %v4722_v10 = vadd.f32 %v4622_v61, %v949_v24  ;;  %v4725_v54 = vadd.f32 %v3364_v15, %v4669_v49  ;;  %v952_v38 = vadd.f32 %v4583_v35, %v951_v17  ;;  %v3367_v58 = vadd.f32 %v3366_v43, %v3365_v41 }
 0x18f   : > { %v4729_v13 = vadd.f32 %v4640_v27, %v960_v20 }
 0x190   : > { %v4732_v62 = vadd.f32 %v4627_v25, %v952_v38  ;;  %v4735_v37 = vadd.f32 %v3367_v58, %v4673_v59 }
 0x192   : > { %v3566_v46 = vpop.f32.mrb[72].mxu0  ;;  %v3368_v52 = vpop.f32.mrb[72].mxu1 }
 0x193   : > { %v973_v61 = vadd.f32 %v3566_v46, %v4608_v8  ;;  %v964_v34 = vpop.f32.mrb[73].mxu0  ;;  %v3369_v7 = vpop.f32.mrb[73].mxu1 }
 0x194   : > { %v965_v49 = vadd.f32 %v4596_v53, %v964_v34  ;;  %v3370_v0 = vadd.f32 %v3369_v7, %v3368_v52  ;;  %v3567_v35 = vpop.f32.mrb[74].mxu0  ;;  %v3371_v32 = vpop.f32.mrb[74].mxu1 }
 0x195   : > { %v4740_v27 = vadd.f32 %v4649_v28, %v973_v61  ;;  %v976_v25 = vadd.f32 %v3567_v35, %v4613_v21  ;;  %v967_v9 = vpop.f32.mrb[75].mxu0  ;;  %v3372_v3 = vpop.f32.mrb[75].mxu1 }
 0x196   : > { %v4744_v59 = vadd.f32 %v4645_v63, %v965_v49  ;;  %v4747_v56 = vadd.f32 %v3370_v0, %v4677_v60  ;;  %v968_v8 = vadd.f32 %v4601_v19, %v967_v9  ;;  %v3373_v44 = vadd.f32 %v3372_v3, %v3371_v32 }
 0x197   : > { %v4751_v53 = vadd.f32 %v4651_v1, %v976_v25 }
 0x198   : > { %v1289_v16 = vadd.f32 %v4647_v11, %v968_v8  ;;  %v4755_v28 = vadd.f32 %v3373_v44, %v4681_v47 }
 0x19a   : > { %v3570_v21 = vpop.f32.mrb[76].mxu0  ;;  %v3374_v24 = vpop.f32.mrb[76].mxu1 }
 0x19b   : > { %v989_v15 = vadd.f32 %v3570_v21, %v4632_v14  ;;  %v980_v63 = vpop.f32.mrb[77].mxu0  ;;  %v3375_v36 = vpop.f32.mrb[77].mxu1 }
 0x19c   : > { %v981_v60 = vadd.f32 %v4620_v40, %v980_v63  ;;  %v3376_v41 = vadd.f32 %v3375_v36, %v3374_v24  ;;  %v3571_v20 = vpop.f32.mrb[78].mxu0  ;;  %v3377_v19 = vpop.f32.mrb[78].mxu1 }
 0x19d   : > { %v4760_v17 = vadd.f32 %v4657_v57, %v989_v15  ;;  %v992_v1 = vadd.f32 %v3571_v20, %v4638_v18  ;;  %v983_v11 = vpop.f32.mrb[79].mxu0  ;;  %v3378_v43 = vpop.f32.mrb[79].mxu1 }
 0x19e   : > { %v1302_v47 = vadd.f32 %v4653_v30, %v981_v60  ;;  %v4765_v38 = vadd.f32 %v3376_v41, %v4685_v2  ;;  %v984_v14 = vadd.f32 %v4625_v23, %v983_v11  ;;  %v3379_v58 = vadd.f32 %v3378_v43, %v3377_v19 }
 0x19f   : > { %v4769_v40 = vadd.f32 %v4659_v5, %v992_v1 }
 0x1a0   : > { %v1305_v46 = vadd.f32 %v4655_v45, %v984_v14  ;;  %v4773_v57 = vadd.f32 %v3379_v58, %v4689_v12 }
 0x1a2   : > { %v3420_v52 = vpop.f32.mrb[80].mxu0 }
 0x1a3   : > { %v3421_v18 = vpop.f32.mrb[81].mxu0 }
 0x1a4   : > { %v3422_v61 = vadd.f32 %v3421_v18, %v3420_v52  ;;  %v3423_v34 = vpop.f32.mrb[82].mxu0 }
 0x1a5   : > { %v3424_v7 = vpop.f32.mrb[83].mxu0 }
 0x1a6   : > { %v3425_v30 = vadd.f32 %v3424_v7, %v3423_v34  ;;  %v4776_v2 = vadd.f32 %v3422_v61, %v4700_v4 }
 0x1a8   : > { %v4779_v23 = vadd.f32 %v3425_v30, %v4710_v55 }
 0x1aa   : > { %v3426_v49 = vpop.f32.mrb[84].mxu0 }
 0x1ab   : > { %v3427_v5 = vpop.f32.mrb[85].mxu0 }
 0x1ac   : > { %v3428_v0 = vadd.f32 %v3427_v5, %v3426_v49  ;;  %v3429_v35 = vpop.f32.mrb[86].mxu0 }
 0x1ad   : > { %v3430_v45 = vpop.f32.mrb[87].mxu0 }
 0x1ae   : > { %v3431_v32 = vadd.f32 %v3430_v45, %v3429_v35  ;;  %v3702_v12 = vadd.f32 %v3428_v0, %v4696_v50 }
 0x1b0   : > { %v3710_v25 = vadd.f32 %v3431_v32, %v4707_v51 }
 0x1b2   : > { %v3432_v9 = vpop.f32.mrb[88].mxu0 }
 0x1b3   : > { %v3433_v3 = vpop.f32.mrb[89].mxu0 }
 0x1b4   : > { %v3434_v8 = vadd.f32 %v3433_v3, %v3432_v9  ;;  %v3435_v44 = vpop.f32.mrb[90].mxu0 }
 0x1b5   : > { %v3436_v21 = vpop.f32.mrb[91].mxu0 }
 0x1b6   : > { %v3437_v4 = vadd.f32 %v3436_v21, %v3435_v44  ;;  %v4784_v24 = vadd.f32 %v3434_v8, %v4722_v10 }
 0x1b8   : > { %v4787_v55 = vadd.f32 %v3437_v4, %v4732_v62 }
 0x1ba   : > { %v3438_v15 = vpop.f32.mrb[92].mxu0 }
 0x1bb   : > { %v3439_v63 = vpop.f32.mrb[93].mxu0 }
 0x1bc   : > { %v3440_v36 = vadd.f32 %v3439_v63, %v3438_v15  ;;  %v3441_v60 = vpop.f32.mrb[94].mxu0 }
 0x1bd   : > { %v3442_v41 = vpop.f32.mrb[95].mxu0 }
 0x1be   : > { %v3443_v50 = vadd.f32 %v3442_v41, %v3441_v60  ;;  %v4790_v51 = vadd.f32 %v3440_v36, %v4718_v22 }
 0x1c0   : > { %v4793_v20 = vadd.f32 %v3443_v50, %v4729_v13 }
 0x1c2   : > { %v3444_v19 = vpop.f32.mrb[96].mxu0 }
 0x1c3   : > { %v3445_v1 = vpop.f32.mrb[97].mxu0 }
 0x1c4   : > { %v3446_v11 = vadd.f32 %v3445_v1, %v3444_v19  ;;  %v3447_v10 = vpop.f32.mrb[98].mxu0 }
 0x1c5   : > { %v3448_v43 = vpop.f32.mrb[99].mxu0 }
 0x1c6   : > { %v3449_v14 = vadd.f32 %v3448_v43, %v3447_v10  ;;  %v4796_v62 = vadd.f32 %v3446_v11, %v4744_v59 }
 0x1c8   : > { %v4798_v58 = vadd.f32 %v3449_v14, %v1289_v16 }
 0x1ca   : > { %v3450_v52 = vpop.f32.mrb[100].mxu0 }
 0x1cb   : > { %v3451_v18 = vpop.f32.mrb[101].mxu0 }
 0x1cc   : > { %v3452_v61 = vadd.f32 %v3451_v18, %v3450_v52  ;;  %v3453_v34 = vpop.f32.mrb[102].mxu0 }
 0x1cd   : > { %v3454_v22 = vpop.f32.mrb[103].mxu0 }
 0x1ce   : > { %v3455_v7 = vadd.f32 %v3454_v22, %v3453_v34  ;;  %v4801_v13 = vadd.f32 %v3452_v61, %v4740_v27 }
 0x1d0   : > { %v4804_v30 = vadd.f32 %v3455_v7, %v4751_v53 }
 0x1d2   : > { %v3456_v49 = vpop.f32.mrb[104].mxu0 }
 0x1d3   : > { %v3457_v5 = vpop.f32.mrb[105].mxu0 }
 0x1d4   : > { %v3458_v0 = vadd.f32 %v3457_v5, %v3456_v49  ;;  %v3459_v35 = vpop.f32.mrb[106].mxu0 }
 0x1d5   : > { %v3460_v59 = vpop.f32.mrb[107].mxu0 }
 0x1d6   : > { %v3461_v45 = vadd.f32 %v3460_v59, %v3459_v35  ;;  %v4806_v16 = vadd.f32 %v3458_v0, %v1302_v47  ;;  %v4819_v47 = vld [vmem:[%s4928_s2] ss:$0 sm:$0xff] }
 0x1d8   : > { %v4808_v32 = vadd.f32 %v3461_v45, %v1305_v46 }
 0x1da   : > { %v3462_v9 = vpop.f32.mrb[108].mxu0 }
 0x1db   : > { %v3463_v3 = vpop.f32.mrb[109].mxu0 }
 0x1dc   : > { %v3464_v8 = vadd.f32 %v3463_v3, %v3462_v9  ;;  %v3465_v44 = vpop.f32.mrb[110].mxu0 }
 0x1dd   : > { %v3466_v21 = vpop.f32.mrb[111].mxu0 }
 0x1de   : > { %v3467_v27 = vadd.f32 %v3466_v21, %v3465_v44  ;;  %v4811_v4 = vadd.f32 %v3464_v8, %v4760_v17 }
 0x1e0   : > { %v4814_v53 = vadd.f32 %v3467_v27, %v4769_v40 }
 0x1e2   : > { %v3468_v15 = vpop.f32.mrb[112].mxu0  ;;  %v3654_v63 = vpop.f32.mrb[80].mxu1 }
 0x1e3   : > { %v3703_v46 = vadd.f32 %v3702_v12, %v3654_v63  ;;  %v3469_v36 = vpop.f32.mrb[113].mxu0  ;;  %v2249_v60 = vpop.f32.mrb[81].mxu1 }
 0x1e4   : > { %v3470_v41 = vadd.f32 %v3469_v36, %v3468_v15  ;;  %v3707_v50 = vadd.f32 %v4776_v2, %v2249_v60  ;;  %v3471_v19 = vpop.f32.mrb[114].mxu0  ;;  %v3655_v17 = vpop.f32.mrb[82].mxu1  ;;  %v4932_v60 = vld [vmem:[#allocation2_spill] sm:$0xff] }
 0x1e5   : > { %v2417_v1 = vadd.f32 %v3703_v46, %v4819_v47  ;;  %v3711_v40 = vadd.f32 %v3710_v25, %v3655_v17  ;;  %v3472_v11 = vpop.f32.mrb[115].mxu0  ;;  %v2252_v10 = vpop.f32.mrb[83].mxu1 }
 0x1e6   : > { %v2415_v43 = vadd.f32 %v3707_v50, %v4819_v47  ;;  %v3473_v14 = vadd.f32 %v3472_v11, %v3471_v19  ;;  %v3715_v52 = vadd.f32 %v4779_v23, %v2252_v10  ;;  %v4826_v18 = vadd.f32 %v4663_v48, %v3470_v41 }
 0x1e7   : > { %v2418_v12 = vadd.f32 %v3711_v40, %v4819_v47  ;;  %v2449_v34 = vmax.f32 %v2417_v1, 0.0 }
 0x1e8   : > { %v2416_v2 = vadd.f32 %v3715_v52, %v4819_v47  ;;  %v4832_v61 = vadd.f32 %v4667_v33, %v3473_v14  ;;  %v2447_v22 = vmax.f32 %v2415_v43, 0.0 }
 0x1e9   : > { %v2450_v25 = vmax.f32 %v2418_v12, 0.0 }
 0x1ea   : > { %v2448_v23 = vmax.f32 %v2416_v2, 0.0  ;;  %v3474_v48 = vpop.f32.mrb[116].mxu0  ;;  %v3658_v7 = vpop.f32.mrb[84].mxu1 }
 0x1eb   : > { %v3045_v49 = vpack.c.bf16 %v2450_v25, %v2449_v34  ;;  %v3719_v5 = vadd.f32 %v4790_v51, %v3658_v7  ;;  %v3475_v0 = vpop.f32.mrb[117].mxu0  ;;  %v2265_v35 = vpop.f32.mrb[85].mxu1 }
 0x1ec   : > { %v3040_v33 = vpack.c.bf16 %v2448_v23, %v2447_v22  ;;  %v3476_v59 = vadd.f32 %v3475_v0, %v3474_v48  ;;  %v3723_v45 = vadd.f32 %v4784_v24, %v2265_v35  ;;  %v3477_v9 = vpop.f32.mrb[118].mxu0  ;;  %v3659_v3 = vpop.f32.mrb[86].mxu1  ;;  %v4933_v0 = vld [vmem:[#allocation3_spill] sm:$0xff] }
 0x1ed   : > { %3117 = vst [vmem:[%s4837_s20 + $0x8] sm:$0xff] %v3045_v49   ;;  %v2421_v8 = vadd.f32 %v3719_v5, %v4819_v47  ;;  %v3727_v44 = vadd.f32 %v4793_v20, %v3659_v3  ;;  %v3478_v21 = vpop.f32.mrb[119].mxu0  ;;  %v2268_v27 = vpop.f32.mrb[87].mxu1 }
 0x1ee   : > { %3041 = vst [vmem:[%s4837_s20] sm:$0xff] %v3040_v33   ;;  %v2419_v15 = vadd.f32 %v3723_v45, %v4819_v47  ;;  %v3479_v63 = vadd.f32 %v3478_v21, %v3477_v9  ;;  %v3731_v51 = vadd.f32 %v4787_v55, %v2268_v27  ;;  %v4848_v46 = vadd.f32 %v4671_v29, %v3476_v59 }
 0x1ef   : > { %v2422_v24 = vadd.f32 %v3727_v44, %v4819_v47  ;;  %v2453_v20 = vmax.f32 %v2421_v8, 0.0 }
 0x1f0   : > { %v2420_v36 = vadd.f32 %v3731_v51, %v4819_v47  ;;  %v4853_v41 = vadd.f32 %v4932_v60, %v3479_v63  ;;  %v2451_v19 = vmax.f32 %v2419_v15, 0.0 }
 0x1f1   : > { %v2454_v50 = vmax.f32 %v2422_v24, 0.0 }
 0x1f2   : > { %v2452_v17 = vmax.f32 %v2420_v36, 0.0  ;;  %v3480_v1 = vpop.f32.mrb[120].mxu0  ;;  %v3662_v40 = vpop.f32.mrb[88].mxu1 }
 0x1f3   : > { %v3055_v11 = vpack.c.bf16 %v2454_v50, %v2453_v20  ;;  %v3735_v55 = vadd.f32 %v4801_v13, %v3662_v40  ;;  %v3481_v29 = vpop.f32.mrb[121].mxu0  ;;  %v2281_v10 = vpop.f32.mrb[89].mxu1 }
 0x1f4   : > { %v3050_v43 = vpack.c.bf16 %v2452_v17, %v2451_v19  ;;  %v3482_v14 = vadd.f32 %v3481_v29, %v3480_v1  ;;  %v3739_v52 = vadd.f32 %v4796_v62, %v2281_v10  ;;  %v3483_v12 = vpop.f32.mrb[122].mxu0  ;;  %v3663_v2 = vpop.f32.mrb[90].mxu1 }
 0x1f5   : > { %3119 = vst [vmem:[%s4837_s20 + $0x18] sm:$0xff] %v3055_v11   ;;  %v2425_v34 = vadd.f32 %v3735_v55, %v4819_v47  ;;  %v3743_v25 = vadd.f32 %v4804_v30, %v3663_v2  ;;  %v3484_v22 = vpop.f32.mrb[123].mxu0  ;;  %v2284_v23 = vpop.f32.mrb[91].mxu1 }
 0x1f6   : > { %3118 = vst [vmem:[%s4837_s20 + $0x10] sm:$0xff] %v3050_v43   ;;  %v2423_v48 = vadd.f32 %v3739_v52, %v4819_v47  ;;  %v3485_v7 = vadd.f32 %v3484_v22, %v3483_v12  ;;  %v3747_v13 = vadd.f32 %v4798_v58, %v2284_v23  ;;  %v4864_v49 = vadd.f32 %v4679_v26, %v3482_v14 }
 0x1f7   : > { %v2426_v62 = vadd.f32 %v3743_v25, %v4819_v47  ;;  %v2457_v30 = vmax.f32 %v2425_v34, 0.0 }
 0x1f8   : > { %v2424_v5 = vadd.f32 %v3747_v13, %v4819_v47  ;;  %v4869_v35 = vadd.f32 %v4933_v0, %v3485_v7  ;;  %v2455_v59 = vmax.f32 %v2423_v48, 0.0 }
 0x1f9   : > { %v2458_v33 = vmax.f32 %v2426_v62, 0.0 }
 0x1fa   : > { %v2456_v45 = vmax.f32 %v2424_v5, 0.0  ;;  %v3486_v9 = vpop.f32.mrb[124].mxu0  ;;  %v3666_v3 = vpop.f32.mrb[92].mxu1 }
 0x1fb   : > { %v3065_v8 = vpack.c.bf16 %v2458_v33, %v2457_v30  ;;  %v3751_v58 = vadd.f32 %v4811_v4, %v3666_v3  ;;  %v3487_v26 = vpop.f32.mrb[125].mxu0  ;;  %v2297_v44 = vpop.f32.mrb[93].mxu1 }
 0x1fc   : > { %v3060_v21 = vpack.c.bf16 %v2456_v45, %v2455_v59  ;;  %v3488_v27 = vadd.f32 %v3487_v26, %v3486_v9  ;;  %v3755_v15 = vadd.f32 %v4806_v16, %v2297_v44  ;;  %v3489_v63 = vpop.f32.mrb[126].mxu0  ;;  %v3667_v51 = vpop.f32.mrb[94].mxu1 }
 0x1fd   : > { %3121 = vst [vmem:[%s4837_s20 + $0x28] sm:$0xff] %v3065_v8   ;;  %v2429_v24 = vadd.f32 %v3751_v58, %v4819_v47  ;;  %v3759_v36 = vadd.f32 %v4814_v53, %v3667_v51  ;;  %v3490_v60 = vpop.f32.mrb[127].mxu0  ;;  %v2300_v20 = vpop.f32.mrb[95].mxu1 }
 0x1fe   : > { %3120 = vst [vmem:[%s4837_s20 + $0x20] sm:$0xff] %v3060_v21   ;;  %v2427_v50 = vadd.f32 %v3755_v15, %v4819_v47  ;;  %v3491_v19 = vadd.f32 %v3490_v60, %v3489_v63  ;;  %v3763_v4 = vadd.f32 %v4808_v32, %v2300_v20  ;;  %v3777_v17 = vadd.f32 %v4687_v39, %v3488_v27 }
 0x1ff   : > { %v2430_v1 = vadd.f32 %v3759_v36, %v4819_v47  ;;  %v2461_v11 = vmax.f32 %v2429_v24, 0.0 }
 0x200   : > { %v2428_v16 = vadd.f32 %v3763_v4, %v4819_v47  ;;  %v3783_v40 = vadd.f32 %v4691_v6, %v3491_v19  ;;  %v2459_v53 = vmax.f32 %v2427_v50, 0.0 }
 0x201   : > { %v2462_v55 = vmax.f32 %v2430_v1, 0.0 }
 0x202   : > { %v2460_v29 = vmax.f32 %v2428_v16, 0.0  ;;  %v3492_v10 = vpop.f32.mrb[128].mxu0  ;;  %v3670_v43 = vpop.f32.mrb[0].mxu1 }
 0x203   : > { %v3075_v14 = vpack.c.bf16 %v2462_v55, %v2461_v11  ;;  %v3766_v52 = vadd.f32 %v4848_v46, %v3670_v43  ;;  %v3493_v32 = vpop.f32.mrb[129].mxu0  ;;  %v2313_v12 = vpop.f32.mrb[1].mxu1 }
 0x204   : > { %v3070_v39 = vpack.c.bf16 %v2460_v29, %v2459_v53  ;;  %v3494_v2 = vadd.f32 %v3493_v32, %v3492_v10  ;;  %v3769_v34 = vadd.f32 %v4826_v18, %v2313_v12  ;;  %v3495_v25 = vpop.f32.mrb[130].mxu0  ;;  %v3671_v22 = vpop.f32.mrb[2].mxu1 }
 0x205   : > { %3123 = vst [vmem:[%s4837_s20 + $0x38] sm:$0xff] %v3075_v14   ;;  %v2433_v6 = vadd.f32 %v3766_v52, %v4819_v47  ;;  %v3772_v23 = vadd.f32 %v4853_v41, %v3671_v22  ;;  %v3496_v48 = vpop.f32.mrb[131].mxu0  ;;  %v2316_v7 = vpop.f32.mrb[3].mxu1 }
 0x206   : > { %3122 = vst [vmem:[%s4837_s20 + $0x30] sm:$0xff] %v3070_v39   ;;  %v2431_v13 = vadd.f32 %v3769_v34, %v4819_v47  ;;  %v3497_v62 = vadd.f32 %v3496_v48, %v3495_v25  ;;  %v3775_v46 = vadd.f32 %v4832_v61, %v2316_v7  ;;  %v3792_v5 = vadd.f32 %v4703_v42, %v3494_v2 }
 0x207   : > { %v2434_v0 = vadd.f32 %v3772_v23, %v4819_v47  ;;  %v2465_v33 = vmax.f32 %v2433_v6, 0.0 }
 0x208   : > { %v2432_v18 = vadd.f32 %v3775_v46, %v4819_v47  ;;  %v3798_v30 = vadd.f32 %v4713_v31, %v3497_v62  ;;  %v2463_v41 = vmax.f32 %v2431_v13, 0.0 }
 0x209   : > { %v2466_v59 = vmax.f32 %v2434_v0, 0.0 }
 0x20a   : > { %v2464_v45 = vmax.f32 %v2432_v18, 0.0  ;;  %v3498_v9 = vpop.f32.mrb[132].mxu0  ;;  %v3674_v3 = vpop.f32.mrb[4].mxu1 }
 0x20b   : > { %v3085_v8 = vpack.c.bf16 %v2466_v59, %v2465_v33  ;;  %v3778_v58 = vadd.f32 %v3777_v17, %v3674_v3  ;;  %v3499_v26 = vpop.f32.mrb[133].mxu0  ;;  %v2329_v61 = vpop.f32.mrb[5].mxu1 }
 0x20c   : > { %v3080_v44 = vpack.c.bf16 %v2464_v45, %v2463_v41  ;;  %v3500_v42 = vadd.f32 %v3499_v26, %v3498_v9  ;;  %v3781_v21 = vadd.f32 %v4864_v49, %v2329_v61  ;;  %v3501_v27 = vpop.f32.mrb[134].mxu0  ;;  %v3675_v15 = vpop.f32.mrb[6].mxu1 }
 0x20d   : > { %3125 = vst [vmem:[%s4837_s20 + $0x48] sm:$0xff] %v3085_v8   ;;  %v2437_v31 = vadd.f32 %v3778_v58, %v4819_v47  ;;  %v3784_v63 = vadd.f32 %v3783_v40, %v3675_v15  ;;  %v3502_v51 = vpop.f32.mrb[135].mxu0  ;;  %v2332_v24 = vpop.f32.mrb[7].mxu1 }
 0x20e   : > { %3124 = vst [vmem:[%s4837_s20 + $0x40] sm:$0xff] %v3080_v44   ;;  %v2435_v36 = vadd.f32 %v3781_v21, %v4819_v47  ;;  %v3503_v60 = vadd.f32 %v3502_v51, %v3501_v27  ;;  %v3787_v20 = vadd.f32 %v4869_v35, %v2332_v24  ;;  %v3789_v50 = vadd.f32 %v4725_v54, %v3500_v42 }
 0x20f   : > { %v2438_v19 = vadd.f32 %v3784_v63, %v4819_v47  ;;  %v2469_v17 = vmax.f32 %v2437_v31, 0.0 }
 0x210   : > { %v2436_v49 = vadd.f32 %v3787_v20, %v4819_v47  ;;  %v3795_v4 = vadd.f32 %v4735_v37, %v3503_v60  ;;  %v2467_v16 = vmax.f32 %v2435_v36, 0.0 }
 0x211   : > { %v2470_v1 = vmax.f32 %v2438_v19, 0.0 }
 0x212   : > { %v2468_v40 = vmax.f32 %v2436_v49, 0.0  ;;  %v3504_v11 = vpop.f32.mrb[136].mxu0  ;;  %v3678_v55 = vpop.f32.mrb[8].mxu1 }
 0x213   : > { %v3095_v53 = vpack.c.bf16 %v2470_v1, %v2469_v17  ;;  %v3790_v29 = vadd.f32 %v3789_v50, %v3678_v55  ;;  %v3505_v10 = vpop.f32.mrb[137].mxu0  ;;  %v2345_v35 = vpop.f32.mrb[9].mxu1 }
 0x214   : > { %v3090_v43 = vpack.c.bf16 %v2468_v40, %v2467_v16  ;;  %v3506_v54 = vadd.f32 %v3505_v10, %v3504_v11  ;;  %v3793_v14 = vadd.f32 %v3792_v5, %v2345_v35  ;;  %v3507_v52 = vpop.f32.mrb[138].mxu0  ;;  %v3679_v32 = vpop.f32.mrb[10].mxu1 }
 0x215   : > { %3127 = vst [vmem:[%s4837_s20 + $0x58] sm:$0xff] %v3095_v53   ;;  %v2441_v37 = vadd.f32 %v3790_v29, %v4819_v47  ;;  %v3796_v12 = vadd.f32 %v3795_v4, %v3679_v32  ;;  %v3508_v39 = vpop.f32.mrb[139].mxu0  ;;  %v2348_v2 = vpop.f32.mrb[11].mxu1 }
 0x216   : > { %3126 = vst [vmem:[%s4837_s20 + $0x50] sm:$0xff] %v3090_v43   ;;  %v2439_v34 = vadd.f32 %v3793_v14, %v4819_v47  ;;  %v3509_v25 = vadd.f32 %v3508_v39, %v3507_v52  ;;  %v3799_v22 = vadd.f32 %v3798_v30, %v2348_v2  ;;  %v3804_v6 = vadd.f32 %v4747_v56, %v3506_v54 }
 0x217   : > { %v2442_v23 = vadd.f32 %v3796_v12, %v4819_v47  ;;  %v2473_v13 = vmax.f32 %v2441_v37, 0.0 }
 0x218   : > { %v2440_v48 = vadd.f32 %v3799_v22, %v4819_v47  ;;  %v3810_v7 = vadd.f32 %v4755_v28, %v3509_v25  ;;  %v2471_v46 = vmax.f32 %v2439_v34, 0.0 }
 0x219   : > { %v2474_v62 = vmax.f32 %v2442_v23, 0.0 }
 0x21a   : > { %v2472_v5 = vmax.f32 %v2440_v48, 0.0  ;;  %v3510_v0 = vpop.f32.mrb[140].mxu0  ;;  %v3682_v18 = vpop.f32.mrb[12].mxu1 }
 0x21b   : > { %v3105_v33 = vpack.c.bf16 %v2474_v62, %v2473_v13  ;;  %v3511_v59 = vpop.f32.mrb[141].mxu0  ;;  %v2361_v41 = vpop.f32.mrb[13].mxu1 }
 0x21c   : > { %v3100_v30 = vpack.c.bf16 %v2472_v5, %v2471_v46  ;;  %v3512_v45 = vadd.f32 %v3511_v59, %v3510_v0  ;;  %v3805_v56 = vadd.f32 %v3804_v6, %v2361_v41  ;;  %v3513_v9 = vpop.f32.mrb[142].mxu0  ;;  %v3683_v3 = vpop.f32.mrb[14].mxu1 }
 0x21d   : > { %3129 = vst [vmem:[%s4837_s20 + $0x68] sm:$0xff] %v3105_v33   ;;  %v3514_v8 = vpop.f32.mrb[143].mxu0  ;;  %v2364_v58 = vpop.f32.mrb[15].mxu1 }
 0x21e   : > { %3128 = vst [vmem:[%s4837_s20 + $0x60] sm:$0xff] %v3100_v30   ;;  %v3801_v28 = vadd.f32 %v4765_v38, %v3512_v45  ;;  %v2443_v26 = vadd.f32 %v3805_v56, %v4819_v47  ;;  %v3515_v61 = vadd.f32 %v3514_v8, %v3513_v9  ;;  %v3811_v44 = vadd.f32 %v3810_v7, %v2364_v58 }
 0x220   : > { %v3802_v42 = vadd.f32 %v3801_v28, %v3682_v18  ;;  %v3807_v21 = vadd.f32 %v4773_v57, %v3515_v61  ;;  %v2444_v27 = vadd.f32 %v3811_v44, %v4819_v47  ;;  %v2475_v31 = vmax.f32 %v2443_v26, 0.0 }
 0x222   : > { %v2445_v15 = vadd.f32 %v3802_v42, %v4819_v47  ;;  %v3808_v63 = vadd.f32 %v3807_v21, %v3683_v3  ;;  %v2476_v51 = vmax.f32 %v2444_v27, 0.0 }
 0x224   : > { %v2446_v24 = vadd.f32 %v3808_v63, %v4819_v47  ;;  %v3110_v36 = vpack.c.bf16 %v2476_v51, %v2475_v31  ;;  %v2477_v60 = vmax.f32 %v2445_v15, 0.0 }
 0x226   : > { %v2478_v38 = vmax.f32 %v2446_v24, 0.0  ;;  %3130 = vst [vmem:[%s4837_s20 + $0x70] sm:$0xff] %v3110_v36  }
 0x228   : > { %v3115_v20 = vpack.c.bf16 %v2478_v38, %v2477_v60 }
 0x22a   : > { %3131 = vst [vmem:[%s4837_s20 + $0x78] sm:$0xff] %v3115_v20  }
 0x22b PF: > { %s13_s12 = sadd.s32 1, %s4034_s12  }
 0x22c   : > { %p10_p4 = scmp.ge.s32.totalorder %s13_s12, 4  }
 0x22e   :  { %12 = sbr.rel (!%p10_p4) target bundleno = 1 (0x1), region = 64 }

</bundles_post_ra>
